<compile_context>
chip_gen: v7x
topology: tpu7x:2x2x1
jax: 0.10.0
libtpu: 0.0.40
codegen_flags: <defaults>
</compile_context>

<pallas_src>
import jax
import jax.numpy as jnp
from jax.experimental import pallas as pl
from jax.experimental.pallas import tpu as pltpu


def rnn_encoder_kernel(
    x_ref,        # (1, T*BB, d_e)   batch-block of embedded tokens, row = t*BB + b
    lens_ref,     # (BB, 1) int32    sequence lengths for this batch block
    wih_f_ref,    # (3, d_e, d_h)    forward  input->hidden weights per gate [r, z, n]
    whh_f_ref,    # (3, d_h, d_h)    forward  hidden->hidden weights per gate
    bi_f_ref,     # (3, 1, d_h)      forward  folded biases: [bir+bhr, biz+bhz, bin]
    bhn_f_ref,    # (1, d_h)         forward  bhh_n (must stay inside r * (...))
    wih_b_ref, whh_b_ref, bi_b_ref, bhn_b_ref,   # backward direction, same layout
    wmu_f_ref,    # (d_h, d_zp)      q_mu rows for the forward hidden state
    wmu_b_ref,    # (d_h, d_zp)      q_mu rows for the backward hidden state
    bmu_ref,      # (1, d_zp)
    out_ref,      # (BB, d_zp)
    gf_r, gf_z, gf_n,   # scratch (T*BB, d_h): precomputed input gates, forward
    gb_r, gb_z, gb_n,   # scratch (T*BB, d_h): precomputed input gates, backward
):
    _, TB, _ = x_ref.shape
    BB = out_ref.shape[0]
    d_h = whh_f_ref.shape[-1]
    T = TB // BB

    # ---- phase 1: hoisted input projections (time-batched MXU matmuls, lane-aligned
    # per gate). Biases are folded here, so the serial loop has no bias broadcasts.
    x_flat = x_ref[0]                                   # (T*BB, d_e)
    for g, (gf, gb) in enumerate(((gf_r, gb_r), (gf_z, gb_z), (gf_n, gb_n))):
        gf[...] = (jnp.dot(x_flat, wih_f_ref[g], preferred_element_type=jnp.float32)
                   + bi_f_ref[g])
        gb[...] = (jnp.dot(x_flat, wih_b_ref[g], preferred_element_type=jnp.float32)
                   + bi_b_ref[g])

    lens = lens_ref[...]                                # (BB, 1) int32

    # ---- phase 2: serial recurrence; only h @ W_hh remains per step. Hidden states
    # are fori_loop carries (vregs), not VMEM round-trips.
    def gru_step(t, h, g_r, g_z, g_n, whh_ref, bhn_ref):
        rows = pl.ds(pl.multiple_of(t * BB, BB), BB)    # sublane-aligned slice of GI
        gh_r = jnp.dot(h, whh_ref[0], preferred_element_type=jnp.float32)
        gh_z = jnp.dot(h, whh_ref[1], preferred_element_type=jnp.float32)
        gh_n = jnp.dot(h, whh_ref[2], preferred_element_type=jnp.float32) + bhn_ref[...]
        r = jax.nn.sigmoid(g_r[rows, :] + gh_r)
        z = jax.nn.sigmoid(g_z[rows, :] + gh_z)
        n = jnp.tanh(g_n[rows, :] + r * gh_n)
        h_new = (1.0 - z) * n + z * h
        # pack_sequence semantics: freeze h once past this sequence's length
        return jnp.where(lens > t, h_new, h)

    def body(s, carry):
        hf, hb = carry
        hf = gru_step(s, hf, gf_r, gf_z, gf_n, whh_f_ref, bhn_f_ref)
        hb = gru_step(T - 1 - s, hb, gb_r, gb_z, gb_n, whh_b_ref, bhn_b_ref)
        return hf, hb

    h0 = jnp.zeros((BB, d_h), jnp.float32)
    hf, hb = jax.lax.fori_loop(0, T, body, (h0, h0), unroll=True)

    # ---- phase 3: q_mu projection; split-dot == concat([hf, hb], -1) @ Wmu.
    out_ref[...] = (jnp.dot(hf, wmu_f_ref[...], preferred_element_type=jnp.float32)
                    + jnp.dot(hb, wmu_b_ref[...], preferred_element_type=jnp.float32)
                    + bmu_ref[...])


def rnn_encoder_forward(tokens, lens, params, *, batch_block=8):
    """tokens: (B, T) int32 padded with PAD; lens: (B,) valid lengths."""
    X = params["emb"][tokens].astype(jnp.float32)       # (B, T, d_e)  embedding gather (glue)
    B, T, d_e = X.shape
    d_h = params["whh_f"].shape[0]
    d_z = params["wmu"].shape[1]

    BB = batch_block
    assert BB % 8 == 0, "batch block must be a multiple of 8 sublanes"
    n_bb = -(-B // BB)
    Bp = n_bb * BB
    d_zp = 128 * (-(-d_z // 128))                       # lane-dense output width

    # ---- batch pad + batch-block/time-major layout: row index inside a block = t*BB + b
    Xp = jnp.zeros((Bp, T, d_e), jnp.float32).at[:B].set(X)
    X_blk = (Xp.reshape(n_bb, BB, T, d_e)
               .transpose(0, 2, 1, 3)
               .reshape(n_bb, T * BB, d_e))
    lens_p = jnp.zeros((Bp, 1), jnp.int32).at[:B, 0].set(lens.astype(jnp.int32))

    # ---- split weights per gate (PyTorch order [r | z | n]) so gates stay lane-aligned
    def split_w(w):   # (in, 3*d_h) -> (3, in, d_h)
        return jnp.stack([w[:, :d_h], w[:, d_h:2 * d_h], w[:, 2 * d_h:]], axis=0)

    def split_b(b):   # (1, 3*d_h) -> (3, 1, d_h)
        return jnp.stack([b[:, :d_h], b[:, d_h:2 * d_h], b[:, 2 * d_h:]], axis=0)

    wih_f, whh_f = split_w(params["wih_f"]), split_w(params["whh_f"])
    wih_b, whh_b = split_w(params["wih_b"]), split_w(params["whh_b"])
    bih_f, bhh_f = split_b(params["bih_f"]), split_b(params["bhh_f"])
    bih_b, bhh_b = split_b(params["bih_b"]), split_b(params["bhh_b"])
    # fold input+hidden biases for r and z; n's hidden bias stays inside r * (...)
    bi_f = bih_f.at[:2].add(bhh_f[:2])
    bi_b = bih_b.at[:2].add(bhh_b[:2])
    bhn_f, bhn_b = bhh_f[2], bhh_b[2]

    # lane-dense q_mu: pad d_z to a multiple of 128, split the concat into two dots
    wmu_p = jnp.zeros((2 * d_h, d_zp), jnp.float32).at[:, :d_z].set(params["wmu"])
    bmu_p = jnp.zeros((1, d_zp), jnp.float32).at[:, :d_z].set(params["bmu"])
    wmu_f, wmu_b = wmu_p[:d_h], wmu_p[d_h:]

    def full_spec(a):   # whole array, constant block (weights / biases)
        nd = a.ndim
        return pl.BlockSpec(a.shape, lambda i, _n=nd: (0,) * _n)

    out = pl.pallas_call(
        rnn_encoder_kernel,
        out_shape=jax.ShapeDtypeStruct((Bp, d_zp), jnp.float32),
        grid=(n_bb,),                                    # batch blocks: independent work
        in_specs=[
            pl.BlockSpec((1, T * BB, d_e), lambda i: (i, 0, 0)),
            pl.BlockSpec((BB, 1), lambda i: (i, 0)),
            full_spec(wih_f), full_spec(whh_f), full_spec(bi_f), full_spec(bhn_f),
            full_spec(wih_b), full_spec(whh_b), full_spec(bi_b), full_spec(bhn_b),
            full_spec(wmu_f), full_spec(wmu_b), full_spec(bmu_p),
        ],
        out_specs=pl.BlockSpec((BB, d_zp), lambda i: (i, 0)),
        scratch_shapes=[pltpu.VMEM((T * BB, d_h), jnp.float32)] * 6,
        compiler_params=pltpu.CompilerParams(
            dimension_semantics=("parallel",)),          # 2x on v7x once n_bb > 1
    )(X_blk, lens_p,
      wih_f, whh_f, bi_f, bhn_f,
      wih_b, whh_b, bi_b, bhn_b,
      wmu_f, wmu_b, bmu_p)

    return out[:B, :d_z]


def reference(tokens, lens, params):
    """Pure-JAX reference matching nn.GRU(batch_first, bidir) on packed sequences."""
    X = params["emb"][tokens]  # (B, T, d_e)
    B, T, _ = X.shape
    d_h = params["whh_f"].shape[0]

    def cell(x, h, wih, whh, bih, bhh):
        gi = x @ wih + bih
        gh = h @ whh + bhh
        r = jax.nn.sigmoid(gi[:, :d_h] + gh[:, :d_h])
        z = jax.nn.sigmoid(gi[:, d_h:2 * d_h] + gh[:, d_h:2 * d_h])
        n = jnp.tanh(gi[:, 2 * d_h:] + r * gh[:, 2 * d_h:])
        return (1.0 - z) * n + z * h

    hf = jnp.zeros((B, d_h), jnp.float32)
    hb = jnp.zeros((B, d_h), jnp.float32)
    for t in range(T):
        hf_new = cell(X[:, t], hf, params["wih_f"], params["whh_f"],
                      params["bih_f"], params["bhh_f"])
        hf = jnp.where(lens[:, None] > t, hf_new, hf)
    for t in range(T - 1, -1, -1):
        hb_new = cell(X[:, t], hb, params["wih_b"], params["whh_b"],
                      params["bih_b"], params["bhh_b"])
        hb = jnp.where(lens[:, None] > t, hb_new, hb)
    H = jnp.concatenate([hf, hb], axis=-1)
    return H @ params["wmu"] + params["bmu"]


if __name__ == "__main__":
    # Small config: vocab=16, emb_dim=8, d_h=32, bidir -> d_h_rnn=64, d_z=16
    d_v, d_e, d_h, d_z = 16, 8, 32, 16
    B, T = 2, 8
    PAD = 0

    key = jax.random.PRNGKey(0)
    ks = jax.random.split(key, 16)

    def init(k, shape, scale=0.1):
        return (scale * jax.random.normal(k, shape)).astype(jnp.float32)

    params = {
        "emb":   init(ks[0], (d_v, d_e)),
        "wih_f": init(ks[1], (d_e, 3 * d_h)),
        "whh_f": init(ks[2], (d_h, 3 * d_h)),
        "bih_f": init(ks[3], (1, 3 * d_h)),
        "bhh_f": init(ks[4], (1, 3 * d_h)),
        "wih_b": init(ks[5], (d_e, 3 * d_h)),
        "whh_b": init(ks[6], (d_h, 3 * d_h)),
        "bih_b": init(ks[7], (1, 3 * d_h)),
        "bhh_b": init(ks[8], (1, 3 * d_h)),
        "wmu":   init(ks[9], (2 * d_h, d_z)),
        "bmu":   init(ks[10], (1, d_z)),
    }
    params["emb"] = params["emb"].at[PAD].set(0.0)  # padding_idx row is zero

    # variable-length sequences (pack_sequence semantics), padded with PAD
    lens = jnp.array([8, 5], dtype=jnp.int32)
    tokens = jax.random.randint(ks[11], (B, T), 1, d_v, dtype=jnp.int32)
    tmask = jnp.arange(T)[None, :] < lens[:, None]
    tokens = jnp.where(tmask, tokens, PAD)

    fwd = jax.jit(rnn_encoder_forward)
    out = jax.block_until_ready(fwd(tokens, lens, params))
    ref = reference(tokens, lens, params)

    assert out.shape == (B, d_z)
    if not jnp.allclose(out, ref, atol=2e-3, rtol=2e-3):
        raise AssertionError(f"mismatch: max abs err {jnp.max(jnp.abs(out - ref))}")
    print("KERNEL_OK")
</pallas_src>

<mosaic_0001>
module attributes {stable_mosaic.version = 11 : i64} {
  func.func @rnn_encoder_kernel(%arg0: i32, %arg1: memref<1x64x8xf32, #tpu.memory_space<vmem>>, %arg2: memref<8x1xi32, #tpu.memory_space<vmem>>, %arg3: memref<3x8x32xf32, #tpu.memory_space<vmem>>, %arg4: memref<3x32x32xf32, #tpu.memory_space<vmem>>, %arg5: memref<3x1x32xf32, #tpu.memory_space<vmem>>, %arg6: memref<1x32xf32, #tpu.memory_space<vmem>>, %arg7: memref<3x8x32xf32, #tpu.memory_space<vmem>>, %arg8: memref<3x32x32xf32, #tpu.memory_space<vmem>>, %arg9: memref<3x1x32xf32, #tpu.memory_space<vmem>>, %arg10: memref<1x32xf32, #tpu.memory_space<vmem>>, %arg11: memref<32x128xf32, #tpu.memory_space<vmem>>, %arg12: memref<32x128xf32, #tpu.memory_space<vmem>>, %arg13: memref<1x128xf32, #tpu.memory_space<vmem>>, %arg14: memref<8x128xf32, #tpu.memory_space<vmem>>, %arg15: memref<64x32xf32, #tpu.memory_space<vmem>>, %arg16: memref<64x32xf32, #tpu.memory_space<vmem>>, %arg17: memref<64x32xf32, #tpu.memory_space<vmem>>, %arg18: memref<64x32xf32, #tpu.memory_space<vmem>>, %arg19: memref<64x32xf32, #tpu.memory_space<vmem>>, %arg20: memref<64x32xf32, #tpu.memory_space<vmem>>) attributes {dimension_semantics = [#tpu.dimension_semantics<parallel>], iteration_bounds = array<i64: 1>, scalar_prefetch = 0 : i64, scratch_operands = 6 : i64, tpu.core_type = #tpu.core_type<tc>, window_params = [{transform_indices = @transform_0, window_bounds = array<i64: 1, 64, 8>}, {transform_indices = @transform_1, window_bounds = array<i64: 8, 1>}, {pipeline_mode = #tpu.pipeline_mode<synchronous>, transform_indices = @transform_2, window_bounds = array<i64: 3, 8, 32>}, {pipeline_mode = #tpu.pipeline_mode<synchronous>, transform_indices = @transform_3, window_bounds = array<i64: 3, 32, 32>}, {pipeline_mode = #tpu.pipeline_mode<synchronous>, transform_indices = @transform_4, window_bounds = array<i64: 3, 1, 32>}, {pipeline_mode = #tpu.pipeline_mode<synchronous>, transform_indices = @transform_5, window_bounds = array<i64: 1, 32>}, {pipeline_mode = #tpu.pipeline_mode<synchronous>, transform_indices = @transform_6, window_bounds = array<i64: 3, 8, 32>}, {pipeline_mode = #tpu.pipeline_mode<synchronous>, transform_indices = @transform_7, window_bounds = array<i64: 3, 32, 32>}, {pipeline_mode = #tpu.pipeline_mode<synchronous>, transform_indices = @transform_8, window_bounds = array<i64: 3, 1, 32>}, {pipeline_mode = #tpu.pipeline_mode<synchronous>, transform_indices = @transform_9, window_bounds = array<i64: 1, 32>}, {pipeline_mode = #tpu.pipeline_mode<synchronous>, transform_indices = @transform_10, window_bounds = array<i64: 32, 128>}, {pipeline_mode = #tpu.pipeline_mode<synchronous>, transform_indices = @transform_11, window_bounds = array<i64: 32, 128>}, {pipeline_mode = #tpu.pipeline_mode<synchronous>, transform_indices = @transform_12, window_bounds = array<i64: 1, 128>}, {transform_indices = @transform_13, window_bounds = array<i64: 8, 128>}]} {
    %c0 = arith.constant 0 : index
    %c0_0 = arith.constant 0 : index
    %c0_1 = arith.constant 0 : index
    %0 = vector.load %arg1[%c0, %c0_0, %c0_1] : memref<1x64x8xf32, #tpu.memory_space<vmem>>, vector<1x64x8xf32>
    %1 = vector.shape_cast %0 : vector<1x64x8xf32> to vector<64x8xf32>
    %c0_2 = arith.constant 0 : index
    %c0_3 = arith.constant 0 : index
    %c0_4 = arith.constant 0 : index
    %2 = vector.load %arg3[%c0_2, %c0_3, %c0_4] : memref<3x8x32xf32, #tpu.memory_space<vmem>>, vector<1x8x32xf32>
    %3 = vector.shape_cast %2 : vector<1x8x32xf32> to vector<8x32xf32>
    %cst = arith.constant dense<0.000000e+00> : vector<64x32xf32>
    %4 = tpu.matmul %1, %3, %cst {dimension_numbers = #tpu.dot_dimension_numbers<[1], [0], [0], [1], [0, 0, 1, 1], [], []>} : vector<64x8xf32>, vector<8x32xf32>, vector<64x32xf32> -> vector<64x32xf32>
    %c0_5 = arith.constant 0 : index
    %c0_6 = arith.constant 0 : index
    %c0_7 = arith.constant 0 : index
    %5 = vector.load %arg5[%c0_5, %c0_6, %c0_7] : memref<3x1x32xf32, #tpu.memory_space<vmem>>, vector<1x1x32xf32>
    %6 = vector.shape_cast %5 : vector<1x1x32xf32> to vector<1x32xf32>
    %7 = vector.broadcast %6 : vector<1x32xf32> to vector<64x32xf32>
    %8 = arith.addf %4, %7 : vector<64x32xf32>
    %c0_8 = arith.constant 0 : index
    %c0_9 = arith.constant 0 : index
    %9 = vector.load %arg15[%c0_8, %c0_9] : memref<64x32xf32, #tpu.memory_space<vmem>>, vector<64x32xf32>
    tpu.vector_store %arg15[%c0_8, %c0_9], %8 {strides = array<i32>} : memref<64x32xf32, #tpu.memory_space<vmem>>, vector<64x32xf32>,
    %c0_10 = arith.constant 0 : index
    %c0_11 = arith.constant 0 : index
    %c0_12 = arith.constant 0 : index
    %10 = vector.load %arg7[%c0_10, %c0_11, %c0_12] : memref<3x8x32xf32, #tpu.memory_space<vmem>>, vector<1x8x32xf32>
    %11 = vector.shape_cast %10 : vector<1x8x32xf32> to vector<8x32xf32>
    %cst_13 = arith.constant dense<0.000000e+00> : vector<64x32xf32>
    %12 = tpu.matmul %1, %11, %cst_13 {dimension_numbers = #tpu.dot_dimension_numbers<[1], [0], [0], [1], [0, 0, 1, 1], [], []>} : vector<64x8xf32>, vector<8x32xf32>, vector<64x32xf32> -> vector<64x32xf32>
    %c0_14 = arith.constant 0 : index
    %c0_15 = arith.constant 0 : index
    %c0_16 = arith.constant 0 : index
    %13 = vector.load %arg9[%c0_14, %c0_15, %c0_16] : memref<3x1x32xf32, #tpu.memory_space<vmem>>, vector<1x1x32xf32>
    %14 = vector.shape_cast %13 : vector<1x1x32xf32> to vector<1x32xf32>
    %15 = vector.broadcast %14 : vector<1x32xf32> to vector<64x32xf32>
    %16 = arith.addf %12, %15 : vector<64x32xf32>
    %c0_17 = arith.constant 0 : index
    %c0_18 = arith.constant 0 : index
    %17 = vector.load %arg18[%c0_17, %c0_18] : memref<64x32xf32, #tpu.memory_space<vmem>>, vector<64x32xf32>
    tpu.vector_store %arg18[%c0_17, %c0_18], %16 {strides = array<i32>} : memref<64x32xf32, #tpu.memory_space<vmem>>, vector<64x32xf32>,
    %c1 = arith.constant 1 : index
    %c0_19 = arith.constant 0 : index
    %c0_20 = arith.constant 0 : index
    %18 = vector.load %arg3[%c1, %c0_19, %c0_20] : memref<3x8x32xf32, #tpu.memory_space<vmem>>, vector<1x8x32xf32>
    %19 = vector.shape_cast %18 : vector<1x8x32xf32> to vector<8x32xf32>
    %cst_21 = arith.constant dense<0.000000e+00> : vector<64x32xf32>
    %20 = tpu.matmul %1, %19, %cst_21 {dimension_numbers = #tpu.dot_dimension_numbers<[1], [0], [0], [1], [0, 0, 1, 1], [], []>} : vector<64x8xf32>, vector<8x32xf32>, vector<64x32xf32> -> vector<64x32xf32>
    %c1_22 = arith.constant 1 : index
    %c0_23 = arith.constant 0 : index
    %c0_24 = arith.constant 0 : index
    %21 = vector.load %arg5[%c1_22, %c0_23, %c0_24] : memref<3x1x32xf32, #tpu.memory_space<vmem>>, vector<1x1x32xf32>
    %22 = vector.shape_cast %21 : vector<1x1x32xf32> to vector<1x32xf32>
    %23 = vector.broadcast %22 : vector<1x32xf32> to vector<64x32xf32>
    %24 = arith.addf %20, %23 : vector<64x32xf32>
    %c0_25 = arith.constant 0 : index
    %c0_26 = arith.constant 0 : index
    %25 = vector.load %arg16[%c0_25, %c0_26] : memref<64x32xf32, #tpu.memory_space<vmem>>, vector<64x32xf32>
    tpu.vector_store %arg16[%c0_25, %c0_26], %24 {strides = array<i32>} : memref<64x32xf32, #tpu.memory_space<vmem>>, vector<64x32xf32>,
    %c1_27 = arith.constant 1 : index
    %c0_28 = arith.constant 0 : index
    %c0_29 = arith.constant 0 : index
    %26 = vector.load %arg7[%c1_27, %c0_28, %c0_29] : memref<3x8x32xf32, #tpu.memory_space<vmem>>, vector<1x8x32xf32>
    %27 = vector.shape_cast %26 : vector<1x8x32xf32> to vector<8x32xf32>
    %cst_30 = arith.constant dense<0.000000e+00> : vector<64x32xf32>
    %28 = tpu.matmul %1, %27, %cst_30 {dimension_numbers = #tpu.dot_dimension_numbers<[1], [0], [0], [1], [0, 0, 1, 1], [], []>} : vector<64x8xf32>, vector<8x32xf32>, vector<64x32xf32> -> vector<64x32xf32>
    %c1_31 = arith.constant 1 : index
    %c0_32 = arith.constant 0 : index
    %c0_33 = arith.constant 0 : index
    %29 = vector.load %arg9[%c1_31, %c0_32, %c0_33] : memref<3x1x32xf32, #tpu.memory_space<vmem>>, vector<1x1x32xf32>
    %30 = vector.shape_cast %29 : vector<1x1x32xf32> to vector<1x32xf32>
    %31 = vector.broadcast %30 : vector<1x32xf32> to vector<64x32xf32>
    %32 = arith.addf %28, %31 : vector<64x32xf32>
    %c0_34 = arith.constant 0 : index
    %c0_35 = arith.constant 0 : index
    %33 = vector.load %arg19[%c0_34, %c0_35] : memref<64x32xf32, #tpu.memory_space<vmem>>, vector<64x32xf32>
    tpu.vector_store %arg19[%c0_34, %c0_35], %32 {strides = array<i32>} : memref<64x32xf32, #tpu.memory_space<vmem>>, vector<64x32xf32>,
    %c2 = arith.constant 2 : index
    %c0_36 = arith.constant 0 : index
    %c0_37 = arith.constant 0 : index
    %34 = vector.load %arg3[%c2, %c0_36, %c0_37] : memref<3x8x32xf32, #tpu.memory_space<vmem>>, vector<1x8x32xf32>
    %35 = vector.shape_cast %34 : vector<1x8x32xf32> to vector<8x32xf32>
    %cst_38 = arith.constant dense<0.000000e+00> : vector<64x32xf32>
    %36 = tpu.matmul %1, %35, %cst_38 {dimension_numbers = #tpu.dot_dimension_numbers<[1], [0], [0], [1], [0, 0, 1, 1], [], []>} : vector<64x8xf32>, vector<8x32xf32>, vector<64x32xf32> -> vector<64x32xf32>
    %c2_39 = arith.constant 2 : index
    %c0_40 = arith.constant 0 : index
    %c0_41 = arith.constant 0 : index
    %37 = vector.load %arg5[%c2_39, %c0_40, %c0_41] : memref<3x1x32xf32, #tpu.memory_space<vmem>>, vector<1x1x32xf32>
    %38 = vector.shape_cast %37 : vector<1x1x32xf32> to vector<1x32xf32>
    %39 = vector.broadcast %38 : vector<1x32xf32> to vector<64x32xf32>
    %40 = arith.addf %36, %39 : vector<64x32xf32>
    %c0_42 = arith.constant 0 : index
    %c0_43 = arith.constant 0 : index
    %41 = vector.load %arg17[%c0_42, %c0_43] : memref<64x32xf32, #tpu.memory_space<vmem>>, vector<64x32xf32>
    tpu.vector_store %arg17[%c0_42, %c0_43], %40 {strides = array<i32>} : memref<64x32xf32, #tpu.memory_space<vmem>>, vector<64x32xf32>,
    %c2_44 = arith.constant 2 : index
    %c0_45 = arith.constant 0 : index
    %c0_46 = arith.constant 0 : index
    %42 = vector.load %arg7[%c2_44, %c0_45, %c0_46] : memref<3x8x32xf32, #tpu.memory_space<vmem>>, vector<1x8x32xf32>
    %43 = vector.shape_cast %42 : vector<1x8x32xf32> to vector<8x32xf32>
    %cst_47 = arith.constant dense<0.000000e+00> : vector<64x32xf32>
    %44 = tpu.matmul %1, %43, %cst_47 {dimension_numbers = #tpu.dot_dimension_numbers<[1], [0], [0], [1], [0, 0, 1, 1], [], []>} : vector<64x8xf32>, vector<8x32xf32>, vector<64x32xf32> -> vector<64x32xf32>
    %c2_48 = arith.constant 2 : index
    %c0_49 = arith.constant 0 : index
    %c0_50 = arith.constant 0 : index
    %45 = vector.load %arg9[%c2_48, %c0_49, %c0_50] : memref<3x1x32xf32, #tpu.memory_space<vmem>>, vector<1x1x32xf32>
    %46 = vector.shape_cast %45 : vector<1x1x32xf32> to vector<1x32xf32>
    %47 = vector.broadcast %46 : vector<1x32xf32> to vector<64x32xf32>
    %48 = arith.addf %44, %47 : vector<64x32xf32>
    %c0_51 = arith.constant 0 : index
    %c0_52 = arith.constant 0 : index
    %49 = vector.load %arg20[%c0_51, %c0_52] : memref<64x32xf32, #tpu.memory_space<vmem>>, vector<64x32xf32>
    tpu.vector_store %arg20[%c0_51, %c0_52], %48 {strides = array<i32>} : memref<64x32xf32, #tpu.memory_space<vmem>>, vector<64x32xf32>,
    %c0_53 = arith.constant 0 : index
    %c0_54 = arith.constant 0 : index
    %50 = vector.load %arg2[%c0_53, %c0_54] : memref<8x1xi32, #tpu.memory_space<vmem>>, vector<8x1xi32>
    %cst_55 = arith.constant 0.000000e+00 : f32
    %51 = vector.broadcast %cst_55 : f32 to vector<8x32xf32>
    %c0_i32 = arith.constant 0 : i32
    %c8_i32 = arith.constant 8 : i32
    %52 = arith.muli %c0_i32, %c8_i32 : i32
    %53 = tpu.assume_multiple %52, 8 : i32
    %c0_56 = arith.constant 0 : index
    %c0_57 = arith.constant 0 : index
    %c0_58 = arith.constant 0 : index
    %54 = vector.load %arg4[%c0_56, %c0_57, %c0_58] : memref<3x32x32xf32, #tpu.memory_space<vmem>>, vector<1x32x32xf32>
    %55 = vector.shape_cast %54 : vector<1x32x32xf32> to vector<32x32xf32>
    %cst_59 = arith.constant dense<0.000000e+00> : vector<8x32xf32>
    %56 = tpu.matmul %51, %55, %cst_59 {dimension_numbers = #tpu.dot_dimension_numbers<[1], [0], [0], [1], [0, 0, 1, 1], [], []>} : vector<8x32xf32>, vector<32x32xf32>, vector<8x32xf32> -> vector<8x32xf32>
    %c1_60 = arith.constant 1 : index
    %c0_61 = arith.constant 0 : index
    %c0_62 = arith.constant 0 : index
    %57 = vector.load %arg4[%c1_60, %c0_61, %c0_62] : memref<3x32x32xf32, #tpu.memory_space<vmem>>, vector<1x32x32xf32>
    %58 = vector.shape_cast %57 : vector<1x32x32xf32> to vector<32x32xf32>
    %cst_63 = arith.constant dense<0.000000e+00> : vector<8x32xf32>
    %59 = tpu.matmul %51, %58, %cst_63 {dimension_numbers = #tpu.dot_dimension_numbers<[1], [0], [0], [1], [0, 0, 1, 1], [], []>} : vector<8x32xf32>, vector<32x32xf32>, vector<8x32xf32> -> vector<8x32xf32>
    %c2_64 = arith.constant 2 : index
    %c0_65 = arith.constant 0 : index
    %c0_66 = arith.constant 0 : index
    %60 = vector.load %arg4[%c2_64, %c0_65, %c0_66] : memref<3x32x32xf32, #tpu.memory_space<vmem>>, vector<1x32x32xf32>
    %61 = vector.shape_cast %60 : vector<1x32x32xf32> to vector<32x32xf32>
    %cst_67 = arith.constant dense<0.000000e+00> : vector<8x32xf32>
    %62 = tpu.matmul %51, %61, %cst_67 {dimension_numbers = #tpu.dot_dimension_numbers<[1], [0], [0], [1], [0, 0, 1, 1], [], []>} : vector<8x32xf32>, vector<32x32xf32>, vector<8x32xf32> -> vector<8x32xf32>
    %c0_68 = arith.constant 0 : index
    %c0_69 = arith.constant 0 : index
    %63 = vector.load %arg6[%c0_68, %c0_69] : memref<1x32xf32, #tpu.memory_space<vmem>>, vector<1x32xf32>
    %64 = vector.broadcast %63 : vector<1x32xf32> to vector<8x32xf32>
    %65 = arith.addf %62, %64 : vector<8x32xf32>
    %66 = arith.index_cast %53 : i32 to index
    %c0_70 = arith.constant 0 : index
    %67 = vector.load %arg15[%66, %c0_70] : memref<64x32xf32, #tpu.memory_space<vmem>>, vector<8x32xf32>
    %68 = arith.addf %67, %56 : vector<8x32xf32>
    %69 = arith.negf %68 : vector<8x32xf32>
    %70 = math.exp %69 : vector<8x32xf32>
    %cst_71 = arith.constant 1.000000e+00 : f32
    %71 = vector.broadcast %cst_71 : f32 to vector<8x32xf32>
    %72 = arith.addf %71, %70 : vector<8x32xf32>
    %73 = arith.divf %71, %72 : vector<8x32xf32>
    %74 = arith.index_cast %53 : i32 to index
    %c0_72 = arith.constant 0 : index
    %75 = vector.load %arg16[%74, %c0_72] : memref<64x32xf32, #tpu.memory_space<vmem>>, vector<8x32xf32>
    %76 = arith.addf %75, %59 : vector<8x32xf32>
    %77 = arith.negf %76 : vector<8x32xf32>
    %78 = math.exp %77 : vector<8x32xf32>
    %cst_73 = arith.constant 1.000000e+00 : f32
    %79 = vector.broadcast %cst_73 : f32 to vector<8x32xf32>
    %80 = arith.addf %79, %78 : vector<8x32xf32>
    %81 = arith.divf %79, %80 : vector<8x32xf32>
    %82 = arith.index_cast %53 : i32 to index
    %c0_74 = arith.constant 0 : index
    %83 = vector.load %arg17[%82, %c0_74] : memref<64x32xf32, #tpu.memory_space<vmem>>, vector<8x32xf32>
    %84 = arith.mulf %73, %65 : vector<8x32xf32>
    %85 = arith.addf %83, %84 : vector<8x32xf32>
    %86 = math.tanh %85 : vector<8x32xf32>
    %cst_75 = arith.constant 1.000000e+00 : f32
    %87 = vector.broadcast %cst_75 : f32 to vector<8x32xf32>
    %88 = arith.subf %87, %81 : vector<8x32xf32>
    %89 = arith.mulf %88, %86 : vector<8x32xf32>
    %90 = arith.mulf %81, %51 : vector<8x32xf32>
    %91 = arith.addf %89, %90 : vector<8x32xf32>
    %92 = vector.broadcast %c0_i32 : i32 to vector<8x1xi32>
    %93 = arith.cmpi sgt, %50, %92 : vector<8x1xi32>
    %94 = vector.shape_cast %93 : vector<8x1xi1> to vector<8x1xi1>
    %95 = vector.broadcast %94 : vector<8x1xi1> to vector<8x32xi1>
    %96 = arith.select %95, %91, %51 : vector<8x32xi1>, vector<8x32xf32>
    %c7_i32 = arith.constant 7 : i32
    %97 = arith.subi %c7_i32, %c0_i32 : i32
    %c8_i32_76 = arith.constant 8 : i32
    %98 = arith.muli %97, %c8_i32_76 : i32
    %99 = tpu.assume_multiple %98, 8 : i32
    %c0_77 = arith.constant 0 : index
    %c0_78 = arith.constant 0 : index
    %c0_79 = arith.constant 0 : index
    %100 = vector.load %arg8[%c0_77, %c0_78, %c0_79] : memref<3x32x32xf32, #tpu.memory_space<vmem>>, vector<1x32x32xf32>
    %101 = vector.shape_cast %100 : vector<1x32x32xf32> to vector<32x32xf32>
    %cst_80 = arith.constant dense<0.000000e+00> : vector<8x32xf32>
    %102 = tpu.matmul %51, %101, %cst_80 {dimension_numbers = #tpu.dot_dimension_numbers<[1], [0], [0], [1], [0, 0, 1, 1], [], []>} : vector<8x32xf32>, vector<32x32xf32>, vector<8x32xf32> -> vector<8x32xf32>
    %c1_81 = arith.constant 1 : index
    %c0_82 = arith.constant 0 : index
    %c0_83 = arith.constant 0 : index
    %103 = vector.load %arg8[%c1_81, %c0_82, %c0_83] : memref<3x32x32xf32, #tpu.memory_space<vmem>>, vector<1x32x32xf32>
    %104 = vector.shape_cast %103 : vector<1x32x32xf32> to vector<32x32xf32>
    %cst_84 = arith.constant dense<0.000000e+00> : vector<8x32xf32>
    %105 = tpu.matmul %51, %104, %cst_84 {dimension_numbers = #tpu.dot_dimension_numbers<[1], [0], [0], [1], [0, 0, 1, 1], [], []>} : vector<8x32xf32>, vector<32x32xf32>, vector<8x32xf32> -> vector<8x32xf32>
    %c2_85 = arith.constant 2 : index
    %c0_86 = arith.constant 0 : index
    %c0_87 = arith.constant 0 : index
    %106 = vector.load %arg8[%c2_85, %c0_86, %c0_87] : memref<3x32x32xf32, #tpu.memory_space<vmem>>, vector<1x32x32xf32>
    %107 = vector.shape_cast %106 : vector<1x32x32xf32> to vector<32x32xf32>
    %cst_88 = arith.constant dense<0.000000e+00> : vector<8x32xf32>
    %108 = tpu.matmul %51, %107, %cst_88 {dimension_numbers = #tpu.dot_dimension_numbers<[1], [0], [0], [1], [0, 0, 1, 1], [], []>} : vector<8x32xf32>, vector<32x32xf32>, vector<8x32xf32> -> vector<8x32xf32>
    %c0_89 = arith.constant 0 : index
    %c0_90 = arith.constant 0 : index
    %109 = vector.load %arg10[%c0_89, %c0_90] : memref<1x32xf32, #tpu.memory_space<vmem>>, vector<1x32xf32>
    %110 = vector.broadcast %109 : vector<1x32xf32> to vector<8x32xf32>
    %111 = arith.addf %108, %110 : vector<8x32xf32>
    %112 = arith.index_cast %99 : i32 to index
    %c0_91 = arith.constant 0 : index
    %113 = vector.load %arg18[%112, %c0_91] : memref<64x32xf32, #tpu.memory_space<vmem>>, vector<8x32xf32>
    %114 = arith.addf %113, %102 : vector<8x32xf32>
    %115 = arith.negf %114 : vector<8x32xf32>
    %116 = math.exp %115 : vector<8x32xf32>
    %cst_92 = arith.constant 1.000000e+00 : f32
    %117 = vector.broadcast %cst_92 : f32 to vector<8x32xf32>
    %118 = arith.addf %117, %116 : vector<8x32xf32>
    %119 = arith.divf %117, %118 : vector<8x32xf32>
    %120 = arith.index_cast %99 : i32 to index
    %c0_93 = arith.constant 0 : index
    %121 = vector.load %arg19[%120, %c0_93] : memref<64x32xf32, #tpu.memory_space<vmem>>, vector<8x32xf32>
    %122 = arith.addf %121, %105 : vector<8x32xf32>
    %123 = arith.negf %122 : vector<8x32xf32>
    %124 = math.exp %123 : vector<8x32xf32>
    %cst_94 = arith.constant 1.000000e+00 : f32
    %125 = vector.broadcast %cst_94 : f32 to vector<8x32xf32>
    %126 = arith.addf %125, %124 : vector<8x32xf32>
    %127 = arith.divf %125, %126 : vector<8x32xf32>
    %128 = arith.index_cast %99 : i32 to index
    %c0_95 = arith.constant 0 : index
    %129 = vector.load %arg20[%128, %c0_95] : memref<64x32xf32, #tpu.memory_space<vmem>>, vector<8x32xf32>
    %130 = arith.mulf %119, %111 : vector<8x32xf32>
    %131 = arith.addf %129, %130 : vector<8x32xf32>
    %132 = math.tanh %131 : vector<8x32xf32>
    %cst_96 = arith.constant 1.000000e+00 : f32
    %133 = vector.broadcast %cst_96 : f32 to vector<8x32xf32>
    %134 = arith.subf %133, %127 : vector<8x32xf32>
    %135 = arith.mulf %134, %132 : vector<8x32xf32>
    %136 = arith.mulf %127, %51 : vector<8x32xf32>
    %137 = arith.addf %135, %136 : vector<8x32xf32>
    %138 = vector.broadcast %97 : i32 to vector<8x1xi32>
    %139 = arith.cmpi sgt, %50, %138 : vector<8x1xi32>
    %140 = vector.shape_cast %139 : vector<8x1xi1> to vector<8x1xi1>
    %141 = vector.broadcast %140 : vector<8x1xi1> to vector<8x32xi1>
    %142 = arith.select %141, %137, %51 : vector<8x32xi1>, vector<8x32xf32>
    %c1_i32 = arith.constant 1 : i32
    %c8_i32_97 = arith.constant 8 : i32
    %143 = arith.muli %c1_i32, %c8_i32_97 : i32
    %144 = tpu.assume_multiple %143, 8 : i32
    %c0_98 = arith.constant 0 : index
    %c0_99 = arith.constant 0 : index
    %c0_100 = arith.constant 0 : index
    %145 = vector.load %arg4[%c0_98, %c0_99, %c0_100] : memref<3x32x32xf32, #tpu.memory_space<vmem>>, vector<1x32x32xf32>
    %146 = vector.shape_cast %145 : vector<1x32x32xf32> to vector<32x32xf32>
    %cst_101 = arith.constant dense<0.000000e+00> : vector<8x32xf32>
    %147 = tpu.matmul %96, %146, %cst_101 {dimension_numbers = #tpu.dot_dimension_numbers<[1], [0], [0], [1], [0, 0, 1, 1], [], []>} : vector<8x32xf32>, vector<32x32xf32>, vector<8x32xf32> -> vector<8x32xf32>
    %c1_102 = arith.constant 1 : index
    %c0_103 = arith.constant 0 : index
    %c0_104 = arith.constant 0 : index
    %148 = vector.load %arg4[%c1_102, %c0_103, %c0_104] : memref<3x32x32xf32, #tpu.memory_space<vmem>>, vector<1x32x32xf32>
    %149 = vector.shape_cast %148 : vector<1x32x32xf32> to vector<32x32xf32>
    %cst_105 = arith.constant dense<0.000000e+00> : vector<8x32xf32>
    %150 = tpu.matmul %96, %149, %cst_105 {dimension_numbers = #tpu.dot_dimension_numbers<[1], [0], [0], [1], [0, 0, 1, 1], [], []>} : vector<8x32xf32>, vector<32x32xf32>, vector<8x32xf32> -> vector<8x32xf32>
    %c2_106 = arith.constant 2 : index
    %c0_107 = arith.constant 0 : index
    %c0_108 = arith.constant 0 : index
    %151 = vector.load %arg4[%c2_106, %c0_107, %c0_108] : memref<3x32x32xf32, #tpu.memory_space<vmem>>, vector<1x32x32xf32>
    %152 = vector.shape_cast %151 : vector<1x32x32xf32> to vector<32x32xf32>
    %cst_109 = arith.constant dense<0.000000e+00> : vector<8x32xf32>
    %153 = tpu.matmul %96, %152, %cst_109 {dimension_numbers = #tpu.dot_dimension_numbers<[1], [0], [0], [1], [0, 0, 1, 1], [], []>} : vector<8x32xf32>, vector<32x32xf32>, vector<8x32xf32> -> vector<8x32xf32>
    %c0_110 = arith.constant 0 : index
    %c0_111 = arith.constant 0 : index
    %154 = vector.load %arg6[%c0_110, %c0_111] : memref<1x32xf32, #tpu.memory_space<vmem>>, vector<1x32xf32>
    %155 = vector.broadcast %154 : vector<1x32xf32> to vector<8x32xf32>
    %156 = arith.addf %153, %155 : vector<8x32xf32>
    %157 = arith.index_cast %144 : i32 to index
    %c0_112 = arith.constant 0 : index
    %158 = vector.load %arg15[%157, %c0_112] : memref<64x32xf32, #tpu.memory_space<vmem>>, vector<8x32xf32>
    %159 = arith.addf %158, %147 : vector<8x32xf32>
    %160 = arith.negf %159 : vector<8x32xf32>
    %161 = math.exp %160 : vector<8x32xf32>
    %cst_113 = arith.constant 1.000000e+00 : f32
    %162 = vector.broadcast %cst_113 : f32 to vector<8x32xf32>
    %163 = arith.addf %162, %161 : vector<8x32xf32>
    %164 = arith.divf %162, %163 : vector<8x32xf32>
    %165 = arith.index_cast %144 : i32 to index
    %c0_114 = arith.constant 0 : index
    %166 = vector.load %arg16[%165, %c0_114] : memref<64x32xf32, #tpu.memory_space<vmem>>, vector<8x32xf32>
    %167 = arith.addf %166, %150 : vector<8x32xf32>
    %168 = arith.negf %167 : vector<8x32xf32>
    %169 = math.exp %168 : vector<8x32xf32>
    %cst_115 = arith.constant 1.000000e+00 : f32
    %170 = vector.broadcast %cst_115 : f32 to vector<8x32xf32>
    %171 = arith.addf %170, %169 : vector<8x32xf32>
    %172 = arith.divf %170, %171 : vector<8x32xf32>
    %173 = arith.index_cast %144 : i32 to index
    %c0_116 = arith.constant 0 : index
    %174 = vector.load %arg17[%173, %c0_116] : memref<64x32xf32, #tpu.memory_space<vmem>>, vector<8x32xf32>
    %175 = arith.mulf %164, %156 : vector<8x32xf32>
    %176 = arith.addf %174, %175 : vector<8x32xf32>
    %177 = math.tanh %176 : vector<8x32xf32>
    %cst_117 = arith.constant 1.000000e+00 : f32
    %178 = vector.broadcast %cst_117 : f32 to vector<8x32xf32>
    %179 = arith.subf %178, %172 : vector<8x32xf32>
    %180 = arith.mulf %179, %177 : vector<8x32xf32>
    %181 = arith.mulf %172, %96 : vector<8x32xf32>
    %182 = arith.addf %180, %181 : vector<8x32xf32>
    %183 = vector.broadcast %c1_i32 : i32 to vector<8x1xi32>
    %184 = arith.cmpi sgt, %50, %183 : vector<8x1xi32>
    %185 = vector.shape_cast %184 : vector<8x1xi1> to vector<8x1xi1>
    %186 = vector.broadcast %185 : vector<8x1xi1> to vector<8x32xi1>
    %187 = arith.select %186, %182, %96 : vector<8x32xi1>, vector<8x32xf32>
    %c7_i32_118 = arith.constant 7 : i32
    %188 = arith.subi %c7_i32_118, %c1_i32 : i32
    %c8_i32_119 = arith.constant 8 : i32
    %189 = arith.muli %188, %c8_i32_119 : i32
    %190 = tpu.assume_multiple %189, 8 : i32
    %c0_120 = arith.constant 0 : index
    %c0_121 = arith.constant 0 : index
    %c0_122 = arith.constant 0 : index
    %191 = vector.load %arg8[%c0_120, %c0_121, %c0_122] : memref<3x32x32xf32, #tpu.memory_space<vmem>>, vector<1x32x32xf32>
    %192 = vector.shape_cast %191 : vector<1x32x32xf32> to vector<32x32xf32>
    %cst_123 = arith.constant dense<0.000000e+00> : vector<8x32xf32>
    %193 = tpu.matmul %142, %192, %cst_123 {dimension_numbers = #tpu.dot_dimension_numbers<[1], [0], [0], [1], [0, 0, 1, 1], [], []>} : vector<8x32xf32>, vector<32x32xf32>, vector<8x32xf32> -> vector<8x32xf32>
    %c1_124 = arith.constant 1 : index
    %c0_125 = arith.constant 0 : index
    %c0_126 = arith.constant 0 : index
    %194 = vector.load %arg8[%c1_124, %c0_125, %c0_126] : memref<3x32x32xf32, #tpu.memory_space<vmem>>, vector<1x32x32xf32>
    %195 = vector.shape_cast %194 : vector<1x32x32xf32> to vector<32x32xf32>
    %cst_127 = arith.constant dense<0.000000e+00> : vector<8x32xf32>
    %196 = tpu.matmul %142, %195, %cst_127 {dimension_numbers = #tpu.dot_dimension_numbers<[1], [0], [0], [1], [0, 0, 1, 1], [], []>} : vector<8x32xf32>, vector<32x32xf32>, vector<8x32xf32> -> vector<8x32xf32>
    %c2_128 = arith.constant 2 : index
    %c0_129 = arith.constant 0 : index
    %c0_130 = arith.constant 0 : index
    %197 = vector.load %arg8[%c2_128, %c0_129, %c0_130] : memref<3x32x32xf32, #tpu.memory_space<vmem>>, vector<1x32x32xf32>
    %198 = vector.shape_cast %197 : vector<1x32x32xf32> to vector<32x32xf32>
    %cst_131 = arith.constant dense<0.000000e+00> : vector<8x32xf32>
    %199 = tpu.matmul %142, %198, %cst_131 {dimension_numbers = #tpu.dot_dimension_numbers<[1], [0], [0], [1], [0, 0, 1, 1], [], []>} : vector<8x32xf32>, vector<32x32xf32>, vector<8x32xf32> -> vector<8x32xf32>
    %c0_132 = arith.constant 0 : index
    %c0_133 = arith.constant 0 : index
    %200 = vector.load %arg10[%c0_132, %c0_133] : memref<1x32xf32, #tpu.memory_space<vmem>>, vector<1x32xf32>
    %201 = vector.broadcast %200 : vector<1x32xf32> to vector<8x32xf32>
    %202 = arith.addf %199, %201 : vector<8x32xf32>
    %203 = arith.index_cast %190 : i32 to index
    %c0_134 = arith.constant 0 : index
    %204 = vector.load %arg18[%203, %c0_134] : memref<64x32xf32, #tpu.memory_space<vmem>>, vector<8x32xf32>
    %205 = arith.addf %204, %193 : vector<8x32xf32>
    %206 = arith.negf %205 : vector<8x32xf32>
    %207 = math.exp %206 : vector<8x32xf32>
    %cst_135 = arith.constant 1.000000e+00 : f32
    %208 = vector.broadcast %cst_135 : f32 to vector<8x32xf32>
    %209 = arith.addf %208, %207 : vector<8x32xf32>
    %210 = arith.divf %208, %209 : vector<8x32xf32>
    %211 = arith.index_cast %190 : i32 to index
    %c0_136 = arith.constant 0 : index
    %212 = vector.load %arg19[%211, %c0_136] : memref<64x32xf32, #tpu.memory_space<vmem>>, vector<8x32xf32>
    %213 = arith.addf %212, %196 : vector<8x32xf32>
    %214 = arith.negf %213 : vector<8x32xf32>
    %215 = math.exp %214 : vector<8x32xf32>
    %cst_137 = arith.constant 1.000000e+00 : f32
    %216 = vector.broadcast %cst_137 : f32 to vector<8x32xf32>
    %217 = arith.addf %216, %215 : vector<8x32xf32>
    %218 = arith.divf %216, %217 : vector<8x32xf32>
    %219 = arith.index_cast %190 : i32 to index
    %c0_138 = arith.constant 0 : index
    %220 = vector.load %arg20[%219, %c0_138] : memref<64x32xf32, #tpu.memory_space<vmem>>, vector<8x32xf32>
    %221 = arith.mulf %210, %202 : vector<8x32xf32>
    %222 = arith.addf %220, %221 : vector<8x32xf32>
    %223 = math.tanh %222 : vector<8x32xf32>
    %cst_139 = arith.constant 1.000000e+00 : f32
    %224 = vector.broadcast %cst_139 : f32 to vector<8x32xf32>
    %225 = arith.subf %224, %218 : vector<8x32xf32>
    %226 = arith.mulf %225, %223 : vector<8x32xf32>
    %227 = arith.mulf %218, %142 : vector<8x32xf32>
    %228 = arith.addf %226, %227 : vector<8x32xf32>
    %229 = vector.broadcast %188 : i32 to vector<8x1xi32>
    %230 = arith.cmpi sgt, %50, %229 : vector<8x1xi32>
    %231 = vector.shape_cast %230 : vector<8x1xi1> to vector<8x1xi1>
    %232 = vector.broadcast %231 : vector<8x1xi1> to vector<8x32xi1>
    %233 = arith.select %232, %228, %142 : vector<8x32xi1>, vector<8x32xf32>
    %c2_i32 = arith.constant 2 : i32
    %c8_i32_140 = arith.constant 8 : i32
    %234 = arith.muli %c2_i32, %c8_i32_140 : i32
    %235 = tpu.assume_multiple %234, 8 : i32
    %c0_141 = arith.constant 0 : index
    %c0_142 = arith.constant 0 : index
    %c0_143 = arith.constant 0 : index
    %236 = vector.load %arg4[%c0_141, %c0_142, %c0_143] : memref<3x32x32xf32, #tpu.memory_space<vmem>>, vector<1x32x32xf32>
    %237 = vector.shape_cast %236 : vector<1x32x32xf32> to vector<32x32xf32>
    %cst_144 = arith.constant dense<0.000000e+00> : vector<8x32xf32>
    %238 = tpu.matmul %187, %237, %cst_144 {dimension_numbers = #tpu.dot_dimension_numbers<[1], [0], [0], [1], [0, 0, 1, 1], [], []>} : vector<8x32xf32>, vector<32x32xf32>, vector<8x32xf32> -> vector<8x32xf32>
    %c1_145 = arith.constant 1 : index
    %c0_146 = arith.constant 0 : index
    %c0_147 = arith.constant 0 : index
    %239 = vector.load %arg4[%c1_145, %c0_146, %c0_147] : memref<3x32x32xf32, #tpu.memory_space<vmem>>, vector<1x32x32xf32>
    %240 = vector.shape_cast %239 : vector<1x32x32xf32> to vector<32x32xf32>
    %cst_148 = arith.constant dense<0.000000e+00> : vector<8x32xf32>
    %241 = tpu.matmul %187, %240, %cst_148 {dimension_numbers = #tpu.dot_dimension_numbers<[1], [0], [0], [1], [0, 0, 1, 1], [], []>} : vector<8x32xf32>, vector<32x32xf32>, vector<8x32xf32> -> vector<8x32xf32>
    %c2_149 = arith.constant 2 : index
    %c0_150 = arith.constant 0 : index
    %c0_151 = arith.constant 0 : index
    %242 = vector.load %arg4[%c2_149, %c0_150, %c0_151] : memref<3x32x32xf32, #tpu.memory_space<vmem>>, vector<1x32x32xf32>
    %243 = vector.shape_cast %242 : vector<1x32x32xf32> to vector<32x32xf32>
    %cst_152 = arith.constant dense<0.000000e+00> : vector<8x32xf32>
    %244 = tpu.matmul %187, %243, %cst_152 {dimension_numbers = #tpu.dot_dimension_numbers<[1], [0], [0], [1], [0, 0, 1, 1], [], []>} : vector<8x32xf32>, vector<32x32xf32>, vector<8x32xf32> -> vector<8x32xf32>
    %c0_153 = arith.constant 0 : index
    %c0_154 = arith.constant 0 : index
    %245 = vector.load %arg6[%c0_153, %c0_154] : memref<1x32xf32, #tpu.memory_space<vmem>>, vector<1x32xf32>
    %246 = vector.broadcast %245 : vector<1x32xf32> to vector<8x32xf32>
    %247 = arith.addf %244, %246 : vector<8x32xf32>
    %248 = arith.index_cast %235 : i32 to index
    %c0_155 = arith.constant 0 : index
    %249 = vector.load %arg15[%248, %c0_155] : memref<64x32xf32, #tpu.memory_space<vmem>>, vector<8x32xf32>
    %250 = arith.addf %249, %238 : vector<8x32xf32>
    %251 = arith.negf %250 : vector<8x32xf32>
    %252 = math.exp %251 : vector<8x32xf32>
    %cst_156 = arith.constant 1.000000e+00 : f32
    %253 = vector.broadcast %cst_156 : f32 to vector<8x32xf32>
    %254 = arith.addf %253, %252 : vector<8x32xf32>
    %255 = arith.divf %253, %254 : vector<8x32xf32>
    %256 = arith.index_cast %235 : i32 to index
    %c0_157 = arith.constant 0 : index
    %257 = vector.load %arg16[%256, %c0_157] : memref<64x32xf32, #tpu.memory_space<vmem>>, vector<8x32xf32>
    %258 = arith.addf %257, %241 : vector<8x32xf32>
    %259 = arith.negf %258 : vector<8x32xf32>
    %260 = math.exp %259 : vector<8x32xf32>
    %cst_158 = arith.constant 1.000000e+00 : f32
    %261 = vector.broadcast %cst_158 : f32 to vector<8x32xf32>
    %262 = arith.addf %261, %260 : vector<8x32xf32>
    %263 = arith.divf %261, %262 : vector<8x32xf32>
    %264 = arith.index_cast %235 : i32 to index
    %c0_159 = arith.constant 0 : index
    %265 = vector.load %arg17[%264, %c0_159] : memref<64x32xf32, #tpu.memory_space<vmem>>, vector<8x32xf32>
    %266 = arith.mulf %255, %247 : vector<8x32xf32>
    %267 = arith.addf %265, %266 : vector<8x32xf32>
    %268 = math.tanh %267 : vector<8x32xf32>
    %cst_160 = arith.constant 1.000000e+00 : f32
    %269 = vector.broadcast %cst_160 : f32 to vector<8x32xf32>
    %270 = arith.subf %269, %263 : vector<8x32xf32>
    %271 = arith.mulf %270, %268 : vector<8x32xf32>
    %272 = arith.mulf %263, %187 : vector<8x32xf32>
    %273 = arith.addf %271, %272 : vector<8x32xf32>
    %274 = vector.broadcast %c2_i32 : i32 to vector<8x1xi32>
    %275 = arith.cmpi sgt, %50, %274 : vector<8x1xi32>
    %276 = vector.shape_cast %275 : vector<8x1xi1> to vector<8x1xi1>
    %277 = vector.broadcast %276 : vector<8x1xi1> to vector<8x32xi1>
    %278 = arith.select %277, %273, %187 : vector<8x32xi1>, vector<8x32xf32>
    %c7_i32_161 = arith.constant 7 : i32
    %279 = arith.subi %c7_i32_161, %c2_i32 : i32
    %c8_i32_162 = arith.constant 8 : i32
    %280 = arith.muli %279, %c8_i32_162 : i32
    %281 = tpu.assume_multiple %280, 8 : i32
    %c0_163 = arith.constant 0 : index
    %c0_164 = arith.constant 0 : index
    %c0_165 = arith.constant 0 : index
    %282 = vector.load %arg8[%c0_163, %c0_164, %c0_165] : memref<3x32x32xf32, #tpu.memory_space<vmem>>, vector<1x32x32xf32>
    %283 = vector.shape_cast %282 : vector<1x32x32xf32> to vector<32x32xf32>
    %cst_166 = arith.constant dense<0.000000e+00> : vector<8x32xf32>
    %284 = tpu.matmul %233, %283, %cst_166 {dimension_numbers = #tpu.dot_dimension_numbers<[1], [0], [0], [1], [0, 0, 1, 1], [], []>} : vector<8x32xf32>, vector<32x32xf32>, vector<8x32xf32> -> vector<8x32xf32>
    %c1_167 = arith.constant 1 : index
    %c0_168 = arith.constant 0 : index
    %c0_169 = arith.constant 0 : index
    %285 = vector.load %arg8[%c1_167, %c0_168, %c0_169] : memref<3x32x32xf32, #tpu.memory_space<vmem>>, vector<1x32x32xf32>
    %286 = vector.shape_cast %285 : vector<1x32x32xf32> to vector<32x32xf32>
    %cst_170 = arith.constant dense<0.000000e+00> : vector<8x32xf32>
    %287 = tpu.matmul %233, %286, %cst_170 {dimension_numbers = #tpu.dot_dimension_numbers<[1], [0], [0], [1], [0, 0, 1, 1], [], []>} : vector<8x32xf32>, vector<32x32xf32>, vector<8x32xf32> -> vector<8x32xf32>
    %c2_171 = arith.constant 2 : index
    %c0_172 = arith.constant 0 : index
    %c0_173 = arith.constant 0 : index
    %288 = vector.load %arg8[%c2_171, %c0_172, %c0_173] : memref<3x32x32xf32, #tpu.memory_space<vmem>>, vector<1x32x32xf32>
    %289 = vector.shape_cast %288 : vector<1x32x32xf32> to vector<32x32xf32>
    %cst_174 = arith.constant dense<0.000000e+00> : vector<8x32xf32>
    %290 = tpu.matmul %233, %289, %cst_174 {dimension_numbers = #tpu.dot_dimension_numbers<[1], [0], [0], [1], [0, 0, 1, 1], [], []>} : vector<8x32xf32>, vector<32x32xf32>, vector<8x32xf32> -> vector<8x32xf32>
    %c0_175 = arith.constant 0 : index
    %c0_176 = arith.constant 0 : index
    %291 = vector.load %arg10[%c0_175, %c0_176] : memref<1x32xf32, #tpu.memory_space<vmem>>, vector<1x32xf32>
    %292 = vector.broadcast %291 : vector<1x32xf32> to vector<8x32xf32>
    %293 = arith.addf %290, %292 : vector<8x32xf32>
    %294 = arith.index_cast %281 : i32 to index
    %c0_177 = arith.constant 0 : index
    %295 = vector.load %arg18[%294, %c0_177] : memref<64x32xf32, #tpu.memory_space<vmem>>, vector<8x32xf32>
    %296 = arith.addf %295, %284 : vector<8x32xf32>
    %297 = arith.negf %296 : vector<8x32xf32>
    %298 = math.exp %297 : vector<8x32xf32>
    %cst_178 = arith.constant 1.000000e+00 : f32
    %299 = vector.broadcast %cst_178 : f32 to vector<8x32xf32>
    %300 = arith.addf %299, %298 : vector<8x32xf32>
    %301 = arith.divf %299, %300 : vector<8x32xf32>
    %302 = arith.index_cast %281 : i32 to index
    %c0_179 = arith.constant 0 : index
    %303 = vector.load %arg19[%302, %c0_179] : memref<64x32xf32, #tpu.memory_space<vmem>>, vector<8x32xf32>
    %304 = arith.addf %303, %287 : vector<8x32xf32>
    %305 = arith.negf %304 : vector<8x32xf32>
    %306 = math.exp %305 : vector<8x32xf32>
    %cst_180 = arith.constant 1.000000e+00 : f32
    %307 = vector.broadcast %cst_180 : f32 to vector<8x32xf32>
    %308 = arith.addf %307, %306 : vector<8x32xf32>
    %309 = arith.divf %307, %308 : vector<8x32xf32>
    %310 = arith.index_cast %281 : i32 to index
    %c0_181 = arith.constant 0 : index
    %311 = vector.load %arg20[%310, %c0_181] : memref<64x32xf32, #tpu.memory_space<vmem>>, vector<8x32xf32>
    %312 = arith.mulf %301, %293 : vector<8x32xf32>
    %313 = arith.addf %311, %312 : vector<8x32xf32>
    %314 = math.tanh %313 : vector<8x32xf32>
    %cst_182 = arith.constant 1.000000e+00 : f32
    %315 = vector.broadcast %cst_182 : f32 to vector<8x32xf32>
    %316 = arith.subf %315, %309 : vector<8x32xf32>
    %317 = arith.mulf %316, %314 : vector<8x32xf32>
    %318 = arith.mulf %309, %233 : vector<8x32xf32>
    %319 = arith.addf %317, %318 : vector<8x32xf32>
    %320 = vector.broadcast %279 : i32 to vector<8x1xi32>
    %321 = arith.cmpi sgt, %50, %320 : vector<8x1xi32>
    %322 = vector.shape_cast %321 : vector<8x1xi1> to vector<8x1xi1>
    %323 = vector.broadcast %322 : vector<8x1xi1> to vector<8x32xi1>
    %324 = arith.select %323, %319, %233 : vector<8x32xi1>, vector<8x32xf32>
    %c3_i32 = arith.constant 3 : i32
    %c8_i32_183 = arith.constant 8 : i32
    %325 = arith.muli %c3_i32, %c8_i32_183 : i32
    %326 = tpu.assume_multiple %325, 8 : i32
    %c0_184 = arith.constant 0 : index
    %c0_185 = arith.constant 0 : index
    %c0_186 = arith.constant 0 : index
    %327 = vector.load %arg4[%c0_184, %c0_185, %c0_186] : memref<3x32x32xf32, #tpu.memory_space<vmem>>, vector<1x32x32xf32>
    %328 = vector.shape_cast %327 : vector<1x32x32xf32> to vector<32x32xf32>
    %cst_187 = arith.constant dense<0.000000e+00> : vector<8x32xf32>
    %329 = tpu.matmul %278, %328, %cst_187 {dimension_numbers = #tpu.dot_dimension_numbers<[1], [0], [0], [1], [0, 0, 1, 1], [], []>} : vector<8x32xf32>, vector<32x32xf32>, vector<8x32xf32> -> vector<8x32xf32>
    %c1_188 = arith.constant 1 : index
    %c0_189 = arith.constant 0 : index
    %c0_190 = arith.constant 0 : index
    %330 = vector.load %arg4[%c1_188, %c0_189, %c0_190] : memref<3x32x32xf32, #tpu.memory_space<vmem>>, vector<1x32x32xf32>
    %331 = vector.shape_cast %330 : vector<1x32x32xf32> to vector<32x32xf32>
    %cst_191 = arith.constant dense<0.000000e+00> : vector<8x32xf32>
    %332 = tpu.matmul %278, %331, %cst_191 {dimension_numbers = #tpu.dot_dimension_numbers<[1], [0], [0], [1], [0, 0, 1, 1], [], []>} : vector<8x32xf32>, vector<32x32xf32>, vector<8x32xf32> -> vector<8x32xf32>
    %c2_192 = arith.constant 2 : index
    %c0_193 = arith.constant 0 : index
    %c0_194 = arith.constant 0 : index
    %333 = vector.load %arg4[%c2_192, %c0_193, %c0_194] : memref<3x32x32xf32, #tpu.memory_space<vmem>>, vector<1x32x32xf32>
    %334 = vector.shape_cast %333 : vector<1x32x32xf32> to vector<32x32xf32>
    %cst_195 = arith.constant dense<0.000000e+00> : vector<8x32xf32>
    %335 = tpu.matmul %278, %334, %cst_195 {dimension_numbers = #tpu.dot_dimension_numbers<[1], [0], [0], [1], [0, 0, 1, 1], [], []>} : vector<8x32xf32>, vector<32x32xf32>, vector<8x32xf32> -> vector<8x32xf32>
    %c0_196 = arith.constant 0 : index
    %c0_197 = arith.constant 0 : index
    %336 = vector.load %arg6[%c0_196, %c0_197] : memref<1x32xf32, #tpu.memory_space<vmem>>, vector<1x32xf32>
    %337 = vector.broadcast %336 : vector<1x32xf32> to vector<8x32xf32>
    %338 = arith.addf %335, %337 : vector<8x32xf32>
    %339 = arith.index_cast %326 : i32 to index
    %c0_198 = arith.constant 0 : index
    %340 = vector.load %arg15[%339, %c0_198] : memref<64x32xf32, #tpu.memory_space<vmem>>, vector<8x32xf32>
    %341 = arith.addf %340, %329 : vector<8x32xf32>
    %342 = arith.negf %341 : vector<8x32xf32>
    %343 = math.exp %342 : vector<8x32xf32>
    %cst_199 = arith.constant 1.000000e+00 : f32
    %344 = vector.broadcast %cst_199 : f32 to vector<8x32xf32>
    %345 = arith.addf %344, %343 : vector<8x32xf32>
    %346 = arith.divf %344, %345 : vector<8x32xf32>
    %347 = arith.index_cast %326 : i32 to index
    %c0_200 = arith.constant 0 : index
    %348 = vector.load %arg16[%347, %c0_200] : memref<64x32xf32, #tpu.memory_space<vmem>>, vector<8x32xf32>
    %349 = arith.addf %348, %332 : vector<8x32xf32>
    %350 = arith.negf %349 : vector<8x32xf32>
    %351 = math.exp %350 : vector<8x32xf32>
    %cst_201 = arith.constant 1.000000e+00 : f32
    %352 = vector.broadcast %cst_201 : f32 to vector<8x32xf32>
    %353 = arith.addf %352, %351 : vector<8x32xf32>
    %354 = arith.divf %352, %353 : vector<8x32xf32>
    %355 = arith.index_cast %326 : i32 to index
    %c0_202 = arith.constant 0 : index
    %356 = vector.load %arg17[%355, %c0_202] : memref<64x32xf32, #tpu.memory_space<vmem>>, vector<8x32xf32>
    %357 = arith.mulf %346, %338 : vector<8x32xf32>
    %358 = arith.addf %356, %357 : vector<8x32xf32>
    %359 = math.tanh %358 : vector<8x32xf32>
    %cst_203 = arith.constant 1.000000e+00 : f32
    %360 = vector.broadcast %cst_203 : f32 to vector<8x32xf32>
    %361 = arith.subf %360, %354 : vector<8x32xf32>
    %362 = arith.mulf %361, %359 : vector<8x32xf32>
    %363 = arith.mulf %354, %278 : vector<8x32xf32>
    %364 = arith.addf %362, %363 : vector<8x32xf32>
    %365 = vector.broadcast %c3_i32 : i32 to vector<8x1xi32>
    %366 = arith.cmpi sgt, %50, %365 : vector<8x1xi32>
    %367 = vector.shape_cast %366 : vector<8x1xi1> to vector<8x1xi1>
    %368 = vector.broadcast %367 : vector<8x1xi1> to vector<8x32xi1>
    %369 = arith.select %368, %364, %278 : vector<8x32xi1>, vector<8x32xf32>
    %c7_i32_204 = arith.constant 7 : i32
    %370 = arith.subi %c7_i32_204, %c3_i32 : i32
    %c8_i32_205 = arith.constant 8 : i32
    %371 = arith.muli %370, %c8_i32_205 : i32
    %372 = tpu.assume_multiple %371, 8 : i32
    %c0_206 = arith.constant 0 : index
    %c0_207 = arith.constant 0 : index
    %c0_208 = arith.constant 0 : index
    %373 = vector.load %arg8[%c0_206, %c0_207, %c0_208] : memref<3x32x32xf32, #tpu.memory_space<vmem>>, vector<1x32x32xf32>
    %374 = vector.shape_cast %373 : vector<1x32x32xf32> to vector<32x32xf32>
    %cst_209 = arith.constant dense<0.000000e+00> : vector<8x32xf32>
    %375 = tpu.matmul %324, %374, %cst_209 {dimension_numbers = #tpu.dot_dimension_numbers<[1], [0], [0], [1], [0, 0, 1, 1], [], []>} : vector<8x32xf32>, vector<32x32xf32>, vector<8x32xf32> -> vector<8x32xf32>
    %c1_210 = arith.constant 1 : index
    %c0_211 = arith.constant 0 : index
    %c0_212 = arith.constant 0 : index
    %376 = vector.load %arg8[%c1_210, %c0_211, %c0_212] : memref<3x32x32xf32, #tpu.memory_space<vmem>>, vector<1x32x32xf32>
    %377 = vector.shape_cast %376 : vector<1x32x32xf32> to vector<32x32xf32>
    %cst_213 = arith.constant dense<0.000000e+00> : vector<8x32xf32>
    %378 = tpu.matmul %324, %377, %cst_213 {dimension_numbers = #tpu.dot_dimension_numbers<[1], [0], [0], [1], [0, 0, 1, 1], [], []>} : vector<8x32xf32>, vector<32x32xf32>, vector<8x32xf32> -> vector<8x32xf32>
    %c2_214 = arith.constant 2 : index
    %c0_215 = arith.constant 0 : index
    %c0_216 = arith.constant 0 : index
    %379 = vector.load %arg8[%c2_214, %c0_215, %c0_216] : memref<3x32x32xf32, #tpu.memory_space<vmem>>, vector<1x32x32xf32>
    %380 = vector.shape_cast %379 : vector<1x32x32xf32> to vector<32x32xf32>
    %cst_217 = arith.constant dense<0.000000e+00> : vector<8x32xf32>
    %381 = tpu.matmul %324, %380, %cst_217 {dimension_numbers = #tpu.dot_dimension_numbers<[1], [0], [0], [1], [0, 0, 1, 1], [], []>} : vector<8x32xf32>, vector<32x32xf32>, vector<8x32xf32> -> vector<8x32xf32>
    %c0_218 = arith.constant 0 : index
    %c0_219 = arith.constant 0 : index
    %382 = vector.load %arg10[%c0_218, %c0_219] : memref<1x32xf32, #tpu.memory_space<vmem>>, vector<1x32xf32>
    %383 = vector.broadcast %382 : vector<1x32xf32> to vector<8x32xf32>
    %384 = arith.addf %381, %383 : vector<8x32xf32>
    %385 = arith.index_cast %372 : i32 to index
    %c0_220 = arith.constant 0 : index
    %386 = vector.load %arg18[%385, %c0_220] : memref<64x32xf32, #tpu.memory_space<vmem>>, vector<8x32xf32>
    %387 = arith.addf %386, %375 : vector<8x32xf32>
    %388 = arith.negf %387 : vector<8x32xf32>
    %389 = math.exp %388 : vector<8x32xf32>
    %cst_221 = arith.constant 1.000000e+00 : f32
    %390 = vector.broadcast %cst_221 : f32 to vector<8x32xf32>
    %391 = arith.addf %390, %389 : vector<8x32xf32>
    %392 = arith.divf %390, %391 : vector<8x32xf32>
    %393 = arith.index_cast %372 : i32 to index
    %c0_222 = arith.constant 0 : index
    %394 = vector.load %arg19[%393, %c0_222] : memref<64x32xf32, #tpu.memory_space<vmem>>, vector<8x32xf32>
    %395 = arith.addf %394, %378 : vector<8x32xf32>
    %396 = arith.negf %395 : vector<8x32xf32>
    %397 = math.exp %396 : vector<8x32xf32>
    %cst_223 = arith.constant 1.000000e+00 : f32
    %398 = vector.broadcast %cst_223 : f32 to vector<8x32xf32>
    %399 = arith.addf %398, %397 : vector<8x32xf32>
    %400 = arith.divf %398, %399 : vector<8x32xf32>
    %401 = arith.index_cast %372 : i32 to index
    %c0_224 = arith.constant 0 : index
    %402 = vector.load %arg20[%401, %c0_224] : memref<64x32xf32, #tpu.memory_space<vmem>>, vector<8x32xf32>
    %403 = arith.mulf %392, %384 : vector<8x32xf32>
    %404 = arith.addf %402, %403 : vector<8x32xf32>
    %405 = math.tanh %404 : vector<8x32xf32>
    %cst_225 = arith.constant 1.000000e+00 : f32
    %406 = vector.broadcast %cst_225 : f32 to vector<8x32xf32>
    %407 = arith.subf %406, %400 : vector<8x32xf32>
    %408 = arith.mulf %407, %405 : vector<8x32xf32>
    %409 = arith.mulf %400, %324 : vector<8x32xf32>
    %410 = arith.addf %408, %409 : vector<8x32xf32>
    %411 = vector.broadcast %370 : i32 to vector<8x1xi32>
    %412 = arith.cmpi sgt, %50, %411 : vector<8x1xi32>
    %413 = vector.shape_cast %412 : vector<8x1xi1> to vector<8x1xi1>
    %414 = vector.broadcast %413 : vector<8x1xi1> to vector<8x32xi1>
    %415 = arith.select %414, %410, %324 : vector<8x32xi1>, vector<8x32xf32>
    %c4_i32 = arith.constant 4 : i32
    %c8_i32_226 = arith.constant 8 : i32
    %416 = arith.muli %c4_i32, %c8_i32_226 : i32
    %417 = tpu.assume_multiple %416, 8 : i32
    %c0_227 = arith.constant 0 : index
    %c0_228 = arith.constant 0 : index
    %c0_229 = arith.constant 0 : index
    %418 = vector.load %arg4[%c0_227, %c0_228, %c0_229] : memref<3x32x32xf32, #tpu.memory_space<vmem>>, vector<1x32x32xf32>
    %419 = vector.shape_cast %418 : vector<1x32x32xf32> to vector<32x32xf32>
    %cst_230 = arith.constant dense<0.000000e+00> : vector<8x32xf32>
    %420 = tpu.matmul %369, %419, %cst_230 {dimension_numbers = #tpu.dot_dimension_numbers<[1], [0], [0], [1], [0, 0, 1, 1], [], []>} : vector<8x32xf32>, vector<32x32xf32>, vector<8x32xf32> -> vector<8x32xf32>
    %c1_231 = arith.constant 1 : index
    %c0_232 = arith.constant 0 : index
    %c0_233 = arith.constant 0 : index
    %421 = vector.load %arg4[%c1_231, %c0_232, %c0_233] : memref<3x32x32xf32, #tpu.memory_space<vmem>>, vector<1x32x32xf32>
    %422 = vector.shape_cast %421 : vector<1x32x32xf32> to vector<32x32xf32>
    %cst_234 = arith.constant dense<0.000000e+00> : vector<8x32xf32>
    %423 = tpu.matmul %369, %422, %cst_234 {dimension_numbers = #tpu.dot_dimension_numbers<[1], [0], [0], [1], [0, 0, 1, 1], [], []>} : vector<8x32xf32>, vector<32x32xf32>, vector<8x32xf32> -> vector<8x32xf32>
    %c2_235 = arith.constant 2 : index
    %c0_236 = arith.constant 0 : index
    %c0_237 = arith.constant 0 : index
    %424 = vector.load %arg4[%c2_235, %c0_236, %c0_237] : memref<3x32x32xf32, #tpu.memory_space<vmem>>, vector<1x32x32xf32>
    %425 = vector.shape_cast %424 : vector<1x32x32xf32> to vector<32x32xf32>
    %cst_238 = arith.constant dense<0.000000e+00> : vector<8x32xf32>
    %426 = tpu.matmul %369, %425, %cst_238 {dimension_numbers = #tpu.dot_dimension_numbers<[1], [0], [0], [1], [0, 0, 1, 1], [], []>} : vector<8x32xf32>, vector<32x32xf32>, vector<8x32xf32> -> vector<8x32xf32>
    %c0_239 = arith.constant 0 : index
    %c0_240 = arith.constant 0 : index
    %427 = vector.load %arg6[%c0_239, %c0_240] : memref<1x32xf32, #tpu.memory_space<vmem>>, vector<1x32xf32>
    %428 = vector.broadcast %427 : vector<1x32xf32> to vector<8x32xf32>
    %429 = arith.addf %426, %428 : vector<8x32xf32>
    %430 = arith.index_cast %417 : i32 to index
    %c0_241 = arith.constant 0 : index
    %431 = vector.load %arg15[%430, %c0_241] : memref<64x32xf32, #tpu.memory_space<vmem>>, vector<8x32xf32>
    %432 = arith.addf %431, %420 : vector<8x32xf32>
    %433 = arith.negf %432 : vector<8x32xf32>
    %434 = math.exp %433 : vector<8x32xf32>
    %cst_242 = arith.constant 1.000000e+00 : f32
    %435 = vector.broadcast %cst_242 : f32 to vector<8x32xf32>
    %436 = arith.addf %435, %434 : vector<8x32xf32>
    %437 = arith.divf %435, %436 : vector<8x32xf32>
    %438 = arith.index_cast %417 : i32 to index
    %c0_243 = arith.constant 0 : index
    %439 = vector.load %arg16[%438, %c0_243] : memref<64x32xf32, #tpu.memory_space<vmem>>, vector<8x32xf32>
    %440 = arith.addf %439, %423 : vector<8x32xf32>
    %441 = arith.negf %440 : vector<8x32xf32>
    %442 = math.exp %441 : vector<8x32xf32>
    %cst_244 = arith.constant 1.000000e+00 : f32
    %443 = vector.broadcast %cst_244 : f32 to vector<8x32xf32>
    %444 = arith.addf %443, %442 : vector<8x32xf32>
    %445 = arith.divf %443, %444 : vector<8x32xf32>
    %446 = arith.index_cast %417 : i32 to index
    %c0_245 = arith.constant 0 : index
    %447 = vector.load %arg17[%446, %c0_245] : memref<64x32xf32, #tpu.memory_space<vmem>>, vector<8x32xf32>
    %448 = arith.mulf %437, %429 : vector<8x32xf32>
    %449 = arith.addf %447, %448 : vector<8x32xf32>
    %450 = math.tanh %449 : vector<8x32xf32>
    %cst_246 = arith.constant 1.000000e+00 : f32
    %451 = vector.broadcast %cst_246 : f32 to vector<8x32xf32>
    %452 = arith.subf %451, %445 : vector<8x32xf32>
    %453 = arith.mulf %452, %450 : vector<8x32xf32>
    %454 = arith.mulf %445, %369 : vector<8x32xf32>
    %455 = arith.addf %453, %454 : vector<8x32xf32>
    %456 = vector.broadcast %c4_i32 : i32 to vector<8x1xi32>
    %457 = arith.cmpi sgt, %50, %456 : vector<8x1xi32>
    %458 = vector.shape_cast %457 : vector<8x1xi1> to vector<8x1xi1>
    %459 = vector.broadcast %458 : vector<8x1xi1> to vector<8x32xi1>
    %460 = arith.select %459, %455, %369 : vector<8x32xi1>, vector<8x32xf32>
    %c7_i32_247 = arith.constant 7 : i32
    %461 = arith.subi %c7_i32_247, %c4_i32 : i32
    %c8_i32_248 = arith.constant 8 : i32
    %462 = arith.muli %461, %c8_i32_248 : i32
    %463 = tpu.assume_multiple %462, 8 : i32
    %c0_249 = arith.constant 0 : index
    %c0_250 = arith.constant 0 : index
    %c0_251 = arith.constant 0 : index
    %464 = vector.load %arg8[%c0_249, %c0_250, %c0_251] : memref<3x32x32xf32, #tpu.memory_space<vmem>>, vector<1x32x32xf32>
    %465 = vector.shape_cast %464 : vector<1x32x32xf32> to vector<32x32xf32>
    %cst_252 = arith.constant dense<0.000000e+00> : vector<8x32xf32>
    %466 = tpu.matmul %415, %465, %cst_252 {dimension_numbers = #tpu.dot_dimension_numbers<[1], [0], [0], [1], [0, 0, 1, 1], [], []>} : vector<8x32xf32>, vector<32x32xf32>, vector<8x32xf32> -> vector<8x32xf32>
    %c1_253 = arith.constant 1 : index
    %c0_254 = arith.constant 0 : index
    %c0_255 = arith.constant 0 : index
    %467 = vector.load %arg8[%c1_253, %c0_254, %c0_255] : memref<3x32x32xf32, #tpu.memory_space<vmem>>, vector<1x32x32xf32>
    %468 = vector.shape_cast %467 : vector<1x32x32xf32> to vector<32x32xf32>
    %cst_256 = arith.constant dense<0.000000e+00> : vector<8x32xf32>
    %469 = tpu.matmul %415, %468, %cst_256 {dimension_numbers = #tpu.dot_dimension_numbers<[1], [0], [0], [1], [0, 0, 1, 1], [], []>} : vector<8x32xf32>, vector<32x32xf32>, vector<8x32xf32> -> vector<8x32xf32>
    %c2_257 = arith.constant 2 : index
    %c0_258 = arith.constant 0 : index
    %c0_259 = arith.constant 0 : index
    %470 = vector.load %arg8[%c2_257, %c0_258, %c0_259] : memref<3x32x32xf32, #tpu.memory_space<vmem>>, vector<1x32x32xf32>
    %471 = vector.shape_cast %470 : vector<1x32x32xf32> to vector<32x32xf32>
    %cst_260 = arith.constant dense<0.000000e+00> : vector<8x32xf32>
    %472 = tpu.matmul %415, %471, %cst_260 {dimension_numbers = #tpu.dot_dimension_numbers<[1], [0], [0], [1], [0, 0, 1, 1], [], []>} : vector<8x32xf32>, vector<32x32xf32>, vector<8x32xf32> -> vector<8x32xf32>
    %c0_261 = arith.constant 0 : index
    %c0_262 = arith.constant 0 : index
    %473 = vector.load %arg10[%c0_261, %c0_262] : memref<1x32xf32, #tpu.memory_space<vmem>>, vector<1x32xf32>
    %474 = vector.broadcast %473 : vector<1x32xf32> to vector<8x32xf32>
    %475 = arith.addf %472, %474 : vector<8x32xf32>
    %476 = arith.index_cast %463 : i32 to index
    %c0_263 = arith.constant 0 : index
    %477 = vector.load %arg18[%476, %c0_263] : memref<64x32xf32, #tpu.memory_space<vmem>>, vector<8x32xf32>
    %478 = arith.addf %477, %466 : vector<8x32xf32>
    %479 = arith.negf %478 : vector<8x32xf32>
    %480 = math.exp %479 : vector<8x32xf32>
    %cst_264 = arith.constant 1.000000e+00 : f32
    %481 = vector.broadcast %cst_264 : f32 to vector<8x32xf32>
    %482 = arith.addf %481, %480 : vector<8x32xf32>
    %483 = arith.divf %481, %482 : vector<8x32xf32>
    %484 = arith.index_cast %463 : i32 to index
    %c0_265 = arith.constant 0 : index
    %485 = vector.load %arg19[%484, %c0_265] : memref<64x32xf32, #tpu.memory_space<vmem>>, vector<8x32xf32>
    %486 = arith.addf %485, %469 : vector<8x32xf32>
    %487 = arith.negf %486 : vector<8x32xf32>
    %488 = math.exp %487 : vector<8x32xf32>
    %cst_266 = arith.constant 1.000000e+00 : f32
    %489 = vector.broadcast %cst_266 : f32 to vector<8x32xf32>
    %490 = arith.addf %489, %488 : vector<8x32xf32>
    %491 = arith.divf %489, %490 : vector<8x32xf32>
    %492 = arith.index_cast %463 : i32 to index
    %c0_267 = arith.constant 0 : index
    %493 = vector.load %arg20[%492, %c0_267] : memref<64x32xf32, #tpu.memory_space<vmem>>, vector<8x32xf32>
    %494 = arith.mulf %483, %475 : vector<8x32xf32>
    %495 = arith.addf %493, %494 : vector<8x32xf32>
    %496 = math.tanh %495 : vector<8x32xf32>
    %cst_268 = arith.constant 1.000000e+00 : f32
    %497 = vector.broadcast %cst_268 : f32 to vector<8x32xf32>
    %498 = arith.subf %497, %491 : vector<8x32xf32>
    %499 = arith.mulf %498, %496 : vector<8x32xf32>
    %500 = arith.mulf %491, %415 : vector<8x32xf32>
    %501 = arith.addf %499, %500 : vector<8x32xf32>
    %502 = vector.broadcast %461 : i32 to vector<8x1xi32>
    %503 = arith.cmpi sgt, %50, %502 : vector<8x1xi32>
    %504 = vector.shape_cast %503 : vector<8x1xi1> to vector<8x1xi1>
    %505 = vector.broadcast %504 : vector<8x1xi1> to vector<8x32xi1>
    %506 = arith.select %505, %501, %415 : vector<8x32xi1>, vector<8x32xf32>
    %c5_i32 = arith.constant 5 : i32
    %c8_i32_269 = arith.constant 8 : i32
    %507 = arith.muli %c5_i32, %c8_i32_269 : i32
    %508 = tpu.assume_multiple %507, 8 : i32
    %c0_270 = arith.constant 0 : index
    %c0_271 = arith.constant 0 : index
    %c0_272 = arith.constant 0 : index
    %509 = vector.load %arg4[%c0_270, %c0_271, %c0_272] : memref<3x32x32xf32, #tpu.memory_space<vmem>>, vector<1x32x32xf32>
    %510 = vector.shape_cast %509 : vector<1x32x32xf32> to vector<32x32xf32>
    %cst_273 = arith.constant dense<0.000000e+00> : vector<8x32xf32>
    %511 = tpu.matmul %460, %510, %cst_273 {dimension_numbers = #tpu.dot_dimension_numbers<[1], [0], [0], [1], [0, 0, 1, 1], [], []>} : vector<8x32xf32>, vector<32x32xf32>, vector<8x32xf32> -> vector<8x32xf32>
    %c1_274 = arith.constant 1 : index
    %c0_275 = arith.constant 0 : index
    %c0_276 = arith.constant 0 : index
    %512 = vector.load %arg4[%c1_274, %c0_275, %c0_276] : memref<3x32x32xf32, #tpu.memory_space<vmem>>, vector<1x32x32xf32>
    %513 = vector.shape_cast %512 : vector<1x32x32xf32> to vector<32x32xf32>
    %cst_277 = arith.constant dense<0.000000e+00> : vector<8x32xf32>
    %514 = tpu.matmul %460, %513, %cst_277 {dimension_numbers = #tpu.dot_dimension_numbers<[1], [0], [0], [1], [0, 0, 1, 1], [], []>} : vector<8x32xf32>, vector<32x32xf32>, vector<8x32xf32> -> vector<8x32xf32>
    %c2_278 = arith.constant 2 : index
    %c0_279 = arith.constant 0 : index
    %c0_280 = arith.constant 0 : index
    %515 = vector.load %arg4[%c2_278, %c0_279, %c0_280] : memref<3x32x32xf32, #tpu.memory_space<vmem>>, vector<1x32x32xf32>
    %516 = vector.shape_cast %515 : vector<1x32x32xf32> to vector<32x32xf32>
    %cst_281 = arith.constant dense<0.000000e+00> : vector<8x32xf32>
    %517 = tpu.matmul %460, %516, %cst_281 {dimension_numbers = #tpu.dot_dimension_numbers<[1], [0], [0], [1], [0, 0, 1, 1], [], []>} : vector<8x32xf32>, vector<32x32xf32>, vector<8x32xf32> -> vector<8x32xf32>
    %c0_282 = arith.constant 0 : index
    %c0_283 = arith.constant 0 : index
    %518 = vector.load %arg6[%c0_282, %c0_283] : memref<1x32xf32, #tpu.memory_space<vmem>>, vector<1x32xf32>
    %519 = vector.broadcast %518 : vector<1x32xf32> to vector<8x32xf32>
    %520 = arith.addf %517, %519 : vector<8x32xf32>
    %521 = arith.index_cast %508 : i32 to index
    %c0_284 = arith.constant 0 : index
    %522 = vector.load %arg15[%521, %c0_284] : memref<64x32xf32, #tpu.memory_space<vmem>>, vector<8x32xf32>
    %523 = arith.addf %522, %511 : vector<8x32xf32>
    %524 = arith.negf %523 : vector<8x32xf32>
    %525 = math.exp %524 : vector<8x32xf32>
    %cst_285 = arith.constant 1.000000e+00 : f32
    %526 = vector.broadcast %cst_285 : f32 to vector<8x32xf32>
    %527 = arith.addf %526, %525 : vector<8x32xf32>
    %528 = arith.divf %526, %527 : vector<8x32xf32>
    %529 = arith.index_cast %508 : i32 to index
    %c0_286 = arith.constant 0 : index
    %530 = vector.load %arg16[%529, %c0_286] : memref<64x32xf32, #tpu.memory_space<vmem>>, vector<8x32xf32>
    %531 = arith.addf %530, %514 : vector<8x32xf32>
    %532 = arith.negf %531 : vector<8x32xf32>
    %533 = math.exp %532 : vector<8x32xf32>
    %cst_287 = arith.constant 1.000000e+00 : f32
    %534 = vector.broadcast %cst_287 : f32 to vector<8x32xf32>
    %535 = arith.addf %534, %533 : vector<8x32xf32>
    %536 = arith.divf %534, %535 : vector<8x32xf32>
    %537 = arith.index_cast %508 : i32 to index
    %c0_288 = arith.constant 0 : index
    %538 = vector.load %arg17[%537, %c0_288] : memref<64x32xf32, #tpu.memory_space<vmem>>, vector<8x32xf32>
    %539 = arith.mulf %528, %520 : vector<8x32xf32>
    %540 = arith.addf %538, %539 : vector<8x32xf32>
    %541 = math.tanh %540 : vector<8x32xf32>
    %cst_289 = arith.constant 1.000000e+00 : f32
    %542 = vector.broadcast %cst_289 : f32 to vector<8x32xf32>
    %543 = arith.subf %542, %536 : vector<8x32xf32>
    %544 = arith.mulf %543, %541 : vector<8x32xf32>
    %545 = arith.mulf %536, %460 : vector<8x32xf32>
    %546 = arith.addf %544, %545 : vector<8x32xf32>
    %547 = vector.broadcast %c5_i32 : i32 to vector<8x1xi32>
    %548 = arith.cmpi sgt, %50, %547 : vector<8x1xi32>
    %549 = vector.shape_cast %548 : vector<8x1xi1> to vector<8x1xi1>
    %550 = vector.broadcast %549 : vector<8x1xi1> to vector<8x32xi1>
    %551 = arith.select %550, %546, %460 : vector<8x32xi1>, vector<8x32xf32>
    %c7_i32_290 = arith.constant 7 : i32
    %552 = arith.subi %c7_i32_290, %c5_i32 : i32
    %c8_i32_291 = arith.constant 8 : i32
    %553 = arith.muli %552, %c8_i32_291 : i32
    %554 = tpu.assume_multiple %553, 8 : i32
    %c0_292 = arith.constant 0 : index
    %c0_293 = arith.constant 0 : index
    %c0_294 = arith.constant 0 : index
    %555 = vector.load %arg8[%c0_292, %c0_293, %c0_294] : memref<3x32x32xf32, #tpu.memory_space<vmem>>, vector<1x32x32xf32>
    %556 = vector.shape_cast %555 : vector<1x32x32xf32> to vector<32x32xf32>
    %cst_295 = arith.constant dense<0.000000e+00> : vector<8x32xf32>
    %557 = tpu.matmul %506, %556, %cst_295 {dimension_numbers = #tpu.dot_dimension_numbers<[1], [0], [0], [1], [0, 0, 1, 1], [], []>} : vector<8x32xf32>, vector<32x32xf32>, vector<8x32xf32> -> vector<8x32xf32>
    %c1_296 = arith.constant 1 : index
    %c0_297 = arith.constant 0 : index
    %c0_298 = arith.constant 0 : index
    %558 = vector.load %arg8[%c1_296, %c0_297, %c0_298] : memref<3x32x32xf32, #tpu.memory_space<vmem>>, vector<1x32x32xf32>
    %559 = vector.shape_cast %558 : vector<1x32x32xf32> to vector<32x32xf32>
    %cst_299 = arith.constant dense<0.000000e+00> : vector<8x32xf32>
    %560 = tpu.matmul %506, %559, %cst_299 {dimension_numbers = #tpu.dot_dimension_numbers<[1], [0], [0], [1], [0, 0, 1, 1], [], []>} : vector<8x32xf32>, vector<32x32xf32>, vector<8x32xf32> -> vector<8x32xf32>
    %c2_300 = arith.constant 2 : index
    %c0_301 = arith.constant 0 : index
    %c0_302 = arith.constant 0 : index
    %561 = vector.load %arg8[%c2_300, %c0_301, %c0_302] : memref<3x32x32xf32, #tpu.memory_space<vmem>>, vector<1x32x32xf32>
    %562 = vector.shape_cast %561 : vector<1x32x32xf32> to vector<32x32xf32>
    %cst_303 = arith.constant dense<0.000000e+00> : vector<8x32xf32>
    %563 = tpu.matmul %506, %562, %cst_303 {dimension_numbers = #tpu.dot_dimension_numbers<[1], [0], [0], [1], [0, 0, 1, 1], [], []>} : vector<8x32xf32>, vector<32x32xf32>, vector<8x32xf32> -> vector<8x32xf32>
    %c0_304 = arith.constant 0 : index
    %c0_305 = arith.constant 0 : index
    %564 = vector.load %arg10[%c0_304, %c0_305] : memref<1x32xf32, #tpu.memory_space<vmem>>, vector<1x32xf32>
    %565 = vector.broadcast %564 : vector<1x32xf32> to vector<8x32xf32>
    %566 = arith.addf %563, %565 : vector<8x32xf32>
    %567 = arith.index_cast %554 : i32 to index
    %c0_306 = arith.constant 0 : index
    %568 = vector.load %arg18[%567, %c0_306] : memref<64x32xf32, #tpu.memory_space<vmem>>, vector<8x32xf32>
    %569 = arith.addf %568, %557 : vector<8x32xf32>
    %570 = arith.negf %569 : vector<8x32xf32>
    %571 = math.exp %570 : vector<8x32xf32>
    %cst_307 = arith.constant 1.000000e+00 : f32
    %572 = vector.broadcast %cst_307 : f32 to vector<8x32xf32>
    %573 = arith.addf %572, %571 : vector<8x32xf32>
    %574 = arith.divf %572, %573 : vector<8x32xf32>
    %575 = arith.index_cast %554 : i32 to index
    %c0_308 = arith.constant 0 : index
    %576 = vector.load %arg19[%575, %c0_308] : memref<64x32xf32, #tpu.memory_space<vmem>>, vector<8x32xf32>
    %577 = arith.addf %576, %560 : vector<8x32xf32>
    %578 = arith.negf %577 : vector<8x32xf32>
    %579 = math.exp %578 : vector<8x32xf32>
    %cst_309 = arith.constant 1.000000e+00 : f32
    %580 = vector.broadcast %cst_309 : f32 to vector<8x32xf32>
    %581 = arith.addf %580, %579 : vector<8x32xf32>
    %582 = arith.divf %580, %581 : vector<8x32xf32>
    %583 = arith.index_cast %554 : i32 to index
    %c0_310 = arith.constant 0 : index
    %584 = vector.load %arg20[%583, %c0_310] : memref<64x32xf32, #tpu.memory_space<vmem>>, vector<8x32xf32>
    %585 = arith.mulf %574, %566 : vector<8x32xf32>
    %586 = arith.addf %584, %585 : vector<8x32xf32>
    %587 = math.tanh %586 : vector<8x32xf32>
    %cst_311 = arith.constant 1.000000e+00 : f32
    %588 = vector.broadcast %cst_311 : f32 to vector<8x32xf32>
    %589 = arith.subf %588, %582 : vector<8x32xf32>
    %590 = arith.mulf %589, %587 : vector<8x32xf32>
    %591 = arith.mulf %582, %506 : vector<8x32xf32>
    %592 = arith.addf %590, %591 : vector<8x32xf32>
    %593 = vector.broadcast %552 : i32 to vector<8x1xi32>
    %594 = arith.cmpi sgt, %50, %593 : vector<8x1xi32>
    %595 = vector.shape_cast %594 : vector<8x1xi1> to vector<8x1xi1>
    %596 = vector.broadcast %595 : vector<8x1xi1> to vector<8x32xi1>
    %597 = arith.select %596, %592, %506 : vector<8x32xi1>, vector<8x32xf32>
    %c6_i32 = arith.constant 6 : i32
    %c8_i32_312 = arith.constant 8 : i32
    %598 = arith.muli %c6_i32, %c8_i32_312 : i32
    %599 = tpu.assume_multiple %598, 8 : i32
    %c0_313 = arith.constant 0 : index
    %c0_314 = arith.constant 0 : index
    %c0_315 = arith.constant 0 : index
    %600 = vector.load %arg4[%c0_313, %c0_314, %c0_315] : memref<3x32x32xf32, #tpu.memory_space<vmem>>, vector<1x32x32xf32>
    %601 = vector.shape_cast %600 : vector<1x32x32xf32> to vector<32x32xf32>
    %cst_316 = arith.constant dense<0.000000e+00> : vector<8x32xf32>
    %602 = tpu.matmul %551, %601, %cst_316 {dimension_numbers = #tpu.dot_dimension_numbers<[1], [0], [0], [1], [0, 0, 1, 1], [], []>} : vector<8x32xf32>, vector<32x32xf32>, vector<8x32xf32> -> vector<8x32xf32>
    %c1_317 = arith.constant 1 : index
    %c0_318 = arith.constant 0 : index
    %c0_319 = arith.constant 0 : index
    %603 = vector.load %arg4[%c1_317, %c0_318, %c0_319] : memref<3x32x32xf32, #tpu.memory_space<vmem>>, vector<1x32x32xf32>
    %604 = vector.shape_cast %603 : vector<1x32x32xf32> to vector<32x32xf32>
    %cst_320 = arith.constant dense<0.000000e+00> : vector<8x32xf32>
    %605 = tpu.matmul %551, %604, %cst_320 {dimension_numbers = #tpu.dot_dimension_numbers<[1], [0], [0], [1], [0, 0, 1, 1], [], []>} : vector<8x32xf32>, vector<32x32xf32>, vector<8x32xf32> -> vector<8x32xf32>
    %c2_321 = arith.constant 2 : index
    %c0_322 = arith.constant 0 : index
    %c0_323 = arith.constant 0 : index
    %606 = vector.load %arg4[%c2_321, %c0_322, %c0_323] : memref<3x32x32xf32, #tpu.memory_space<vmem>>, vector<1x32x32xf32>
    %607 = vector.shape_cast %606 : vector<1x32x32xf32> to vector<32x32xf32>
    %cst_324 = arith.constant dense<0.000000e+00> : vector<8x32xf32>
    %608 = tpu.matmul %551, %607, %cst_324 {dimension_numbers = #tpu.dot_dimension_numbers<[1], [0], [0], [1], [0, 0, 1, 1], [], []>} : vector<8x32xf32>, vector<32x32xf32>, vector<8x32xf32> -> vector<8x32xf32>
    %c0_325 = arith.constant 0 : index
    %c0_326 = arith.constant 0 : index
    %609 = vector.load %arg6[%c0_325, %c0_326] : memref<1x32xf32, #tpu.memory_space<vmem>>, vector<1x32xf32>
    %610 = vector.broadcast %609 : vector<1x32xf32> to vector<8x32xf32>
    %611 = arith.addf %608, %610 : vector<8x32xf32>
    %612 = arith.index_cast %599 : i32 to index
    %c0_327 = arith.constant 0 : index
    %613 = vector.load %arg15[%612, %c0_327] : memref<64x32xf32, #tpu.memory_space<vmem>>, vector<8x32xf32>
    %614 = arith.addf %613, %602 : vector<8x32xf32>
    %615 = arith.negf %614 : vector<8x32xf32>
    %616 = math.exp %615 : vector<8x32xf32>
    %cst_328 = arith.constant 1.000000e+00 : f32
    %617 = vector.broadcast %cst_328 : f32 to vector<8x32xf32>
    %618 = arith.addf %617, %616 : vector<8x32xf32>
    %619 = arith.divf %617, %618 : vector<8x32xf32>
    %620 = arith.index_cast %599 : i32 to index
    %c0_329 = arith.constant 0 : index
    %621 = vector.load %arg16[%620, %c0_329] : memref<64x32xf32, #tpu.memory_space<vmem>>, vector<8x32xf32>
    %622 = arith.addf %621, %605 : vector<8x32xf32>
    %623 = arith.negf %622 : vector<8x32xf32>
    %624 = math.exp %623 : vector<8x32xf32>
    %cst_330 = arith.constant 1.000000e+00 : f32
    %625 = vector.broadcast %cst_330 : f32 to vector<8x32xf32>
    %626 = arith.addf %625, %624 : vector<8x32xf32>
    %627 = arith.divf %625, %626 : vector<8x32xf32>
    %628 = arith.index_cast %599 : i32 to index
    %c0_331 = arith.constant 0 : index
    %629 = vector.load %arg17[%628, %c0_331] : memref<64x32xf32, #tpu.memory_space<vmem>>, vector<8x32xf32>
    %630 = arith.mulf %619, %611 : vector<8x32xf32>
    %631 = arith.addf %629, %630 : vector<8x32xf32>
    %632 = math.tanh %631 : vector<8x32xf32>
    %cst_332 = arith.constant 1.000000e+00 : f32
    %633 = vector.broadcast %cst_332 : f32 to vector<8x32xf32>
    %634 = arith.subf %633, %627 : vector<8x32xf32>
    %635 = arith.mulf %634, %632 : vector<8x32xf32>
    %636 = arith.mulf %627, %551 : vector<8x32xf32>
    %637 = arith.addf %635, %636 : vector<8x32xf32>
    %638 = vector.broadcast %c6_i32 : i32 to vector<8x1xi32>
    %639 = arith.cmpi sgt, %50, %638 : vector<8x1xi32>
    %640 = vector.shape_cast %639 : vector<8x1xi1> to vector<8x1xi1>
    %641 = vector.broadcast %640 : vector<8x1xi1> to vector<8x32xi1>
    %642 = arith.select %641, %637, %551 : vector<8x32xi1>, vector<8x32xf32>
    %c7_i32_333 = arith.constant 7 : i32
    %643 = arith.subi %c7_i32_333, %c6_i32 : i32
    %c8_i32_334 = arith.constant 8 : i32
    %644 = arith.muli %643, %c8_i32_334 : i32
    %645 = tpu.assume_multiple %644, 8 : i32
    %c0_335 = arith.constant 0 : index
    %c0_336 = arith.constant 0 : index
    %c0_337 = arith.constant 0 : index
    %646 = vector.load %arg8[%c0_335, %c0_336, %c0_337] : memref<3x32x32xf32, #tpu.memory_space<vmem>>, vector<1x32x32xf32>
    %647 = vector.shape_cast %646 : vector<1x32x32xf32> to vector<32x32xf32>
    %cst_338 = arith.constant dense<0.000000e+00> : vector<8x32xf32>
    %648 = tpu.matmul %597, %647, %cst_338 {dimension_numbers = #tpu.dot_dimension_numbers<[1], [0], [0], [1], [0, 0, 1, 1], [], []>} : vector<8x32xf32>, vector<32x32xf32>, vector<8x32xf32> -> vector<8x32xf32>
    %c1_339 = arith.constant 1 : index
    %c0_340 = arith.constant 0 : index
    %c0_341 = arith.constant 0 : index
    %649 = vector.load %arg8[%c1_339, %c0_340, %c0_341] : memref<3x32x32xf32, #tpu.memory_space<vmem>>, vector<1x32x32xf32>
    %650 = vector.shape_cast %649 : vector<1x32x32xf32> to vector<32x32xf32>
    %cst_342 = arith.constant dense<0.000000e+00> : vector<8x32xf32>
    %651 = tpu.matmul %597, %650, %cst_342 {dimension_numbers = #tpu.dot_dimension_numbers<[1], [0], [0], [1], [0, 0, 1, 1], [], []>} : vector<8x32xf32>, vector<32x32xf32>, vector<8x32xf32> -> vector<8x32xf32>
    %c2_343 = arith.constant 2 : index
    %c0_344 = arith.constant 0 : index
    %c0_345 = arith.constant 0 : index
    %652 = vector.load %arg8[%c2_343, %c0_344, %c0_345] : memref<3x32x32xf32, #tpu.memory_space<vmem>>, vector<1x32x32xf32>
    %653 = vector.shape_cast %652 : vector<1x32x32xf32> to vector<32x32xf32>
    %cst_346 = arith.constant dense<0.000000e+00> : vector<8x32xf32>
    %654 = tpu.matmul %597, %653, %cst_346 {dimension_numbers = #tpu.dot_dimension_numbers<[1], [0], [0], [1], [0, 0, 1, 1], [], []>} : vector<8x32xf32>, vector<32x32xf32>, vector<8x32xf32> -> vector<8x32xf32>
    %c0_347 = arith.constant 0 : index
    %c0_348 = arith.constant 0 : index
    %655 = vector.load %arg10[%c0_347, %c0_348] : memref<1x32xf32, #tpu.memory_space<vmem>>, vector<1x32xf32>
    %656 = vector.broadcast %655 : vector<1x32xf32> to vector<8x32xf32>
    %657 = arith.addf %654, %656 : vector<8x32xf32>
    %658 = arith.index_cast %645 : i32 to index
    %c0_349 = arith.constant 0 : index
    %659 = vector.load %arg18[%658, %c0_349] : memref<64x32xf32, #tpu.memory_space<vmem>>, vector<8x32xf32>
    %660 = arith.addf %659, %648 : vector<8x32xf32>
    %661 = arith.negf %660 : vector<8x32xf32>
    %662 = math.exp %661 : vector<8x32xf32>
    %cst_350 = arith.constant 1.000000e+00 : f32
    %663 = vector.broadcast %cst_350 : f32 to vector<8x32xf32>
    %664 = arith.addf %663, %662 : vector<8x32xf32>
    %665 = arith.divf %663, %664 : vector<8x32xf32>
    %666 = arith.index_cast %645 : i32 to index
    %c0_351 = arith.constant 0 : index
    %667 = vector.load %arg19[%666, %c0_351] : memref<64x32xf32, #tpu.memory_space<vmem>>, vector<8x32xf32>
    %668 = arith.addf %667, %651 : vector<8x32xf32>
    %669 = arith.negf %668 : vector<8x32xf32>
    %670 = math.exp %669 : vector<8x32xf32>
    %cst_352 = arith.constant 1.000000e+00 : f32
    %671 = vector.broadcast %cst_352 : f32 to vector<8x32xf32>
    %672 = arith.addf %671, %670 : vector<8x32xf32>
    %673 = arith.divf %671, %672 : vector<8x32xf32>
    %674 = arith.index_cast %645 : i32 to index
    %c0_353 = arith.constant 0 : index
    %675 = vector.load %arg20[%674, %c0_353] : memref<64x32xf32, #tpu.memory_space<vmem>>, vector<8x32xf32>
    %676 = arith.mulf %665, %657 : vector<8x32xf32>
    %677 = arith.addf %675, %676 : vector<8x32xf32>
    %678 = math.tanh %677 : vector<8x32xf32>
    %cst_354 = arith.constant 1.000000e+00 : f32
    %679 = vector.broadcast %cst_354 : f32 to vector<8x32xf32>
    %680 = arith.subf %679, %673 : vector<8x32xf32>
    %681 = arith.mulf %680, %678 : vector<8x32xf32>
    %682 = arith.mulf %673, %597 : vector<8x32xf32>
    %683 = arith.addf %681, %682 : vector<8x32xf32>
    %684 = vector.broadcast %643 : i32 to vector<8x1xi32>
    %685 = arith.cmpi sgt, %50, %684 : vector<8x1xi32>
    %686 = vector.shape_cast %685 : vector<8x1xi1> to vector<8x1xi1>
    %687 = vector.broadcast %686 : vector<8x1xi1> to vector<8x32xi1>
    %688 = arith.select %687, %683, %597 : vector<8x32xi1>, vector<8x32xf32>
    %c7_i32_355 = arith.constant 7 : i32
    %c8_i32_356 = arith.constant 8 : i32
    %689 = arith.muli %c7_i32_355, %c8_i32_356 : i32
    %690 = tpu.assume_multiple %689, 8 : i32
    %c0_357 = arith.constant 0 : index
    %c0_358 = arith.constant 0 : index
    %c0_359 = arith.constant 0 : index
    %691 = vector.load %arg4[%c0_357, %c0_358, %c0_359] : memref<3x32x32xf32, #tpu.memory_space<vmem>>, vector<1x32x32xf32>
    %692 = vector.shape_cast %691 : vector<1x32x32xf32> to vector<32x32xf32>
    %cst_360 = arith.constant dense<0.000000e+00> : vector<8x32xf32>
    %693 = tpu.matmul %642, %692, %cst_360 {dimension_numbers = #tpu.dot_dimension_numbers<[1], [0], [0], [1], [0, 0, 1, 1], [], []>} : vector<8x32xf32>, vector<32x32xf32>, vector<8x32xf32> -> vector<8x32xf32>
    %c1_361 = arith.constant 1 : index
    %c0_362 = arith.constant 0 : index
    %c0_363 = arith.constant 0 : index
    %694 = vector.load %arg4[%c1_361, %c0_362, %c0_363] : memref<3x32x32xf32, #tpu.memory_space<vmem>>, vector<1x32x32xf32>
    %695 = vector.shape_cast %694 : vector<1x32x32xf32> to vector<32x32xf32>
    %cst_364 = arith.constant dense<0.000000e+00> : vector<8x32xf32>
    %696 = tpu.matmul %642, %695, %cst_364 {dimension_numbers = #tpu.dot_dimension_numbers<[1], [0], [0], [1], [0, 0, 1, 1], [], []>} : vector<8x32xf32>, vector<32x32xf32>, vector<8x32xf32> -> vector<8x32xf32>
    %c2_365 = arith.constant 2 : index
    %c0_366 = arith.constant 0 : index
    %c0_367 = arith.constant 0 : index
    %697 = vector.load %arg4[%c2_365, %c0_366, %c0_367] : memref<3x32x32xf32, #tpu.memory_space<vmem>>, vector<1x32x32xf32>
    %698 = vector.shape_cast %697 : vector<1x32x32xf32> to vector<32x32xf32>
    %cst_368 = arith.constant dense<0.000000e+00> : vector<8x32xf32>
    %699 = tpu.matmul %642, %698, %cst_368 {dimension_numbers = #tpu.dot_dimension_numbers<[1], [0], [0], [1], [0, 0, 1, 1], [], []>} : vector<8x32xf32>, vector<32x32xf32>, vector<8x32xf32> -> vector<8x32xf32>
    %c0_369 = arith.constant 0 : index
    %c0_370 = arith.constant 0 : index
    %700 = vector.load %arg6[%c0_369, %c0_370] : memref<1x32xf32, #tpu.memory_space<vmem>>, vector<1x32xf32>
    %701 = vector.broadcast %700 : vector<1x32xf32> to vector<8x32xf32>
    %702 = arith.addf %699, %701 : vector<8x32xf32>
    %703 = arith.index_cast %690 : i32 to index
    %c0_371 = arith.constant 0 : index
    %704 = vector.load %arg15[%703, %c0_371] : memref<64x32xf32, #tpu.memory_space<vmem>>, vector<8x32xf32>
    %705 = arith.addf %704, %693 : vector<8x32xf32>
    %706 = arith.negf %705 : vector<8x32xf32>
    %707 = math.exp %706 : vector<8x32xf32>
    %cst_372 = arith.constant 1.000000e+00 : f32
    %708 = vector.broadcast %cst_372 : f32 to vector<8x32xf32>
    %709 = arith.addf %708, %707 : vector<8x32xf32>
    %710 = arith.divf %708, %709 : vector<8x32xf32>
    %711 = arith.index_cast %690 : i32 to index
    %c0_373 = arith.constant 0 : index
    %712 = vector.load %arg16[%711, %c0_373] : memref<64x32xf32, #tpu.memory_space<vmem>>, vector<8x32xf32>
    %713 = arith.addf %712, %696 : vector<8x32xf32>
    %714 = arith.negf %713 : vector<8x32xf32>
    %715 = math.exp %714 : vector<8x32xf32>
    %cst_374 = arith.constant 1.000000e+00 : f32
    %716 = vector.broadcast %cst_374 : f32 to vector<8x32xf32>
    %717 = arith.addf %716, %715 : vector<8x32xf32>
    %718 = arith.divf %716, %717 : vector<8x32xf32>
    %719 = arith.index_cast %690 : i32 to index
    %c0_375 = arith.constant 0 : index
    %720 = vector.load %arg17[%719, %c0_375] : memref<64x32xf32, #tpu.memory_space<vmem>>, vector<8x32xf32>
    %721 = arith.mulf %710, %702 : vector<8x32xf32>
    %722 = arith.addf %720, %721 : vector<8x32xf32>
    %723 = math.tanh %722 : vector<8x32xf32>
    %cst_376 = arith.constant 1.000000e+00 : f32
    %724 = vector.broadcast %cst_376 : f32 to vector<8x32xf32>
    %725 = arith.subf %724, %718 : vector<8x32xf32>
    %726 = arith.mulf %725, %723 : vector<8x32xf32>
    %727 = arith.mulf %718, %642 : vector<8x32xf32>
    %728 = arith.addf %726, %727 : vector<8x32xf32>
    %729 = vector.broadcast %c7_i32_355 : i32 to vector<8x1xi32>
    %730 = arith.cmpi sgt, %50, %729 : vector<8x1xi32>
    %731 = vector.shape_cast %730 : vector<8x1xi1> to vector<8x1xi1>
    %732 = vector.broadcast %731 : vector<8x1xi1> to vector<8x32xi1>
    %733 = arith.select %732, %728, %642 : vector<8x32xi1>, vector<8x32xf32>
    %c7_i32_377 = arith.constant 7 : i32
    %734 = arith.subi %c7_i32_377, %c7_i32_355 : i32
    %c8_i32_378 = arith.constant 8 : i32
    %735 = arith.muli %734, %c8_i32_378 : i32
    %736 = tpu.assume_multiple %735, 8 : i32
    %c0_379 = arith.constant 0 : index
    %c0_380 = arith.constant 0 : index
    %c0_381 = arith.constant 0 : index
    %737 = vector.load %arg8[%c0_379, %c0_380, %c0_381] : memref<3x32x32xf32, #tpu.memory_space<vmem>>, vector<1x32x32xf32>
    %738 = vector.shape_cast %737 : vector<1x32x32xf32> to vector<32x32xf32>
    %cst_382 = arith.constant dense<0.000000e+00> : vector<8x32xf32>
    %739 = tpu.matmul %688, %738, %cst_382 {dimension_numbers = #tpu.dot_dimension_numbers<[1], [0], [0], [1], [0, 0, 1, 1], [], []>} : vector<8x32xf32>, vector<32x32xf32>, vector<8x32xf32> -> vector<8x32xf32>
    %c1_383 = arith.constant 1 : index
    %c0_384 = arith.constant 0 : index
    %c0_385 = arith.constant 0 : index
    %740 = vector.load %arg8[%c1_383, %c0_384, %c0_385] : memref<3x32x32xf32, #tpu.memory_space<vmem>>, vector<1x32x32xf32>
    %741 = vector.shape_cast %740 : vector<1x32x32xf32> to vector<32x32xf32>
    %cst_386 = arith.constant dense<0.000000e+00> : vector<8x32xf32>
    %742 = tpu.matmul %688, %741, %cst_386 {dimension_numbers = #tpu.dot_dimension_numbers<[1], [0], [0], [1], [0, 0, 1, 1], [], []>} : vector<8x32xf32>, vector<32x32xf32>, vector<8x32xf32> -> vector<8x32xf32>
    %c2_387 = arith.constant 2 : index
    %c0_388 = arith.constant 0 : index
    %c0_389 = arith.constant 0 : index
    %743 = vector.load %arg8[%c2_387, %c0_388, %c0_389] : memref<3x32x32xf32, #tpu.memory_space<vmem>>, vector<1x32x32xf32>
    %744 = vector.shape_cast %743 : vector<1x32x32xf32> to vector<32x32xf32>
    %cst_390 = arith.constant dense<0.000000e+00> : vector<8x32xf32>
    %745 = tpu.matmul %688, %744, %cst_390 {dimension_numbers = #tpu.dot_dimension_numbers<[1], [0], [0], [1], [0, 0, 1, 1], [], []>} : vector<8x32xf32>, vector<32x32xf32>, vector<8x32xf32> -> vector<8x32xf32>
    %c0_391 = arith.constant 0 : index
    %c0_392 = arith.constant 0 : index
    %746 = vector.load %arg10[%c0_391, %c0_392] : memref<1x32xf32, #tpu.memory_space<vmem>>, vector<1x32xf32>
    %747 = vector.broadcast %746 : vector<1x32xf32> to vector<8x32xf32>
    %748 = arith.addf %745, %747 : vector<8x32xf32>
    %749 = arith.index_cast %736 : i32 to index
    %c0_393 = arith.constant 0 : index
    %750 = vector.load %arg18[%749, %c0_393] : memref<64x32xf32, #tpu.memory_space<vmem>>, vector<8x32xf32>
    %751 = arith.addf %750, %739 : vector<8x32xf32>
    %752 = arith.negf %751 : vector<8x32xf32>
    %753 = math.exp %752 : vector<8x32xf32>
    %cst_394 = arith.constant 1.000000e+00 : f32
    %754 = vector.broadcast %cst_394 : f32 to vector<8x32xf32>
    %755 = arith.addf %754, %753 : vector<8x32xf32>
    %756 = arith.divf %754, %755 : vector<8x32xf32>
    %757 = arith.index_cast %736 : i32 to index
    %c0_395 = arith.constant 0 : index
    %758 = vector.load %arg19[%757, %c0_395] : memref<64x32xf32, #tpu.memory_space<vmem>>, vector<8x32xf32>
    %759 = arith.addf %758, %742 : vector<8x32xf32>
    %760 = arith.negf %759 : vector<8x32xf32>
    %761 = math.exp %760 : vector<8x32xf32>
    %cst_396 = arith.constant 1.000000e+00 : f32
    %762 = vector.broadcast %cst_396 : f32 to vector<8x32xf32>
    %763 = arith.addf %762, %761 : vector<8x32xf32>
    %764 = arith.divf %762, %763 : vector<8x32xf32>
    %765 = arith.index_cast %736 : i32 to index
    %c0_397 = arith.constant 0 : index
    %766 = vector.load %arg20[%765, %c0_397] : memref<64x32xf32, #tpu.memory_space<vmem>>, vector<8x32xf32>
    %767 = arith.mulf %756, %748 : vector<8x32xf32>
    %768 = arith.addf %766, %767 : vector<8x32xf32>
    %769 = math.tanh %768 : vector<8x32xf32>
    %cst_398 = arith.constant 1.000000e+00 : f32
    %770 = vector.broadcast %cst_398 : f32 to vector<8x32xf32>
    %771 = arith.subf %770, %764 : vector<8x32xf32>
    %772 = arith.mulf %771, %769 : vector<8x32xf32>
    %773 = arith.mulf %764, %688 : vector<8x32xf32>
    %774 = arith.addf %772, %773 : vector<8x32xf32>
    %775 = vector.broadcast %734 : i32 to vector<8x1xi32>
    %776 = arith.cmpi sgt, %50, %775 : vector<8x1xi32>
    %777 = vector.shape_cast %776 : vector<8x1xi1> to vector<8x1xi1>
    %778 = vector.broadcast %777 : vector<8x1xi1> to vector<8x32xi1>
    %779 = arith.select %778, %774, %688 : vector<8x32xi1>, vector<8x32xf32>
    %c8_i32_399 = arith.constant 8 : i32
    %c0_400 = arith.constant 0 : index
    %c0_401 = arith.constant 0 : index
    %780 = vector.load %arg11[%c0_400, %c0_401] : memref<32x128xf32, #tpu.memory_space<vmem>>, vector<32x128xf32>
    %cst_402 = arith.constant dense<0.000000e+00> : vector<8x128xf32>
    %781 = tpu.matmul %733, %780, %cst_402 {dimension_numbers = #tpu.dot_dimension_numbers<[1], [0], [0], [1], [0, 0, 1, 1], [], []>} : vector<8x32xf32>, vector<32x128xf32>, vector<8x128xf32> -> vector<8x128xf32>
    %c0_403 = arith.constant 0 : index
    %c0_404 = arith.constant 0 : index
    %782 = vector.load %arg12[%c0_403, %c0_404] : memref<32x128xf32, #tpu.memory_space<vmem>>, vector<32x128xf32>
    %cst_405 = arith.constant dense<0.000000e+00> : vector<8x128xf32>
    %783 = tpu.matmul %779, %782, %cst_405 {dimension_numbers = #tpu.dot_dimension_numbers<[1], [0], [0], [1], [0, 0, 1, 1], [], []>} : vector<8x32xf32>, vector<32x128xf32>, vector<8x128xf32> -> vector<8x128xf32>
    %784 = arith.addf %781, %783 : vector<8x128xf32>
    %c0_406 = arith.constant 0 : index
    %c0_407 = arith.constant 0 : index
    %785 = vector.load %arg13[%c0_406, %c0_407] : memref<1x128xf32, #tpu.memory_space<vmem>>, vector<1x128xf32>
    %786 = vector.broadcast %785 : vector<1x128xf32> to vector<8x128xf32>
    %787 = arith.addf %784, %786 : vector<8x128xf32>
    %c0_408 = arith.constant 0 : index
    %c0_409 = arith.constant 0 : index
    %788 = vector.load %arg14[%c0_408, %c0_409] : memref<8x128xf32, #tpu.memory_space<vmem>>, vector<8x128xf32>
    tpu.vector_store %arg14[%c0_408, %c0_409], %787 {strides = array<i32>} : memref<8x128xf32, #tpu.memory_space<vmem>>, vector<8x128xf32>,
    return
  }
  func.func @transform_0(%arg0: i32) -> (i32, i32, i32) {
    %c0_i32 = arith.constant 0 : i32
    %c0_i32_0 = arith.constant 0 : i32
    %c0_i32_1 = arith.constant 0 : i32
    return %arg0, %c0_i32, %c0_i32_0 : i32, i32, i32
  }
  func.func @transform_1(%arg0: i32) -> (i32, i32) {
    %c0_i32 = arith.constant 0 : i32
    %c0_i32_0 = arith.constant 0 : i32
    return %arg0, %c0_i32 : i32, i32
  }
  func.func @transform_2(%arg0: i32) -> (i32, i32, i32) {
    %c0_i32 = arith.constant 0 : i32
    %c0_i32_0 = arith.constant 0 : i32
    %c0_i32_1 = arith.constant 0 : i32
    %c0_i32_2 = arith.constant 0 : i32
    return %c0_i32, %c0_i32_0, %c0_i32_1 : i32, i32, i32
  }
  func.func @transform_3(%arg0: i32) -> (i32, i32, i32) {
    %c0_i32 = arith.constant 0 : i32
    %c0_i32_0 = arith.constant 0 : i32
    %c0_i32_1 = arith.constant 0 : i32
    %c0_i32_2 = arith.constant 0 : i32
    return %c0_i32, %c0_i32_0, %c0_i32_1 : i32, i32, i32
  }
  func.func @transform_4(%arg0: i32) -> (i32, i32, i32) {
    %c0_i32 = arith.constant 0 : i32
    %c0_i32_0 = arith.constant 0 : i32
    %c0_i32_1 = arith.constant 0 : i32
    %c0_i32_2 = arith.constant 0 : i32
    return %c0_i32, %c0_i32_0, %c0_i32_1 : i32, i32, i32
  }
  func.func @transform_5(%arg0: i32) -> (i32, i32) {
    %c0_i32 = arith.constant 0 : i32
    %c0_i32_0 = arith.constant 0 : i32
    %c0_i32_1 = arith.constant 0 : i32
    return %c0_i32, %c0_i32_0 : i32, i32
  }
  func.func @transform_6(%arg0: i32) -> (i32, i32, i32) {
    %c0_i32 = arith.constant 0 : i32
    %c0_i32_0 = arith.constant 0 : i32
    %c0_i32_1 = arith.constant 0 : i32
    %c0_i32_2 = arith.constant 0 : i32
    return %c0_i32, %c0_i32_0, %c0_i32_1 : i32, i32, i32
  }
  func.func @transform_7(%arg0: i32) -> (i32, i32, i32) {
    %c0_i32 = arith.constant 0 : i32
    %c0_i32_0 = arith.constant 0 : i32
    %c0_i32_1 = arith.constant 0 : i32
    %c0_i32_2 = arith.constant 0 : i32
    return %c0_i32, %c0_i32_0, %c0_i32_1 : i32, i32, i32
  }
  func.func @transform_8(%arg0: i32) -> (i32, i32, i32) {
    %c0_i32 = arith.constant 0 : i32
    %c0_i32_0 = arith.constant 0 : i32
    %c0_i32_1 = arith.constant 0 : i32
    %c0_i32_2 = arith.constant 0 : i32
    return %c0_i32, %c0_i32_0, %c0_i32_1 : i32, i32, i32
  }
  func.func @transform_9(%arg0: i32) -> (i32, i32) {
    %c0_i32 = arith.constant 0 : i32
    %c0_i32_0 = arith.constant 0 : i32
    %c0_i32_1 = arith.constant 0 : i32
    return %c0_i32, %c0_i32_0 : i32, i32
  }
  func.func @transform_10(%arg0: i32) -> (i32, i32) {
    %c0_i32 = arith.constant 0 : i32
    %c0_i32_0 = arith.constant 0 : i32
    %c0_i32_1 = arith.constant 0 : i32
    return %c0_i32, %c0_i32_0 : i32, i32
  }
  func.func @transform_11(%arg0: i32) -> (i32, i32) {
    %c0_i32 = arith.constant 0 : i32
    %c0_i32_0 = arith.constant 0 : i32
    %c0_i32_1 = arith.constant 0 : i32
    return %c0_i32, %c0_i32_0 : i32, i32
  }
  func.func @transform_12(%arg0: i32) -> (i32, i32) {
    %c0_i32 = arith.constant 0 : i32
    %c0_i32_0 = arith.constant 0 : i32
    %c0_i32_1 = arith.constant 0 : i32
    return %c0_i32, %c0_i32_0 : i32, i32
  }
  func.func @transform_13(%arg0: i32) -> (i32, i32) {
    %c0_i32 = arith.constant 0 : i32
    %c0_i32_0 = arith.constant 0 : i32
    return %arg0, %c0_i32 : i32, i32
  }
}

</mosaic_0001>

<bundles_post_ra>
// kernel: rnn_encoder_forward.1
= control target key start
LH: loop header
LB: loop body
LE: loop exit
PB: predicated region body
PF: predicated region fallthrough
CT: control target
= control target key end

     0   :  { %vm60_vm0 = vcmask 64512   ;;  %v6480_v13 = vmov 0   ;;  %v6481_v18 = vmov 0.0|0.0   ;;  %vm6482_vm5 = vmmov 0   ;;  %s7459_s2 = inlined_call_operand.vmem [shape: f32[3,8,32], index: 2, kind: input, shape index: {}]   ;;  %s7460_s6 = inlined_call_operand.vmem [shape: f32[3,8,32], index: 6, kind: input, shape index: {}]   ;;  %s7461_s0 = inlined_call_operand.vmem [shape: f32[1,64,8], index: 0, kind: input, shape index: {}]   ;;  %s7462_s1 = inlined_call_operand.vmem [shape: s32[8,1], index: 1, kind: input, shape index: {}]   ;;  %s7463_s3 = inlined_call_operand.vmem [shape: f32[3,32,32], index: 3, kind: input, shape index: {}]   ;;  %s7464_s7 = inlined_call_operand.vmem [shape: f32[3,32,32], index: 7, kind: input, shape index: {}]   ;;  %s7465_s4 = inlined_call_operand.vmem [shape: f32[3,1,32], index: 4, kind: input, shape index: {}]   ;;  %s7466_s8 = inlined_call_operand.vmem [shape: f32[3,1,32], index: 8, kind: input, shape index: {}]   ;;  %s7467_s5 = inlined_call_operand.vmem [shape: f32[1,32], index: 5, kind: input, shape index: {}]   ;;  %s7468_s9 = inlined_call_operand.vmem [shape: f32[1,32], index: 9, kind: input, shape index: {}]   ;;  %s7469_s10 = inlined_call_operand.vmem [shape: f32[32,128], index: 10, kind: input, shape index: {}]   ;;  %s7470_s11 = inlined_call_operand.vmem [shape: f32[32,128], index: 11, kind: input, shape index: {}]   ;;  %s7471_s12 = inlined_call_operand.vmem [shape: f32[1,128], index: 12, kind: input, shape index: {}]   ;;  %s7472_s13 = inlined_call_operand.vmem [shape: f32[8,128], index: 13, kind: output, shape index: {}]  }
   0x1   :  { %v52_v0 = vld [vmem:[%s7459_s2] sm:$0xff]  ;;  %v6568_v3 = vld [vmem:[%s7461_s0 + $0x8] sm:$0xff]  ;;  %v6587_v6 = vld [vmem:[%s7461_s0 + $0x10] sm:$0xff]  ;;  %6316 = vset.pattern.permute.xlu0 %v6480_v13  ;;  %6317 = vset.pattern.permute.xlu1 %v6480_v13  ;;  %v6483_v37 = vmov 0.0   ;;  %vm190_vm10 = vcmask 261120  }
   0x2   :  { %v199_v1 = vld [vmem:[%s7460_s6] sm:$0xff]  ;;  %5378 = vmatprep.subr.mxu0 %v52_v0  ;;  %v4935_v4 = vld [vmem:[%s7459_s2 + $0x8] sm:$0xff]  ;;  %v6592_v7 = vld [vmem:[%s7461_s0 + $0x18] sm:$0xff] }
   0x3   :  { %v6563_v2 = vld [vmem:[%s7461_s0] sm:$0xff]  ;;  %5392 = vmatprep.subr.mxu1 %v199_v1  ;;  %5379 = vmatpush3.msra.mxu0 %v52_v0  ;;  %v4946_v5 = vld [vmem:[%s7460_s6 + $0x8] sm:$0xff]  ;;  %v4957_v9 = vld [vmem:[%s7459_s2 + $0x10] sm:$0xff] }
   0x4   :  { %5380 = vmatprep.mubr.msk.f32.mxu0 %vm60_vm0, %v6563_v2  ;;  %5393 = vmatpush3.msra.mxu1 %v199_v1  ;;  %v6597_v8 = vld [vmem:[%s7461_s0 + $0x20] sm:$0xff]  ;;  %v4968_v10 = vld [vmem:[%s7460_s6 + $0x10] sm:$0xff]  ;;  %v6620_v11 = vld [vmem:[%s7461_s0 + $0x28] sm:$0xff] }
   0x5   :  { %5394 = vmatprep.mubr.msk.f32.mxu1 %vm60_vm0, %v6563_v2  ;;  %5381 = vmatmul.mubr.msk.f32.vlgmr.msra.gmra.mrb[0].mxu0 %vm60_vm0, %v6568_v3  ;;  %v6625_v12 = vld [vmem:[%s7461_s0 + $0x30] sm:$0xff]  ;;  %v6636_v14 = vld [vmem:[%s7462_s1] sm:$0xff]  ;;  %v6645_v15 = vld [vmem:[%s7461_s0 + $0x38] sm:$0xff] }
   0x6   :  { %5395 = vmatmul.mubr.msk.f32.vlgmr.msra.gmra.mrb[0].mxu1 %vm60_vm0, %v6568_v3  ;;  %5406 = vmatprep.subr.mxu0 %v4935_v4  ;;  %vm1071_vm1 = vcmp.gt.s32.totalorder %v6636_v14, 0  ;;  %vm1336_vm2 = vcmp.gt.s32.totalorder %v6636_v14, 7  ;;  %vm2077_vm3 = vcmp.gt.s32.totalorder %v6636_v14, 2  ;;  %vm2571_vm4 = vcmp.gt.s32.totalorder %v6636_v14, 3  ;;  %v813_v21 = vld [vmem:[%s7463_s3] sm:$0xff]  ;;  %v814_v22 = vld [vmem:[%s7463_s3 + $0x8] sm:$0xff] }
   0x7   :  { %5420 = vmatprep.subr.mxu1 %v4946_v5  ;;  %5407 = vmatpush3.msra.mxu0 %v4935_v4  ;;  %v1072_v16 = vsel %vm1071_vm1, 1, %v6480_v13  ;;  %v1337_v17 = vsel %vm1336_vm2, 1, %v6480_v13  ;;  %v2078_v19 = vsel %vm2077_vm3, 1, %v6480_v13  ;;  %v2572_v20 = vsel %vm2571_vm4, 1, %v6480_v13  ;;  %v4979_v23 = vld [vmem:[%s7463_s3 + $0x20] sm:$0xff]  ;;  %v4980_v24 = vld [vmem:[%s7463_s3 + $0x28] sm:$0xff] }
   0x8   :  { %5421 = vmatpush3.msra.mxu1 %v4946_v5  ;;  %5383 = vmatprep.mubr.msk.f32.mxu0 %vm60_vm0, %v6587_v6  ;;  %v6709_v25 = vpack.c.bf16 %v814_v22, %v813_v21  ;;  %v6711_v26 = vpack.c.bf16 %v4980_v24, %v4979_v23  ;;  %v815_v27 = vld [vmem:[%s7463_s3 + $0x10] sm:$0xff]  ;;  %v816_v28 = vld [vmem:[%s7463_s3 + $0x18] sm:$0xff]  ;;  %v4983_v33 = vld [vmem:[%s7463_s3 + $0x40] sm:$0xff]  ;;  %vm1583_vm6 = vcmp.gt.s32.totalorder %v6636_v14, 1  ;;  %vm1830_vm7 = vcmp.gt.s32.totalorder %v6636_v14, 6 }
   0x9   :  { %5397 = vmatprep.mubr.msk.f32.mxu1 %vm60_vm0, %v6587_v6  ;;  %5384 = vmatmul.mubr.msk.f32.gmra.mrb[2].mxu0 %vm60_vm0, %v6592_v7  ;;  %v4981_v29 = vld [vmem:[%s7463_s3 + $0x30] sm:$0xff]  ;;  %v4982_v30 = vld [vmem:[%s7463_s3 + $0x38] sm:$0xff]  ;;  %v6735_v31 = vpack.c.bf16 %v816_v28, %v815_v27  ;;  %v4984_v34 = vld [vmem:[%s7463_s3 + $0x48] sm:$0xff]  ;;  %v1584_v58 = vsel %vm1583_vm6, 1, %v6480_v13  ;;  %v1831_v59 = vsel %vm1830_vm7, 1, %v6480_v13  ;;  %vm2324_vm8 = vcmp.gt.s32.totalorder %v6636_v14, 5 }
   0xa   :  { %5398 = vmatmul.mubr.msk.f32.gmra.mrb[2].mxu1 %vm60_vm0, %v6592_v7  ;;  %5386 = vmatprep.mubr.msk.f32.mxu0 %vm60_vm0, %v6597_v8  ;;  %v6737_v32 = vpack.c.bf16 %v4982_v30, %v4981_v29  ;;  %v1078_v35 = vld [vmem:[%s7464_s7] sm:$0xff]  ;;  %v1079_v36 = vld [vmem:[%s7464_s7 + $0x8] sm:$0xff]  ;;  %v6781_v38 = vpack.c.bf16 %v4984_v34, %v4983_v33  ;;  %v4985_v40 = vld [vmem:[%s7463_s3 + $0x50] sm:$0xff]  ;;  %v2325_v60 = vsel %vm2324_vm8, 1, %v6480_v13  ;;  %vm2818_vm9 = vcmp.gt.s32.totalorder %v6636_v14, 4 }
   0xb   :  { %5400 = vmatprep.mubr.msk.f32.mxu1 %vm60_vm0, %v6597_v8  ;;  %5434 = vmatprep.subr.mxu0 %v4957_v9  ;;  %v6783_v39 = vpack.c.bf16 %v1079_v36, %v1078_v35  ;;  %v4986_v41 = vld [vmem:[%s7463_s3 + $0x58] sm:$0xff]  ;;  %v1080_v42 = vld [vmem:[%s7464_s7 + $0x10] sm:$0xff]  ;;  %v4990_v46 = vld [vmem:[%s7464_s7 + $0x20] sm:$0xff]  ;;  %v2819_v61 = vsel %vm2818_vm9, 1, %v6480_v13 }
   0xc   :  { %5448 = vmatprep.subr.mxu1 %v4968_v10  ;;  %1074 = vperm.xlu0 %6316, %v1072_v16   ;;  %v1081_v43 = vld [vmem:[%s7464_s7 + $0x18] sm:$0xff]  ;;  %v6801_v44 = vpack.c.bf16 %v4986_v41, %v4985_v40  ;;  %v4991_v47 = vld [vmem:[%s7464_s7 + $0x28] sm:$0xff]  ;;  %v4994_v48 = vld [vmem:[%s7464_s7 + $0x40] sm:$0xff] }
   0xd   :  { %5387 = vmatmul.mubr.msk.f32.gmra.mrb[4].mxu0 %vm60_vm0, %v6620_v11  ;;  %v6803_v45 = vpack.c.bf16 %v1081_v43, %v1080_v42  ;;  %v4995_v49 = vld [vmem:[%s7464_s7 + $0x48] sm:$0xff]  ;;  %v6825_v50 = vpack.c.bf16 %v4991_v47, %v4990_v46  ;;  %v4992_v51 = vld [vmem:[%s7464_s7 + $0x30] sm:$0xff]  ;;  %v4993_v52 = vld [vmem:[%s7464_s7 + $0x38] sm:$0xff]  ;;  %1586 = vperm.xlu1 %6317, %v1584_v58  }
   0xe   :  { %5401 = vmatmul.mubr.msk.f32.gmra.mrb[4].mxu1 %vm60_vm0, %v6620_v11  ;;  %5389 = vmatprep.mubr.msk.f32.mxu0 %vm60_vm0, %v6625_v12  ;;  %v6835_v53 = vpack.c.bf16 %v4995_v49, %v4994_v48  ;;  %v4996_v54 = vld [vmem:[%s7464_s7 + $0x50] sm:$0xff]  ;;  %v4997_v55 = vld [vmem:[%s7464_s7 + $0x58] sm:$0xff]  ;;  %v6846_v56 = vpack.c.bf16 %v4993_v52, %v4992_v51  ;;  %v4917_v62 = vld [vmem:[%s7465_s4] ss:$0 sm:$0xff] }
   0xf   :  { %5403 = vmatprep.mubr.msk.f32.mxu1 %vm60_vm0, %v6625_v12  ;;  %v6852_v57 = vpack.c.bf16 %v4997_v55, %v4996_v54  ;;  %v4926_v63 = vld [vmem:[%s7466_s8] ss:$0 sm:$0xff]  ;;  %v4937_v40 = vld [vmem:[%s7465_s4 + $0x1] ss:$0 sm:$0xff] }
  0x10   :  { %1339 = vperm.xlu0 %6316, %v1337_v17   ;;  %v4948_v41 = vld [vmem:[%s7466_s8 + $0x1] ss:$0 sm:$0xff] }
  0x11   :  { %5390 = vmatmul.mubr.msk.f32.gmra.mrb[6].mxu0 %vm60_vm0, %v6645_v15  ;;  %1833 = vperm.xlu1 %6317, %v1831_v59  }
  0x12   :  { %5404 = vmatmul.mubr.msk.f32.gmra.mrb[6].mxu1 %vm60_vm0, %v6645_v15  ;;  %5408 = vmatprep.mubr.msk.f32.mxu0 %vm60_vm0, %v6563_v2 }
  0x13   :  { %5422 = vmatprep.mubr.msk.f32.mxu1 %vm60_vm0, %v6563_v2 }
  0x14   :  { %2080 = vperm.xlu0 %6316, %v2078_v19  }
  0x15   :  { %5409 = vmatmul.mubr.msk.f32.vlgmr.msra.gmra.mrb[8].mxu0 %vm60_vm0, %v6568_v3  ;;  %2327 = vperm.xlu1 %6317, %v2325_v60  }
  0x16   :  { %5423 = vmatmul.mubr.msk.f32.vlgmr.msra.gmra.mrb[8].mxu1 %vm60_vm0, %v6568_v3  ;;  %5435 = vmatpush3.msra.mxu0 %v4957_v9 }
  0x17   :  { %5449 = vmatpush3.msra.mxu1 %v4968_v10  ;;  %5411 = vmatprep.mubr.msk.f32.mxu0 %vm60_vm0, %v6587_v6 }
  0x18   :  { %5425 = vmatprep.mubr.msk.f32.mxu1 %vm60_vm0, %v6587_v6  ;;  %6012 = vmatprep.subr.bf16.mxu0 %v6481_v18 }
  0x19   :  { %6018 = vmatprep.subr.bf16.mxu1 %v6481_v18  ;;  %5412 = vmatmul.mubr.msk.f32.gmra.mrb[10].mxu0 %vm60_vm0, %v6592_v7 }
  0x1a   :  { %5426 = vmatmul.mubr.msk.f32.gmra.mrb[10].mxu1 %vm60_vm0, %v6592_v7  ;;  %5414 = vmatprep.mubr.msk.f32.mxu0 %vm60_vm0, %v6597_v8 }
  0x1b   :  { %5428 = vmatprep.mubr.msk.f32.mxu1 %vm60_vm0, %v6597_v8  ;;  %2574 = vperm.xlu0 %6316, %v2572_v20  }
  0x1c   :  { %2821 = vperm.xlu1 %6317, %v2819_v61  }
  0x1d   :  { %5415 = vmatmul.mubr.msk.f32.gmra.mrb[12].mxu0 %vm60_vm0, %v6620_v11 }
  0x1e   :  { %5429 = vmatmul.mubr.msk.f32.gmra.mrb[12].mxu1 %vm60_vm0, %v6620_v11  ;;  %5417 = vmatprep.mubr.msk.f32.mxu0 %vm60_vm0, %v6625_v12 }
  0x1f   :  { %5431 = vmatprep.mubr.msk.f32.mxu1 %vm60_vm0, %v6625_v12 }
  0x21   :  { %5418 = vmatmul.mubr.msk.f32.gmra.mrb[14].mxu0 %vm60_vm0, %v6645_v15 }
  0x22   :  { %5432 = vmatmul.mubr.msk.f32.gmra.mrb[14].mxu1 %vm60_vm0, %v6645_v15  ;;  %5436 = vmatprep.mubr.msk.f32.mxu0 %vm60_vm0, %v6563_v2 }
  0x23   :  { %5450 = vmatprep.mubr.msk.f32.mxu1 %vm60_vm0, %v6563_v2 }
  0x25   :  { %5437 = vmatmul.mubr.msk.f32.vlgmr.msra.gmra.mrb[16].mxu0 %vm60_vm0, %v6568_v3 }
  0x26   :  { %5451 = vmatmul.mubr.msk.f32.vlgmr.msra.gmra.mrb[16].mxu1 %vm60_vm0, %v6568_v3  ;;  %6014 = vmatpush3.bf16.msra.mxu0 %v6709_v25 }
  0x27   :  { %6020 = vmatpush3.bf16.msra.mxu1 %v6711_v26  ;;  %5439 = vmatprep.mubr.msk.f32.mxu0 %vm60_vm0, %v6587_v6 }
  0x28   :  { %5453 = vmatprep.mubr.msk.f32.mxu1 %vm60_vm0, %v6587_v6  ;;  %6015 = vmatprep.subr.bf16.mxu0 %v6481_v18 }
  0x29   :  { %6021 = vmatprep.subr.bf16.mxu1 %v6481_v18  ;;  %5440 = vmatmul.mubr.msk.f32.gmra.mrb[18].mxu0 %vm60_vm0, %v6592_v7 }
  0x2a   :  { %5454 = vmatmul.mubr.msk.f32.gmra.mrb[18].mxu1 %vm60_vm0, %v6592_v7  ;;  %5442 = vmatprep.mubr.msk.f32.mxu0 %vm60_vm0, %v6597_v8 }
  0x2b   :  { %5456 = vmatprep.mubr.msk.f32.mxu1 %vm60_vm0, %v6597_v8  ;;  %6017 = vmatpush3.bf16.msra.mxu0 %v6735_v31 }
  0x2c   :  { %6023 = vmatpush3.bf16.msra.mxu1 %v6737_v32  ;;  %6024 = vmatprep.subr.bf16.mxu0 %v6481_v18 }
  0x2d   :  { %6030 = vmatprep.subr.bf16.mxu1 %v6481_v18  ;;  %5443 = vmatmul.mubr.msk.f32.gmra.mrb[20].mxu0 %vm60_vm0, %v6620_v11 }
  0x2e   :  { %5457 = vmatmul.mubr.msk.f32.gmra.mrb[20].mxu1 %vm60_vm0, %v6620_v11  ;;  %5445 = vmatprep.mubr.msk.f32.mxu0 %vm60_vm0, %v6625_v12 }
  0x2f   :  { %5459 = vmatprep.mubr.msk.f32.mxu1 %vm60_vm0, %v6625_v12 }
  0x31   :  { %5446 = vmatmul.mubr.msk.f32.gmra.mrb[22].mxu0 %vm60_vm0, %v6645_v15 }
  0x32   :  { %5460 = vmatmul.mubr.msk.f32.gmra.mrb[22].mxu1 %vm60_vm0, %v6645_v15  ;;  %5470 = vmatprep.mubr.msk.f32.mxu0 %vm6482_vm5, %v6483_v37 }
  0x33   :  { %5481 = vmatprep.mubr.msk.f32.mxu1 %vm6482_vm5, %v6483_v37 }
  0x35   :  { %5471 = vmatmul.mubr.f32.vlgmr.msra.gmra.mrb[24].mxu0 %v6483_v37 }
  0x36   :  { %5482 = vmatmul.mubr.f32.vlgmr.msra.gmra.mrb[24].mxu1 %v6483_v37  ;;  %6026 = vmatpush3.bf16.msra.mxu0 %v6781_v38 }
  0x37   :  { %6032 = vmatpush3.bf16.msra.mxu1 %v6783_v39  ;;  %6027 = vmatprep.subr.bf16.mxu0 %v6481_v18 }
  0x38   :  { %6033 = vmatprep.subr.bf16.mxu1 %v6481_v18  ;;  %5503 = vmatprep.mubr.msk.f32.mxu1 %vm6482_vm5, %v6483_v37 }
  0x39   :  { %5492 = vmatprep.mubr.msk.f32.mxu0 %vm6482_vm5, %v6483_v37 }
  0x3a   :  { %6029 = vmatpush3.bf16.msra.mxu0 %v6801_v44 }
  0x3b   :  { %6035 = vmatpush3.bf16.msra.mxu1 %v6803_v45  ;;  %6036 = vmatprep.subr.bf16.mxu0 %v6481_v18 }
  0x3c   :  { %6042 = vmatprep.subr.bf16.mxu1 %v6481_v18 }
  0x3d   :  { %5493 = vmatmul.mubr.f32.vlgmr.msra.gmra.mrb[26].mxu0 %v6483_v37 }
  0x3e   :  { %5504 = vmatmul.mubr.f32.vlgmr.msra.gmra.mrb[26].mxu1 %v6483_v37  ;;  %6038 = vmatpush3.bf16.msra.mxu0 %v6825_v50 }
  0x3f   :  { %5514 = vmatprep.mubr.msk.f32.mxu0 %vm6482_vm5, %v6483_v37  ;;  %6039 = vmatprep.subr.bf16.mxu0 %v6481_v18 }
  0x40   :  { %6044 = vmatpush3.bf16.msra.mxu1 %v6835_v53  ;;  %5525 = vmatprep.mubr.msk.f32.mxu1 %vm6482_vm5, %v6483_v37 }
  0x41   :  { %6045 = vmatprep.subr.bf16.mxu1 %v6481_v18 }
  0x42   :  { %6041 = vmatpush3.bf16.msra.mxu0 %v6846_v56 }
  0x43   :  { %6048 = vmatprep.subr.bf16.mxu0 %v6481_v18 }
  0x44   :  { %6047 = vmatpush3.bf16.msra.mxu1 %v6852_v57 }
  0x45   :  { %6054 = vmatprep.subr.bf16.mxu1 %v6481_v18  ;;  %5515 = vmatmul.mubr.f32.vlgmr.msra.gmra.mrb[28].mxu0 %v6483_v37 }
  0x46   :  { %6050 = vmatpush3.bf16.msra.mxu0 %v6709_v25  ;;  %5536 = vmatprep.mubr.msk.f32.mxu0 %vm6482_vm5, %v6483_v37 }
  0x47   :  { %5526 = vmatmul.mubr.f32.vlgmr.msra.gmra.mrb[28].mxu1 %v6483_v37  ;;  %6051 = vmatprep.subr.bf16.mxu0 %v6481_v18 }
  0x48   :  { %6056 = vmatpush3.bf16.msra.mxu1 %v6711_v26  ;;  %5547 = vmatprep.mubr.msk.f32.mxu1 %vm6482_vm5, %v6483_v37 }
  0x49   :  { %6057 = vmatprep.subr.bf16.mxu1 %v6481_v18 }
  0x4a   :  { %6053 = vmatpush3.bf16.msra.mxu0 %v6735_v31 }
  0x4b   :  { %6060 = vmatprep.subr.bf16.mxu0 %v6481_v18 }
  0x4c   :  { %6059 = vmatpush3.bf16.msra.mxu1 %v6737_v32 }
  0x4d   :  { %6066 = vmatprep.subr.bf16.mxu1 %v6481_v18 }
  0xd8   :  { %v5382_v0 = vpop.f32.mrb[0].mxu0 }
  0xd9   :  { %v5396_v1 = vpop.f32.mrb[0].mxu1  ;;  %v157_v2 = vadd.f32 %v5382_v0, %v4917_v62  ;;  %v151_v4 = vpop.f32.mrb[1].mxu0 }
  0xda   :  { %v279_v3 = vadd.f32 %v5396_v1, %v4926_v63  ;;  %v273_v5 = vpop.f32.mrb[1].mxu1  ;;  %v152_v6 = vadd.f32 %v4917_v62, %v151_v4 }
  0xdb   :  { %v274_v7 = vadd.f32 %v4926_v63, %v273_v5  ;;  %192 = vst.msk [vmem:[#allocation2 + $0x8] sm:$0xff] %vm190_vm10, %v157_v2 }
  0xdc   :  { %313 = vst.msk [vmem:[#allocation5 + $0x8] sm:$0xff] %vm190_vm10, %v279_v3  ;;  %191 = vst.msk [vmem:[#allocation2] sm:$0xff] %vm190_vm10, %v152_v6  ;;  %v5385_v8 = vpop.f32.mrb[2].mxu0 }
  0xdd   :  { %312 = vst.msk [vmem:[#allocation5] sm:$0xff] %vm190_vm10, %v274_v7  ;;  %v5399_v9 = vpop.f32.mrb[2].mxu1  ;;  %v167_v10 = vadd.f32 %v5385_v8, %v4917_v62  ;;  %v161_v12 = vpop.f32.mrb[3].mxu0 }
  0xde   :  { %v289_v11 = vadd.f32 %v5399_v9, %v4926_v63  ;;  %v283_v13 = vpop.f32.mrb[3].mxu1  ;;  %v162_v14 = vadd.f32 %v4917_v62, %v161_v12 }
  0xdf   :  { %v284_v15 = vadd.f32 %v4926_v63, %v283_v13  ;;  %194 = vst.msk [vmem:[#allocation2 + $0x18] sm:$0xff] %vm190_vm10, %v167_v10 }
  0xe0   :  { %315 = vst.msk [vmem:[#allocation5 + $0x18] sm:$0xff] %vm190_vm10, %v289_v11  ;;  %193 = vst.msk [vmem:[#allocation2 + $0x10] sm:$0xff] %vm190_vm10, %v162_v14  ;;  %v5388_v16 = vpop.f32.mrb[4].mxu0 }
  0xe1   :  { %314 = vst.msk [vmem:[#allocation5 + $0x10] sm:$0xff] %vm190_vm10, %v284_v15  ;;  %v5402_v17 = vpop.f32.mrb[4].mxu1  ;;  %v177_v19 = vadd.f32 %v5388_v16, %v4917_v62  ;;  %v171_v21 = vpop.f32.mrb[5].mxu0  ;;  %v4959_v16 = vld [vmem:[%s7465_s4 + $0x2] ss:$0 sm:$0xff] }
  0xe2   :  { %v299_v20 = vadd.f32 %v5402_v17, %v4926_v63  ;;  %v293_v22 = vpop.f32.mrb[5].mxu1  ;;  %v172_v23 = vadd.f32 %v4917_v62, %v171_v21  ;;  %v4970_v17 = vld [vmem:[%s7466_s8 + $0x2] ss:$0 sm:$0xff] }
  0xe3   :  { %v294_v24 = vadd.f32 %v4926_v63, %v293_v22  ;;  %196 = vst.msk [vmem:[#allocation2 + $0x28] sm:$0xff] %vm190_vm10, %v177_v19 }
  0xe4   :  { %317 = vst.msk [vmem:[#allocation5 + $0x28] sm:$0xff] %vm190_vm10, %v299_v20  ;;  %195 = vst.msk [vmem:[#allocation2 + $0x20] sm:$0xff] %vm190_vm10, %v172_v23  ;;  %v5391_v27 = vpop.f32.mrb[6].mxu0 }
  0xe5   :  { %316 = vst.msk [vmem:[#allocation5 + $0x20] sm:$0xff] %vm190_vm10, %v294_v24  ;;  %v5405_v28 = vpop.f32.mrb[6].mxu1  ;;  %v187_v29 = vadd.f32 %v5391_v27, %v4917_v62  ;;  %v181_v33 = vpop.f32.mrb[7].mxu0 }
  0xe6   :  { %v309_v30 = vadd.f32 %v5405_v28, %v4926_v63  ;;  %v303_v34 = vpop.f32.mrb[7].mxu1  ;;  %v182_v35 = vadd.f32 %v4917_v62, %v181_v33 }
  0xe7   :  { %v304_v36 = vadd.f32 %v4926_v63, %v303_v34  ;;  %198 = vst.msk [vmem:[#allocation2 + $0x38] sm:$0xff] %vm190_vm10, %v187_v29 }
  0xe8   :  { %319 = vst.msk [vmem:[#allocation5 + $0x38] sm:$0xff] %vm190_vm10, %v309_v30  ;;  %197 = vst.msk [vmem:[#allocation2 + $0x30] sm:$0xff] %vm190_vm10, %v182_v35  ;;  %v5410_v42 = vpop.f32.mrb[8].mxu0 }
  0xe9   :  { %318 = vst.msk [vmem:[#allocation5 + $0x30] sm:$0xff] %vm190_vm10, %v304_v36  ;;  %v5424_v43 = vpop.f32.mrb[8].mxu1  ;;  %v402_v46 = vadd.f32 %v5410_v42, %v4937_v40  ;;  %v396_v48 = vpop.f32.mrb[9].mxu0 }
  0xea   :  { %v525_v47 = vadd.f32 %v5424_v43, %v4948_v41  ;;  %v519_v49 = vpop.f32.mrb[9].mxu1  ;;  %v397_v51 = vadd.f32 %v4937_v40, %v396_v48 }
  0xeb   :  { %v520_v52 = vadd.f32 %v4948_v41, %v519_v49  ;;  %436 = vst.msk [vmem:[#allocation3 + $0x8] sm:$0xff] %vm190_vm10, %v402_v46 }
  0xec   :  { %559 = vst.msk [vmem:[#allocation6 + $0x8] sm:$0xff] %vm190_vm10, %v525_v47  ;;  %435 = vst.msk [vmem:[#allocation3] sm:$0xff] %vm190_vm10, %v397_v51  ;;  %v5413_v54 = vpop.f32.mrb[10].mxu0 }
  0xed   :  { %558 = vst.msk [vmem:[#allocation6] sm:$0xff] %vm190_vm10, %v520_v52  ;;  %v5427_v55 = vpop.f32.mrb[10].mxu1  ;;  %v412_v58 = vadd.f32 %v5413_v54, %v4937_v40  ;;  %v406_v60 = vpop.f32.mrb[11].mxu0 }
  0xee   :  { %v535_v59 = vadd.f32 %v5427_v55, %v4948_v41  ;;  %v529_v61 = vpop.f32.mrb[11].mxu1  ;;  %v407_v62 = vadd.f32 %v4937_v40, %v406_v60 }
  0xef   :  { %v530_v63 = vadd.f32 %v4948_v41, %v529_v61  ;;  %438 = vst.msk [vmem:[#allocation3 + $0x18] sm:$0xff] %vm190_vm10, %v412_v58 }
  0xf0   :  { %561 = vst.msk [vmem:[#allocation6 + $0x18] sm:$0xff] %vm190_vm10, %v535_v59  ;;  %437 = vst.msk [vmem:[#allocation3 + $0x10] sm:$0xff] %vm190_vm10, %v407_v62  ;;  %v5416_v0 = vpop.f32.mrb[12].mxu0 }
  0xf1   :  { %560 = vst.msk [vmem:[#allocation6 + $0x10] sm:$0xff] %vm190_vm10, %v530_v63  ;;  %v5430_v1 = vpop.f32.mrb[12].mxu1  ;;  %v422_v2 = vadd.f32 %v5416_v0, %v4937_v40  ;;  %v416_v4 = vpop.f32.mrb[13].mxu0 }
  0xf2   :  { %v545_v3 = vadd.f32 %v5430_v1, %v4948_v41  ;;  %v539_v5 = vpop.f32.mrb[13].mxu1  ;;  %v417_v6 = vadd.f32 %v4937_v40, %v416_v4  ;;  %v1047_v1 = vld [vmem:[#allocation2] sm:$0xff] }
  0xf3   :  { %v540_v7 = vadd.f32 %v4948_v41, %v539_v5  ;;  %440 = vst.msk [vmem:[#allocation3 + $0x28] sm:$0xff] %vm190_vm10, %v422_v2 }
  0xf4   :  { %563 = vst.msk [vmem:[#allocation6 + $0x28] sm:$0xff] %vm190_vm10, %v545_v3  ;;  %439 = vst.msk [vmem:[#allocation3 + $0x20] sm:$0xff] %vm190_vm10, %v417_v6  ;;  %v5419_v8 = vpop.f32.mrb[14].mxu0 }
  0xf5   :  { %562 = vst.msk [vmem:[#allocation6 + $0x20] sm:$0xff] %vm190_vm10, %v540_v7  ;;  %v5433_v9 = vpop.f32.mrb[14].mxu1  ;;  %v432_v10 = vadd.f32 %v5419_v8, %v4937_v40  ;;  %v426_v12 = vpop.f32.mrb[15].mxu0  ;;  %v1055_v7 = vld [vmem:[#allocation3] sm:$0xff] }
  0xf6   :  { %v555_v11 = vadd.f32 %v5433_v9, %v4948_v41  ;;  %v549_v13 = vpop.f32.mrb[15].mxu1  ;;  %v427_v14 = vadd.f32 %v4937_v40, %v426_v12 }
  0xf7   :  { %v550_v15 = vadd.f32 %v4948_v41, %v549_v13  ;;  %442 = vst.msk [vmem:[#allocation3 + $0x38] sm:$0xff] %vm190_vm10, %v432_v10 }
  0xf8   :  { %565 = vst.msk [vmem:[#allocation6 + $0x38] sm:$0xff] %vm190_vm10, %v555_v11  ;;  %441 = vst.msk [vmem:[#allocation3 + $0x30] sm:$0xff] %vm190_vm10, %v427_v14  ;;  %v5438_v19 = vpop.f32.mrb[16].mxu0  ;;  %v1310_v11 = vld [vmem:[#allocation5 + $0x38] sm:$0xff] }
  0xf9   :  { %564 = vst.msk [vmem:[#allocation6 + $0x30] sm:$0xff] %vm190_vm10, %v550_v15  ;;  %v5452_v20 = vpop.f32.mrb[16].mxu1  ;;  %v648_v21 = vadd.f32 %v5438_v19, %v4959_v16  ;;  %v642_v23 = vpop.f32.mrb[17].mxu0 }
  0xfa   :  { %v771_v22 = vadd.f32 %v5452_v20, %v4970_v17  ;;  %v765_v24 = vpop.f32.mrb[17].mxu1  ;;  %v643_v27 = vadd.f32 %v4959_v16, %v642_v23 }
  0xfb   :  { %v766_v28 = vadd.f32 %v4970_v17, %v765_v24  ;;  %682 = vst.msk [vmem:[#allocation4 + $0x8] sm:$0xff] %vm190_vm10, %v648_v21 }
  0xfc   :  { %805 = vst.msk [vmem:[#allocation7 + $0x8] sm:$0xff] %vm190_vm10, %v771_v22  ;;  %681 = vst.msk [vmem:[#allocation4] sm:$0xff] %vm190_vm10, %v643_v27  ;;  %v5441_v29 = vpop.f32.mrb[18].mxu0 }
  0xfd   :  { %804 = vst.msk [vmem:[#allocation7] sm:$0xff] %vm190_vm10, %v766_v28  ;;  %v5455_v30 = vpop.f32.mrb[18].mxu1  ;;  %v658_v33 = vadd.f32 %v5441_v29, %v4959_v16  ;;  %v652_v35 = vpop.f32.mrb[19].mxu0 }
  0xfe   :  { %v781_v34 = vadd.f32 %v5455_v30, %v4970_v17  ;;  %v775_v36 = vpop.f32.mrb[19].mxu1  ;;  %v653_v40 = vadd.f32 %v4959_v16, %v652_v35 }
  0xff   :  { %v776_v41 = vadd.f32 %v4970_v17, %v775_v36  ;;  %684 = vst.msk [vmem:[#allocation4 + $0x18] sm:$0xff] %vm190_vm10, %v658_v33  ;;  %v1319_v21 = vld [vmem:[#allocation6 + $0x38] sm:$0xff] }
 0x100   :  { %807 = vst.msk [vmem:[#allocation7 + $0x18] sm:$0xff] %vm190_vm10, %v781_v34  ;;  %683 = vst.msk [vmem:[#allocation4 + $0x10] sm:$0xff] %vm190_vm10, %v653_v40  ;;  %v5444_v42 = vpop.f32.mrb[20].mxu0  ;;  %v6952_v34 = vld [vmem:[%s7467_s5] ss:$0 sm:$0xff] }
 0x101   :  { %806 = vst.msk [vmem:[#allocation7 + $0x10] sm:$0xff] %vm190_vm10, %v776_v41  ;;  %v5458_v43 = vpop.f32.mrb[20].mxu1  ;;  %v668_v46 = vadd.f32 %v5444_v42, %v4959_v16  ;;  %v662_v48 = vpop.f32.mrb[21].mxu0 }
 0x102   :  { %v791_v47 = vadd.f32 %v5458_v43, %v4970_v17  ;;  %v785_v49 = vpop.f32.mrb[21].mxu1  ;;  %v663_v51 = vadd.f32 %v4959_v16, %v662_v48  ;;  %v6958_v43 = vld [vmem:[%s7468_s9] ss:$0 sm:$0xff] }
 0x103   :  { %v786_v52 = vadd.f32 %v4970_v17, %v785_v49  ;;  %686 = vst.msk [vmem:[#allocation4 + $0x28] sm:$0xff] %vm190_vm10, %v668_v46  ;;  %v1063_v42 = vld [vmem:[#allocation4] sm:$0xff] }
 0x104   :  { %809 = vst.msk [vmem:[#allocation7 + $0x28] sm:$0xff] %vm190_vm10, %v791_v47  ;;  %685 = vst.msk [vmem:[#allocation4 + $0x20] sm:$0xff] %vm190_vm10, %v663_v51  ;;  %v5447_v54 = vpop.f32.mrb[22].mxu0 }
 0x105   :  { %808 = vst.msk [vmem:[#allocation7 + $0x20] sm:$0xff] %vm190_vm10, %v786_v52  ;;  %v5461_v55 = vpop.f32.mrb[22].mxu1  ;;  %v678_v58 = vadd.f32 %v5447_v54, %v4959_v16  ;;  %v672_v60 = vpop.f32.mrb[23].mxu0 }
 0x106   :  { %v801_v59 = vadd.f32 %v5461_v55, %v4970_v17  ;;  %v795_v61 = vpop.f32.mrb[23].mxu1  ;;  %v673_v62 = vadd.f32 %v4959_v16, %v672_v60 }
 0x107   :  { %v796_v63 = vadd.f32 %v4970_v17, %v795_v61  ;;  %688 = vst.msk [vmem:[#allocation4 + $0x38] sm:$0xff] %vm190_vm10, %v678_v58  ;;  %v6961_v61 = vpop.permute.xlu0 %1074 }
 0x108   :  { %811 = vst.msk [vmem:[#allocation7 + $0x38] sm:$0xff] %vm190_vm10, %v801_v59  ;;  %687 = vst.msk [vmem:[#allocation4 + $0x30] sm:$0xff] %vm190_vm10, %v673_v62  ;;  %v886_v0 = vpop.f32.mrb[24].mxu0  ;;  %vm1076_vm11 = vcmp.eq.s32.totalorder %v6961_v61, 1 }
 0x109   :  { %810 = vst.msk [vmem:[#allocation7 + $0x30] sm:$0xff] %vm190_vm10, %v796_v63  ;;  %v961_v2 = vpop.f32.mrb[24].mxu1  ;;  %v1048_v3 = vadd.f32 %v1047_v1, %v886_v0  ;;  %v5472_v4 = vpop.f32.mrb[25].mxu0 }
 0x10a   :  { %v5483_v5 = vpop.f32.mrb[25].mxu1  ;;  %v1056_v8 = vadd.f32 %v1055_v7, %v961_v2 }
 0x10b   :  { %v4988_v6 = vmul.f32 -1.442695, %v1048_v3  ;;  %v6980_v7 = vpop.permute.xlu0 %1339 }
 0x10c   :  { %v4989_v9 = vmul.f32 -1.442695, %v1056_v8  ;;  %vm1341_vm12 = vcmp.eq.s32.totalorder %v6980_v7, 1  ;;  %v5073_v7 = vld [vmem:[%s7471_s12] ss:$0 sm:$0xff] }
 0x10d   :  { %6318 = vpow2.f32 %v4988_v6 }
 0x10e   :  { %6320 = vpow2.f32 %v4989_v9 }
 0x10f   :  { %v1328_v54 = vld [vmem:[#allocation7 + $0x38] sm:$0xff] }
 0x110   :  { %v1043_v12 = vpop.f32.mrb[26].mxu0 }
 0x111   :  { %v1148_v10 = vpop.f32.mrb[26].mxu1  ;;  %v5494_v15 = vpop.f32.mrb[27].mxu0  ;;  %v1044_v36 = vadd.f32 %v6952_v34, %v1043_v12 }
 0x112   :  { %v1311_v13 = vadd.f32 %v1310_v11, %v1148_v10  ;;  %v5505_v14 = vpop.f32.mrb[27].mxu1  ;;  %v1557_v11 = vld [vmem:[#allocation2 + $0x8] sm:$0xff] }
 0x114   :  { %v4999_v16 = vmul.f32 -1.442695, %v1311_v13 }
 0x116   :  { %6322 = vpow2.f32 %v4999_v16 }
 0x117   :  { %v6319_v17 = vpop.eup %6318 }
 0x118   :  { %v1052_v19 = vadd.f32 1.0, %v6319_v17  ;;  %v1223_v20 = vpop.f32.mrb[28].mxu0  ;;  %v6321_v29 = vpop.eup %6320  ;;  %v1566_v17 = vld [vmem:[#allocation3 + $0x8] sm:$0xff] }
 0x119   :  { %v1320_v22 = vadd.f32 %v1319_v21, %v1223_v20  ;;  %v5516_v23 = vpop.f32.mrb[29].mxu0  ;;  %v1060_v35 = vadd.f32 1.0, %v6321_v29 }
 0x11a   :  { %v1305_v24 = vpop.f32.mrb[28].mxu1  ;;  %6324 = vrcp.f32 %v1052_v19  ;;  %v1804_v23 = vld [vmem:[#allocation5 + $0x30] sm:$0xff] }
 0x11b   :  { %v5527_v27 = vpop.f32.mrb[29].mxu1  ;;  %v5000_v28 = vmul.f32 -1.442695, %v1320_v22  ;;  %v1306_v49 = vadd.f32 %v6958_v43, %v1305_v24 }
 0x11d   :  { %6326 = vpow2.f32 %v5000_v28 }
 0x120   :  { %v6323_v30 = vpop.eup %6322 }
 0x121   :  { %v1315_v33 = vadd.f32 1.0, %v6323_v30 }
 0x123   :  { %6328 = vrcp.f32 %v1315_v33 }
 0x124   :  { %v6325_v40 = vpop.eup %6324  ;;  %6330 = vrcp.f32 %v1060_v35 }
 0x125   :  { %v1064_v41 = vmul.f32 %v6325_v40, %v1044_v36  ;;  %v1813_v36 = vld [vmem:[#allocation6 + $0x30] sm:$0xff] }
 0x127   :  { %v6327_v46 = vpop.eup %6326  ;;  %v1065_v47 = vadd.f32 %v1064_v41, %v1063_v42 }
 0x128   :  { %v1324_v48 = vadd.f32 1.0, %v6327_v46 }
 0x129   :  { %6332 = vtanh.f32 %v1065_v47 }
 0x12a   :  { %6334 = vrcp.f32 %v1324_v48 }
 0x12d   :  { %v6329_v51 = vpop.eup %6328 }
 0x12e   :  { %v1329_v52 = vmul.f32 %v6329_v51, %v1306_v49  ;;  %v6331_v55 = vpop.eup %6330 }
 0x12f   :  { %v1067_v59 = vsub.f32 1.0, %v6331_v55  ;;  %v1069_v63 = vmul.f32 0.0, %v6331_v55 }
 0x130   :  { %v1330_v58 = vadd.f32 %v1329_v52, %v1328_v54 }
 0x132   :  { %6336 = vtanh.f32 %v1330_v58 }
 0x133   :  { %v6333_v60 = vpop.eup %6332 }
 0x134   :  { %v1068_v62 = vmul.f32 %v6333_v60, %v1067_v59  ;;  %v6335_v1 = vpop.eup %6334  ;;  %v1575_v59 = vld [vmem:[#allocation4 + $0x8] sm:$0xff] }
 0x135   :  { %v1332_v3 = vsub.f32 1.0, %v6335_v1  ;;  %v1334_v6 = vmul.f32 0.0, %v6335_v1 }
 0x136   :  { %v1070_v0 = vadd.f32 %v1069_v63, %v1068_v62 }
 0x138   :  { %v6966_v2 = vsel %vm1076_vm11, %v1070_v0, 0.0 }
 0x139   :  { %5537 = vmatmul.mubr.msk.f32.vlgmr.msra.gmra.mrb[30].mxu0 %vm190_vm10, %v6966_v2  ;;  %5548 = vmatmul.mubr.msk.f32.vlgmr.msra.gmra.mrb[30].mxu1 %vm190_vm10, %v6966_v2 }
 0x13a   :  { %6062 = vmatpush3.bf16.msra.mxu0 %v6781_v38  ;;  %6068 = vmatpush3.bf16.msra.mxu1 %v6783_v39 }
 0x13b   :  { %6063 = vmatprep.subr.bf16.mxu0 %v6481_v18  ;;  %6069 = vmatprep.subr.bf16.mxu1 %v6481_v18 }
 0x13c   :  { %v6337_v4 = vpop.eup %6336  ;;  %5558 = vmatprep.mubr.msk.f32.mxu0 %vm6482_vm5, %v6483_v37  ;;  %5569 = vmatprep.mubr.msk.f32.mxu1 %vm6482_vm5, %v6483_v37 }
 0x13d   :  { %v1333_v5 = vmul.f32 %v6337_v4, %v1332_v3  ;;  %v1822_v4 = vld [vmem:[#allocation7 + $0x30] sm:$0xff] }
 0x13e   :  { %6065 = vmatpush3.bf16.msra.mxu0 %v6801_v44  ;;  %6071 = vmatpush3.bf16.msra.mxu1 %v6803_v45 }
 0x13f   :  { %v1335_v8 = vadd.f32 %v1334_v6, %v1333_v5  ;;  %6072 = vmatprep.subr.bf16.mxu0 %v6481_v18  ;;  %6078 = vmatprep.subr.bf16.mxu1 %v6481_v18 }
 0x141   :  { %v6989_v9 = vsel %vm1341_vm12, %v1335_v8, 0.0  ;;  %5559 = vmatmul.mubr.msk.f32.vlgmr.msra.gmra.mrb[32].mxu0 %vm190_vm10, %v6966_v2 }
 0x142   :  { %5570 = vmatmul.mubr.msk.f32.vlgmr.msra.gmra.mrb[32].mxu1 %vm190_vm10, %v6989_v9  ;;  %6074 = vmatpush3.bf16.msra.mxu0 %v6825_v50 }
 0x143   :  { %6080 = vmatpush3.bf16.msra.mxu1 %v6835_v53  ;;  %6075 = vmatprep.subr.bf16.mxu0 %v6481_v18 }
 0x144   :  { %6081 = vmatprep.subr.bf16.mxu1 %v6481_v18  ;;  %5580 = vmatprep.mubr.msk.f32.mxu0 %vm6482_vm5, %v6483_v37 }
 0x145   :  { %5591 = vmatprep.mubr.msk.f32.mxu1 %vm6482_vm5, %v6483_v37 }
 0x146   :  { %6077 = vmatpush3.bf16.msra.mxu0 %v6846_v56 }
 0x147   :  { %6083 = vmatpush3.bf16.msra.mxu1 %v6852_v57  ;;  %6084 = vmatprep.subr.bf16.mxu0 %v6481_v18 }
 0x148   :  { %6090 = vmatprep.subr.bf16.mxu1 %v6481_v18 }
 0x149   :  { %5581 = vmatmul.mubr.msk.f32.vlgmr.msra.gmra.mrb[34].mxu0 %vm190_vm10, %v6989_v9 }
 0x14a   :  { %5592 = vmatmul.mubr.msk.f32.vlgmr.msra.gmra.mrb[34].mxu1 %vm190_vm10, %v6989_v9  ;;  %6086 = vmatpush3.bf16.msra.mxu0 %v6709_v25 }
 0x14b   :  { %6092 = vmatpush3.bf16.msra.mxu1 %v6711_v26  ;;  %6087 = vmatprep.subr.bf16.mxu0 %v6481_v18 }
 0x14c   :  { %6093 = vmatprep.subr.bf16.mxu1 %v6481_v18  ;;  %5602 = vmatprep.mubr.msk.f32.mxu0 %vm6482_vm5, %v6483_v37 }
 0x14d   :  { %5613 = vmatprep.mubr.msk.f32.mxu1 %vm6482_vm5, %v6483_v37 }
 0x14e   :  { %6089 = vmatpush3.bf16.msra.mxu0 %v6735_v31 }
 0x14f   :  { %6095 = vmatpush3.bf16.msra.mxu1 %v6737_v32  ;;  %6096 = vmatprep.subr.bf16.mxu0 %v6481_v18 }
 0x150   :  { %6102 = vmatprep.subr.bf16.mxu1 %v6481_v18 }
 0x20c   :  { %v1412_v10 = vpop.f32.mrb[30].mxu0  ;;  %v1482_v12 = vpop.f32.mrb[30].mxu1 }
 0x20d   :  { %v1558_v13 = vadd.f32 %v1557_v11, %v1412_v10  ;;  %v5538_v14 = vpop.f32.mrb[31].mxu0  ;;  %v5549_v15 = vpop.f32.mrb[31].mxu1  ;;  %v1567_v19 = vadd.f32 %v1566_v17, %v1482_v12 }
 0x20e   :  { %v7025_v11 = vpop.permute.xlu1 %1586 }
 0x20f   :  { %v5004_v16 = vmul.f32 -1.442695, %v1558_v13  ;;  %v5005_v20 = vmul.f32 -1.442695, %v1567_v19  ;;  %vm1588_vm13 = vcmp.eq.s32.totalorder %v7025_v11, 1 }
 0x211   :  { %6338 = vpow2.f32 %v5004_v16 }
 0x212   :  { %6340 = vpow2.f32 %v5005_v20 }
 0x214   :  { %v1552_v21 = vpop.f32.mrb[32].mxu0 }
 0x215   :  { %v1659_v22 = vpop.f32.mrb[32].mxu1  ;;  %v5560_v27 = vpop.f32.mrb[33].mxu0  ;;  %v1553_v54 = vadd.f32 %v6952_v34, %v1552_v21 }
 0x216   :  { %v1805_v24 = vadd.f32 %v1804_v23, %v1659_v22  ;;  %v5571_v28 = vpop.f32.mrb[33].mxu1  ;;  %v7047_v21 = vpop.permute.xlu1 %1833 }
 0x217   :  { %vm1835_vm14 = vcmp.eq.s32.totalorder %v7047_v21, 1 }
 0x218   :  { %v5009_v29 = vmul.f32 -1.442695, %v1805_v24  ;;  %v2051_v24 = vld [vmem:[#allocation2 + $0x10] sm:$0xff] }
 0x21a   :  { %6342 = vpow2.f32 %v5009_v29 }
 0x21b   :  { %v6339_v30 = vpop.eup %6338 }
 0x21c   :  { %v1562_v33 = vadd.f32 1.0, %v6339_v30  ;;  %v1729_v35 = vpop.f32.mrb[34].mxu0  ;;  %v6341_v48 = vpop.eup %6340 }
 0x21d   :  { %v1799_v40 = vpop.f32.mrb[34].mxu1  ;;  %v1814_v41 = vadd.f32 %v1813_v36, %v1729_v35  ;;  %v5582_v42 = vpop.f32.mrb[35].mxu0  ;;  %v1571_v52 = vadd.f32 1.0, %v6341_v48  ;;  %v2060_v35 = vld [vmem:[#allocation3 + $0x10] sm:$0xff] }
 0x21e   :  { %v5593_v46 = vpop.f32.mrb[35].mxu1  ;;  %6344 = vrcp.f32 %v1562_v33  ;;  %v1800_v0 = vadd.f32 %v6958_v43, %v1799_v40 }
 0x21f   :  { %v5010_v47 = vmul.f32 -1.442695, %v1814_v41  ;;  %v2298_v46 = vld [vmem:[#allocation5 + $0x28] sm:$0xff] }
 0x221   :  { %6346 = vpow2.f32 %v5010_v47 }
 0x224   :  { %v6343_v49 = vpop.eup %6342 }
 0x225   :  { %v1809_v51 = vadd.f32 1.0, %v6343_v49 }
 0x227   :  { %6348 = vrcp.f32 %v1809_v51 }
 0x228   :  { %v6345_v55 = vpop.eup %6344  ;;  %6350 = vrcp.f32 %v1571_v52 }
 0x229   :  { %v1576_v58 = vmul.f32 %v6345_v55, %v1553_v54 }
 0x22b   :  { %v6347_v60 = vpop.eup %6346  ;;  %v1577_v62 = vadd.f32 %v1576_v58, %v1575_v59  ;;  %v2307_v58 = vld [vmem:[#allocation6 + $0x28] sm:$0xff] }
 0x22c   :  { %v1818_v63 = vadd.f32 1.0, %v6347_v60 }
 0x22d   :  { %6352 = vtanh.f32 %v1577_v62 }
 0x22e   :  { %6354 = vrcp.f32 %v1818_v63 }
 0x231   :  { %v6349_v1 = vpop.eup %6348 }
 0x232   :  { %v1823_v3 = vmul.f32 %v6349_v1, %v1800_v0  ;;  %v6351_v5 = vpop.eup %6350 }
 0x233   :  { %v1579_v8 = vsub.f32 1.0, %v6351_v5  ;;  %v1581_v13 = vmul.f32 %v6351_v5, %v6966_v2 }
 0x234   :  { %v1824_v6 = vadd.f32 %v1823_v3, %v1822_v4 }
 0x236   :  { %6356 = vtanh.f32 %v1824_v6 }
 0x237   :  { %v6353_v10 = vpop.eup %6352 }
 0x238   :  { %v1580_v12 = vmul.f32 %v6353_v10, %v1579_v8  ;;  %v6355_v15 = vpop.eup %6354 }
 0x239   :  { %v1826_v17 = vsub.f32 1.0, %v6355_v15 }
 0x23a   :  { %v1582_v14 = vadd.f32 %v1581_v13, %v1580_v12  ;;  %v2069_v12 = vld [vmem:[#allocation4 + $0x10] sm:$0xff] }
 0x23c   :  { %v7032_v16 = vsel %vm1588_vm13, %v1582_v14, %v6966_v2  ;;  %v1828_v2 = vmul.f32 %v6355_v15, %v6989_v9 }
 0x23d   :  { %5603 = vmatmul.mubr.msk.f32.vlgmr.msra.gmra.mrb[36].mxu0 %vm190_vm10, %v7032_v16  ;;  %5614 = vmatmul.mubr.msk.f32.vlgmr.msra.gmra.mrb[36].mxu1 %vm190_vm10, %v7032_v16 }
 0x23e   :  { %6098 = vmatpush3.bf16.msra.mxu0 %v6781_v38  ;;  %6104 = vmatpush3.bf16.msra.mxu1 %v6783_v39 }
 0x23f   :  { %6099 = vmatprep.subr.bf16.mxu0 %v6481_v18  ;;  %6105 = vmatprep.subr.bf16.mxu1 %v6481_v18 }
 0x240   :  { %v6357_v19 = vpop.eup %6356  ;;  %5624 = vmatprep.mubr.msk.f32.mxu0 %vm6482_vm5, %v6483_v37  ;;  %5635 = vmatprep.mubr.msk.f32.mxu1 %vm6482_vm5, %v6483_v37 }
 0x241   :  { %v1827_v20 = vmul.f32 %v6357_v19, %v1826_v17 }
 0x242   :  { %6101 = vmatpush3.bf16.msra.mxu0 %v6801_v44  ;;  %6107 = vmatpush3.bf16.msra.mxu1 %v6803_v45 }
 0x243   :  { %v1829_v22 = vadd.f32 %v1828_v2, %v1827_v20  ;;  %6108 = vmatprep.subr.bf16.mxu0 %v6481_v18  ;;  %6114 = vmatprep.subr.bf16.mxu1 %v6481_v18  ;;  %v2316_v2 = vld [vmem:[#allocation7 + $0x28] sm:$0xff] }
 0x245   :  { %v7057_v23 = vsel %vm1835_vm14, %v1829_v22, %v6989_v9  ;;  %5625 = vmatmul.mubr.msk.f32.vlgmr.msra.gmra.mrb[38].mxu0 %vm190_vm10, %v7032_v16 }
 0x246   :  { %5636 = vmatmul.mubr.msk.f32.vlgmr.msra.gmra.mrb[38].mxu1 %vm190_vm10, %v7057_v23  ;;  %6110 = vmatpush3.bf16.msra.mxu0 %v6825_v50 }
 0x247   :  { %6116 = vmatpush3.bf16.msra.mxu1 %v6835_v53  ;;  %6111 = vmatprep.subr.bf16.mxu0 %v6481_v18 }
 0x248   :  { %6117 = vmatprep.subr.bf16.mxu1 %v6481_v18  ;;  %5646 = vmatprep.mubr.msk.f32.mxu0 %vm6482_vm5, %v6483_v37 }
 0x249   :  { %5657 = vmatprep.mubr.msk.f32.mxu1 %vm6482_vm5, %v6483_v37 }
 0x24a   :  { %6113 = vmatpush3.bf16.msra.mxu0 %v6846_v56 }
 0x24b   :  { %6119 = vmatpush3.bf16.msra.mxu1 %v6852_v57  ;;  %6120 = vmatprep.subr.bf16.mxu0 %v6481_v18 }
 0x24c   :  { %6126 = vmatprep.subr.bf16.mxu1 %v6481_v18 }
 0x24d   :  { %5647 = vmatmul.mubr.msk.f32.vlgmr.msra.gmra.mrb[40].mxu0 %vm190_vm10, %v7057_v23 }
 0x24e   :  { %5658 = vmatmul.mubr.msk.f32.vlgmr.msra.gmra.mrb[40].mxu1 %vm190_vm10, %v7057_v23  ;;  %6122 = vmatpush3.bf16.msra.mxu0 %v6709_v25 }
 0x24f   :  { %6128 = vmatpush3.bf16.msra.mxu1 %v6711_v26  ;;  %6123 = vmatprep.subr.bf16.mxu0 %v6481_v18 }
 0x250   :  { %6129 = vmatprep.subr.bf16.mxu1 %v6481_v18  ;;  %5668 = vmatprep.mubr.msk.f32.mxu0 %vm6482_vm5, %v6483_v37 }
 0x251   :  { %5679 = vmatprep.mubr.msk.f32.mxu1 %vm6482_vm5, %v6483_v37 }
 0x252   :  { %6125 = vmatpush3.bf16.msra.mxu0 %v6735_v31 }
 0x253   :  { %6131 = vmatpush3.bf16.msra.mxu1 %v6737_v32  ;;  %6132 = vmatprep.subr.bf16.mxu0 %v6481_v18 }
 0x254   :  { %6138 = vmatprep.subr.bf16.mxu1 %v6481_v18 }
 0x310   :  { %v1906_v9 = vpop.f32.mrb[36].mxu0  ;;  %v1976_v27 = vpop.f32.mrb[36].mxu1 }
 0x311   :  { %v2052_v28 = vadd.f32 %v2051_v24, %v1906_v9  ;;  %v5604_v29 = vpop.f32.mrb[37].mxu0  ;;  %v5615_v30 = vpop.f32.mrb[37].mxu1  ;;  %v2061_v36 = vadd.f32 %v2060_v35, %v1976_v27 }
 0x312   :  { %v7094_v30 = vpop.permute.xlu0 %2080 }
 0x313   :  { %v5014_v33 = vmul.f32 -1.442695, %v2052_v28  ;;  %v5015_v40 = vmul.f32 -1.442695, %v2061_v36  ;;  %vm2082_vm15 = vcmp.eq.s32.totalorder %v7094_v30, 1 }
 0x315   :  { %6358 = vpow2.f32 %v5014_v33 }
 0x316   :  { %6360 = vpow2.f32 %v5015_v40 }
 0x318   :  { %v2046_v41 = vpop.f32.mrb[38].mxu0 }
 0x319   :  { %v2153_v42 = vpop.f32.mrb[38].mxu1  ;;  %v5626_v48 = vpop.f32.mrb[39].mxu0  ;;  %v2047_v6 = vadd.f32 %v6952_v34, %v2046_v41 }
 0x31a   :  { %v2299_v47 = vadd.f32 %v2298_v46, %v2153_v42  ;;  %v5637_v49 = vpop.f32.mrb[39].mxu1  ;;  %v7115_v46 = vpop.permute.xlu1 %2327 }
 0x31b   :  { %vm2329_vm0 = vcmp.eq.s32.totalorder %v7115_v46, 1  ;;  %v2545_v49 = vld [vmem:[#allocation2 + $0x18] sm:$0xff] }
 0x31c   :  { %v5019_v51 = vmul.f32 -1.442695, %v2299_v47 }
 0x31e   :  { %6362 = vpow2.f32 %v5019_v51 }
 0x31f   :  { %v6359_v52 = vpop.eup %6358 }
 0x320   :  { %v2056_v54 = vadd.f32 1.0, %v6359_v52  ;;  %v2223_v55 = vpop.f32.mrb[40].mxu0  ;;  %v6361_v1 = vpop.eup %6360 }
 0x321   :  { %v2293_v59 = vpop.f32.mrb[40].mxu1  ;;  %v2308_v60 = vadd.f32 %v2307_v58, %v2223_v55  ;;  %v5648_v62 = vpop.f32.mrb[41].mxu0  ;;  %v2065_v5 = vadd.f32 1.0, %v6361_v1  ;;  %v2792_v1 = vld [vmem:[#allocation5 + $0x20] sm:$0xff] }
 0x322   :  { %v5659_v63 = vpop.f32.mrb[41].mxu1  ;;  %6364 = vrcp.f32 %v2056_v54  ;;  %v2294_v17 = vadd.f32 %v6958_v43, %v2293_v59  ;;  %v2554_v59 = vld [vmem:[#allocation3 + $0x18] sm:$0xff] }
 0x323   :  { %v5020_v0 = vmul.f32 -1.442695, %v2308_v60 }
 0x325   :  { %6366 = vpow2.f32 %v5020_v0 }
 0x328   :  { %v6363_v3 = vpop.eup %6362 }
 0x329   :  { %v2303_v4 = vadd.f32 1.0, %v6363_v3 }
 0x32b   :  { %6368 = vrcp.f32 %v2303_v4 }
 0x32c   :  { %v6365_v8 = vpop.eup %6364  ;;  %6370 = vrcp.f32 %v2065_v5 }
 0x32d   :  { %v2070_v10 = vmul.f32 %v6365_v8, %v2047_v6 }
 0x32f   :  { %v6367_v13 = vpop.eup %6366  ;;  %v2071_v14 = vadd.f32 %v2070_v10, %v2069_v12 }
 0x330   :  { %v2312_v15 = vadd.f32 1.0, %v6367_v13  ;;  %v2801_v13 = vld [vmem:[#allocation6 + $0x20] sm:$0xff] }
 0x331   :  { %6372 = vtanh.f32 %v2071_v14 }
 0x332   :  { %6374 = vrcp.f32 %v2312_v15 }
 0x335   :  { %v6369_v19 = vpop.eup %6368 }
 0x336   :  { %v2317_v20 = vmul.f32 %v6369_v19, %v2294_v17  ;;  %v6371_v22 = vpop.eup %6370 }
 0x337   :  { %v2073_v24 = vsub.f32 1.0, %v6371_v22  ;;  %v2075_v29 = vmul.f32 %v6371_v22, %v7032_v16 }
 0x338   :  { %v2318_v9 = vadd.f32 %v2317_v20, %v2316_v2 }
 0x33a   :  { %6376 = vtanh.f32 %v2318_v9 }
 0x33b   :  { %v6373_v27 = vpop.eup %6372 }
 0x33c   :  { %v2074_v28 = vmul.f32 %v6373_v27, %v2073_v24  ;;  %v6375_v35 = vpop.eup %6374 }
 0x33d   :  { %v2320_v40 = vsub.f32 1.0, %v6375_v35  ;;  %v2322_v42 = vmul.f32 %v6375_v35, %v7057_v23 }
 0x33e   :  { %v2076_v33 = vadd.f32 %v2075_v29, %v2074_v28 }
 0x340   :  { %v7100_v36 = vsel %vm2082_vm15, %v2076_v33, %v7032_v16  ;;  %v2563_v33 = vld [vmem:[#allocation4 + $0x18] sm:$0xff] }
 0x341   :  { %5669 = vmatmul.mubr.msk.f32.vlgmr.msra.gmra.mrb[42].mxu0 %vm190_vm10, %v7100_v36  ;;  %5680 = vmatmul.mubr.msk.f32.vlgmr.msra.gmra.mrb[42].mxu1 %vm190_vm10, %v7100_v36 }
 0x342   :  { %6134 = vmatpush3.bf16.msra.mxu0 %v6781_v38  ;;  %6140 = vmatpush3.bf16.msra.mxu1 %v6783_v39 }
 0x343   :  { %6135 = vmatprep.subr.bf16.mxu0 %v6481_v18  ;;  %6141 = vmatprep.subr.bf16.mxu1 %v6481_v18 }
 0x344   :  { %v6377_v41 = vpop.eup %6376  ;;  %5690 = vmatprep.mubr.msk.f32.mxu0 %vm6482_vm5, %v6483_v37  ;;  %5701 = vmatprep.mubr.msk.f32.mxu1 %vm6482_vm5, %v6483_v37 }
 0x345   :  { %v2321_v16 = vmul.f32 %v6377_v41, %v2320_v40 }
 0x346   :  { %6137 = vmatpush3.bf16.msra.mxu0 %v6801_v44  ;;  %6143 = vmatpush3.bf16.msra.mxu1 %v6803_v45 }
 0x347   :  { %v2323_v47 = vadd.f32 %v2322_v42, %v2321_v16  ;;  %6144 = vmatprep.subr.bf16.mxu0 %v6481_v18  ;;  %6150 = vmatprep.subr.bf16.mxu1 %v6481_v18 }
 0x349   :  { %v7125_v48 = vsel %vm2329_vm0, %v2323_v47, %v7057_v23  ;;  %5691 = vmatmul.mubr.msk.f32.vlgmr.msra.gmra.mrb[44].mxu0 %vm190_vm10, %v7100_v36 }
 0x34a   :  { %5702 = vmatmul.mubr.msk.f32.vlgmr.msra.gmra.mrb[44].mxu1 %vm190_vm10, %v7125_v48  ;;  %6146 = vmatpush3.bf16.msra.mxu0 %v6825_v50 }
 0x34b   :  { %6152 = vmatpush3.bf16.msra.mxu1 %v6835_v53  ;;  %6147 = vmatprep.subr.bf16.mxu0 %v6481_v18 }
 0x34c   :  { %6153 = vmatprep.subr.bf16.mxu1 %v6481_v18  ;;  %5712 = vmatprep.mubr.msk.f32.mxu0 %vm6482_vm5, %v6483_v37 }
 0x34d   :  { %5723 = vmatprep.mubr.msk.f32.mxu1 %vm6482_vm5, %v6483_v37 }
 0x34e   :  { %6149 = vmatpush3.bf16.msra.mxu0 %v6846_v56 }
 0x34f   :  { %6155 = vmatpush3.bf16.msra.mxu1 %v6852_v57  ;;  %6156 = vmatprep.subr.bf16.mxu0 %v6481_v18 }
 0x350   :  { %6162 = vmatprep.subr.bf16.mxu1 %v6481_v18 }
 0x351   :  { %5713 = vmatmul.mubr.msk.f32.vlgmr.msra.gmra.mrb[46].mxu0 %vm190_vm10, %v7125_v48 }
 0x352   :  { %5724 = vmatmul.mubr.msk.f32.vlgmr.msra.gmra.mrb[46].mxu1 %vm190_vm10, %v7125_v48  ;;  %6158 = vmatpush3.bf16.msra.mxu0 %v6709_v25 }
 0x353   :  { %6164 = vmatpush3.bf16.msra.mxu1 %v6711_v26  ;;  %6159 = vmatprep.subr.bf16.mxu0 %v6481_v18 }
 0x354   :  { %6165 = vmatprep.subr.bf16.mxu1 %v6481_v18  ;;  %5734 = vmatprep.mubr.msk.f32.mxu0 %vm6482_vm5, %v6483_v37 }
 0x355   :  { %5745 = vmatprep.mubr.msk.f32.mxu1 %vm6482_vm5, %v6483_v37 }
 0x356   :  { %6161 = vmatpush3.bf16.msra.mxu0 %v6735_v31 }
 0x357   :  { %6167 = vmatpush3.bf16.msra.mxu1 %v6737_v32  ;;  %6168 = vmatprep.subr.bf16.mxu0 %v6481_v18 }
 0x358   :  { %6174 = vmatprep.subr.bf16.mxu1 %v6481_v18 }
 0x414   :  { %v2400_v23 = vpop.f32.mrb[42].mxu0  ;;  %v2470_v51 = vpop.f32.mrb[42].mxu1 }
 0x415   :  { %v2546_v52 = vadd.f32 %v2545_v49, %v2400_v23  ;;  %v5670_v54 = vpop.f32.mrb[43].mxu0  ;;  %v5681_v55 = vpop.f32.mrb[43].mxu1  ;;  %v2555_v60 = vadd.f32 %v2554_v59, %v2470_v51  ;;  %v2810_v23 = vld [vmem:[#allocation7 + $0x20] sm:$0xff] }
 0x416   :  { %v7161_v55 = vpop.permute.xlu0 %2574 }
 0x417   :  { %v5024_v58 = vmul.f32 -1.442695, %v2546_v52  ;;  %v5025_v62 = vmul.f32 -1.442695, %v2555_v60  ;;  %vm2576_vm1 = vcmp.eq.s32.totalorder %v7161_v55, 1 }
 0x419   :  { %6378 = vpow2.f32 %v5024_v58 }
 0x41a   :  { %6380 = vpow2.f32 %v5025_v62 }
 0x41c   :  { %v2540_v63 = vpop.f32.mrb[44].mxu0 }
 0x41d   :  { %v2647_v0 = vpop.f32.mrb[44].mxu1  ;;  %v5692_v4 = vpop.f32.mrb[45].mxu0  ;;  %v2541_v27 = vadd.f32 %v6952_v34, %v2540_v63 }
 0x41e   :  { %v2793_v3 = vadd.f32 %v2792_v1, %v2647_v0  ;;  %v5703_v5 = vpop.f32.mrb[45].mxu1 }
 0x420   :  { %v5029_v6 = vmul.f32 -1.442695, %v2793_v3  ;;  %v7178_v3 = vpop.permute.xlu1 %2821 }
 0x421   :  { %vm2823_vm2 = vcmp.eq.s32.totalorder %v7178_v3, 1 }
 0x422   :  { %6382 = vpow2.f32 %v5029_v6 }
 0x423   :  { %v6379_v8 = vpop.eup %6378 }
 0x424   :  { %v2550_v10 = vadd.f32 1.0, %v6379_v8  ;;  %v2717_v12 = vpop.f32.mrb[46].mxu0  ;;  %v6381_v2 = vpop.eup %6380  ;;  %v3039_v8 = vld [vmem:[#allocation2 + $0x20] sm:$0xff] }
 0x425   :  { %v2787_v14 = vpop.f32.mrb[46].mxu1  ;;  %v2802_v15 = vadd.f32 %v2801_v13, %v2717_v12  ;;  %v5714_v17 = vpop.f32.mrb[47].mxu0  ;;  %v2559_v24 = vadd.f32 1.0, %v6381_v2 }
 0x426   :  { %v5725_v19 = vpop.f32.mrb[47].mxu1  ;;  %6384 = vrcp.f32 %v2550_v10  ;;  %v2788_v16 = vadd.f32 %v6958_v43, %v2787_v14  ;;  %v3048_v17 = vld [vmem:[#allocation3 + $0x20] sm:$0xff] }
 0x427   :  { %v5030_v20 = vmul.f32 -1.442695, %v2802_v15 }
 0x429   :  { %6386 = vpow2.f32 %v5030_v20 }
 0x42c   :  { %v6383_v22 = vpop.eup %6382 }
 0x42d   :  { %v2797_v9 = vadd.f32 1.0, %v6383_v22 }
 0x42f   :  { %6388 = vrcp.f32 %v2797_v9  ;;  %v3280_v9 = vld [vmem:[#allocation5 + $0x18] sm:$0xff] }
 0x430   :  { %v6385_v28 = vpop.eup %6384  ;;  %6390 = vrcp.f32 %v2559_v24 }
 0x431   :  { %v2564_v29 = vmul.f32 %v6385_v28, %v2541_v27 }
 0x433   :  { %v6387_v35 = vpop.eup %6386  ;;  %v2565_v40 = vadd.f32 %v2564_v29, %v2563_v33 }
 0x434   :  { %v2806_v41 = vadd.f32 1.0, %v6387_v35 }
 0x435   :  { %6392 = vtanh.f32 %v2565_v40 }
 0x436   :  { %6394 = vrcp.f32 %v2806_v41  ;;  %v3289_v41 = vld [vmem:[#allocation6 + $0x18] sm:$0xff] }
 0x439   :  { %v6389_v42 = vpop.eup %6388 }
 0x43a   :  { %v2811_v47 = vmul.f32 %v6389_v42, %v2788_v16  ;;  %v6391_v49 = vpop.eup %6390 }
 0x43b   :  { %v2567_v52 = vsub.f32 1.0, %v6391_v49  ;;  %v2569_v59 = vmul.f32 %v6391_v49, %v7100_v36 }
 0x43c   :  { %v2812_v51 = vadd.f32 %v2811_v47, %v2810_v23 }
 0x43e   :  { %6396 = vtanh.f32 %v2812_v51 }
 0x43f   :  { %v6393_v54 = vpop.eup %6392 }
 0x440   :  { %v2568_v58 = vmul.f32 %v6393_v54, %v2567_v52  ;;  %v6395_v62 = vpop.eup %6394 }
 0x441   :  { %v2814_v0 = vsub.f32 1.0, %v6395_v62  ;;  %v2816_v4 = vmul.f32 %v6395_v62, %v7125_v48 }
 0x442   :  { %v2570_v60 = vadd.f32 %v2569_v59, %v2568_v58 }
 0x444   :  { %v7168_v63 = vsel %vm2576_vm1, %v2570_v60, %v7100_v36 }
 0x445   :  { %5735 = vmatmul.mubr.msk.f32.vlgmr.msra.gmra.mrb[48].mxu0 %vm190_vm10, %v7168_v63  ;;  %5746 = vmatmul.mubr.msk.f32.vlgmr.msra.gmra.mrb[48].mxu1 %vm190_vm10, %v7168_v63 }
 0x446   :  { %6170 = vmatpush3.bf16.msra.mxu0 %v6781_v38  ;;  %6176 = vmatpush3.bf16.msra.mxu1 %v6783_v39 }
 0x447   :  { %6171 = vmatprep.subr.bf16.mxu0 %v6481_v18  ;;  %6177 = vmatprep.subr.bf16.mxu1 %v6481_v18 }
 0x448   :  { %v6397_v1 = vpop.eup %6396  ;;  %5756 = vmatprep.mubr.msk.f32.mxu0 %vm6482_vm5, %v6483_v37  ;;  %5767 = vmatprep.mubr.msk.f32.mxu1 %vm6482_vm5, %v6483_v37 }
 0x449   :  { %v2815_v36 = vmul.f32 %v6397_v1, %v2814_v0  ;;  %v3057_v0 = vld [vmem:[#allocation4 + $0x20] sm:$0xff] }
 0x44a   :  { %6173 = vmatpush3.bf16.msra.mxu0 %v6801_v44  ;;  %6179 = vmatpush3.bf16.msra.mxu1 %v6803_v45 }
 0x44b   :  { %v2817_v5 = vadd.f32 %v2816_v4, %v2815_v36  ;;  %6180 = vmatprep.subr.bf16.mxu0 %v6481_v18  ;;  %6186 = vmatprep.subr.bf16.mxu1 %v6481_v18 }
 0x44d   :  { %v7193_v6 = vsel %vm2823_vm2, %v2817_v5, %v7125_v48  ;;  %5757 = vmatmul.mubr.msk.f32.vlgmr.msra.gmra.mrb[50].mxu0 %vm190_vm10, %v7168_v63 }
 0x44e   :  { %5768 = vmatmul.mubr.msk.f32.vlgmr.msra.gmra.mrb[50].mxu1 %vm190_vm10, %v7193_v6  ;;  %6182 = vmatpush3.bf16.msra.mxu0 %v6825_v50 }
 0x44f   :  { %6188 = vmatpush3.bf16.msra.mxu1 %v6835_v53  ;;  %6183 = vmatprep.subr.bf16.mxu0 %v6481_v18 }
 0x450   :  { %6189 = vmatprep.subr.bf16.mxu1 %v6481_v18  ;;  %5778 = vmatprep.mubr.msk.f32.mxu0 %vm6482_vm5, %v6483_v37 }
 0x451   :  { %5789 = vmatprep.mubr.msk.f32.mxu1 %vm6482_vm5, %v6483_v37 }
 0x452   :  { %6185 = vmatpush3.bf16.msra.mxu0 %v6846_v56 }
 0x453   :  { %6191 = vmatpush3.bf16.msra.mxu1 %v6852_v57  ;;  %6192 = vmatprep.subr.bf16.mxu0 %v6481_v18 }
 0x454   :  { %6198 = vmatprep.subr.bf16.mxu1 %v6481_v18 }
 0x455   :  { %5779 = vmatmul.mubr.msk.f32.vlgmr.msra.gmra.mrb[52].mxu0 %vm190_vm10, %v7193_v6 }
 0x456   :  { %5790 = vmatmul.mubr.msk.f32.vlgmr.msra.gmra.mrb[52].mxu1 %vm190_vm10, %v7193_v6  ;;  %6194 = vmatpush3.bf16.msra.mxu0 %v6709_v25 }
 0x457   :  { %6200 = vmatpush3.bf16.msra.mxu1 %v6711_v26  ;;  %6195 = vmatprep.subr.bf16.mxu0 %v6481_v18 }
 0x458   :  { %6201 = vmatprep.subr.bf16.mxu1 %v6481_v18  ;;  %5800 = vmatprep.mubr.msk.f32.mxu0 %vm6482_vm5, %v6483_v37 }
 0x459   :  { %5811 = vmatprep.mubr.msk.f32.mxu1 %vm6482_vm5, %v6483_v37 }
 0x45a   :  { %6197 = vmatpush3.bf16.msra.mxu0 %v6735_v31 }
 0x45b   :  { %6203 = vmatpush3.bf16.msra.mxu1 %v6737_v32  ;;  %6204 = vmatprep.subr.bf16.mxu0 %v6481_v18 }
 0x45c   :  { %6210 = vmatprep.subr.bf16.mxu1 %v6481_v18 }
 0x518   :  { %v2894_v48 = vpop.f32.mrb[48].mxu0  ;;  %v2964_v10 = vpop.f32.mrb[48].mxu1 }
 0x519   :  { %v3040_v12 = vadd.f32 %v3039_v8, %v2894_v48  ;;  %v5736_v13 = vpop.f32.mrb[49].mxu0  ;;  %v5747_v14 = vpop.f32.mrb[49].mxu1  ;;  %v3049_v19 = vadd.f32 %v3048_v17, %v2964_v10  ;;  %v3298_v10 = vld [vmem:[#allocation7 + $0x18] sm:$0xff] }
 0x51b   :  { %v5034_v15 = vmul.f32 -1.442695, %v3040_v12  ;;  %v5035_v20 = vmul.f32 -1.442695, %v3049_v19 }
 0x51d   :  { %6398 = vpow2.f32 %v5034_v15 }
 0x51e   :  { %6400 = vpow2.f32 %v5035_v20 }
 0x520   :  { %v3034_v2 = vpop.f32.mrb[50].mxu0 }
 0x521   :  { %v3135_v22 = vpop.f32.mrb[50].mxu1  ;;  %v5758_v27 = vpop.f32.mrb[51].mxu0  ;;  %v3035_v59 = vadd.f32 %v6952_v34, %v3034_v2 }
 0x522   :  { %v3281_v24 = vadd.f32 %v3280_v9, %v3135_v22  ;;  %v5769_v28 = vpop.f32.mrb[51].mxu1 }
 0x524   :  { %v5039_v29 = vmul.f32 -1.442695, %v3281_v24 }
 0x526   :  { %6402 = vpow2.f32 %v5039_v29 }
 0x527   :  { %v6399_v33 = vpop.eup %6398 }
 0x528   :  { %v3044_v35 = vadd.f32 1.0, %v6399_v33  ;;  %v3205_v40 = vpop.f32.mrb[52].mxu0  ;;  %v6401_v51 = vpop.eup %6400 }
 0x529   :  { %v3275_v16 = vpop.f32.mrb[52].mxu1  ;;  %v3290_v42 = vadd.f32 %v3289_v41, %v3205_v40  ;;  %v5780_v47 = vpop.f32.mrb[53].mxu0  ;;  %v3053_v58 = vadd.f32 1.0, %v6401_v51  ;;  %v3530_v40 = vld [vmem:[#allocation3 + $0x28] sm:$0xff] }
 0x52a   :  { %v5791_v23 = vpop.f32.mrb[53].mxu1  ;;  %6404 = vrcp.f32 %v3044_v35  ;;  %v3276_v5 = vadd.f32 %v6958_v43, %v3275_v16 }
 0x52b   :  { %v5040_v49 = vmul.f32 -1.442695, %v3290_v42  ;;  %v3762_v23 = vld [vmem:[#allocation5 + $0x10] sm:$0xff] }
 0x52d   :  { %6406 = vpow2.f32 %v5040_v49 }
 0x530   :  { %v6403_v52 = vpop.eup %6402 }
 0x531   :  { %v3285_v54 = vadd.f32 1.0, %v6403_v52 }
 0x533   :  { %6408 = vrcp.f32 %v3285_v54 }
 0x534   :  { %v6405_v60 = vpop.eup %6404  ;;  %6410 = vrcp.f32 %v3053_v58 }
 0x535   :  { %v3058_v62 = vmul.f32 %v6405_v60, %v3035_v59 }
 0x537   :  { %v6407_v1 = vpop.eup %6406  ;;  %v3059_v36 = vadd.f32 %v3058_v62, %v3057_v0  ;;  %v3771_v62 = vld [vmem:[#allocation6 + $0x10] sm:$0xff] }
 0x538   :  { %v3294_v4 = vadd.f32 1.0, %v6407_v1 }
 0x539   :  { %6412 = vtanh.f32 %v3059_v36 }
 0x53a   :  { %6414 = vrcp.f32 %v3294_v4 }
 0x53d   :  { %v6409_v48 = vpop.eup %6408 }
 0x53e   :  { %v3299_v8 = vmul.f32 %v6409_v48, %v3276_v5  ;;  %v6411_v12 = vpop.eup %6410 }
 0x53f   :  { %v3061_v14 = vsub.f32 1.0, %v6411_v12  ;;  %v3063_v17 = vmul.f32 %v6411_v12, %v7168_v63 }
 0x540   :  { %v3300_v13 = vadd.f32 %v3299_v8, %v3298_v10 }
 0x542   :  { %6416 = vtanh.f32 %v3300_v13  ;;  %v7292_v13 = vld [vmem:[%s7467_s5] ss:$0 sm:$0xff] }
 0x543   :  { %v6413_v15 = vpop.eup %6412 }
 0x544   :  { %v3062_v34 = vmul.f32 %v6413_v15, %v3061_v14  ;;  %v6415_v20 = vpop.eup %6414 }
 0x545   :  { %v3302_v43 = vsub.f32 1.0, %v6415_v20  ;;  %v3304_v3 = vmul.f32 %v6415_v20, %v7193_v6 }
 0x546   :  { %v3064_v19 = vadd.f32 %v3063_v17, %v3062_v34  ;;  %v3539_v17 = vld [vmem:[#allocation4 + $0x28] sm:$0xff] }
 0x548   :  { %v7233_v2 = vsel %vm2823_vm2, %v3064_v19, %v7168_v63 }
 0x549   :  { %5801 = vmatmul.mubr.msk.f32.vlgmr.msra.gmra.mrb[54].mxu0 %vm190_vm10, %v7233_v2  ;;  %5812 = vmatmul.mubr.msk.f32.vlgmr.msra.gmra.mrb[54].mxu1 %vm190_vm10, %v7233_v2 }
 0x54a   :  { %6206 = vmatpush3.bf16.msra.mxu0 %v6781_v38  ;;  %6212 = vmatpush3.bf16.msra.mxu1 %v6783_v39 }
 0x54b   :  { %6207 = vmatprep.subr.bf16.mxu0 %v6481_v18  ;;  %6213 = vmatprep.subr.bf16.mxu1 %v6481_v18 }
 0x54c   :  { %v6417_v22 = vpop.eup %6416  ;;  %5822 = vmatprep.mubr.msk.f32.mxu0 %vm6482_vm5, %v6483_v37  ;;  %5833 = vmatprep.mubr.msk.f32.mxu1 %vm6482_vm5, %v6483_v37 }
 0x54d   :  { %v3303_v63 = vmul.f32 %v6417_v22, %v3302_v43  ;;  %v7298_v22 = vld [vmem:[%s7468_s9] ss:$0 sm:$0xff] }
 0x54e   :  { %6209 = vmatpush3.bf16.msra.mxu0 %v6801_v44  ;;  %6215 = vmatpush3.bf16.msra.mxu1 %v6803_v45 }
 0x54f   :  { %v3305_v9 = vadd.f32 %v3304_v3, %v3303_v63  ;;  %6216 = vmatprep.subr.bf16.mxu0 %v6481_v18  ;;  %6222 = vmatprep.subr.bf16.mxu1 %v6481_v18 }
 0x551   :  { %v7255_v24 = vsel %vm2576_vm1, %v3305_v9, %v7193_v6  ;;  %5823 = vmatmul.mubr.msk.f32.vlgmr.msra.gmra.mrb[56].mxu0 %vm190_vm10, %v7233_v2  ;;  %v3521_v6 = vld [vmem:[#allocation2 + $0x28] sm:$0xff] }
 0x552   :  { %5834 = vmatmul.mubr.msk.f32.vlgmr.msra.gmra.mrb[56].mxu1 %vm190_vm10, %v7255_v24  ;;  %6218 = vmatpush3.bf16.msra.mxu0 %v6825_v50 }
 0x553   :  { %6224 = vmatpush3.bf16.msra.mxu1 %v6835_v53  ;;  %6219 = vmatprep.subr.bf16.mxu0 %v6481_v18 }
 0x554   :  { %6225 = vmatprep.subr.bf16.mxu1 %v6481_v18  ;;  %5844 = vmatprep.mubr.msk.f32.mxu0 %vm6482_vm5, %v6483_v37 }
 0x555   :  { %5855 = vmatprep.mubr.msk.f32.mxu1 %vm6482_vm5, %v6483_v37 }
 0x556   :  { %6221 = vmatpush3.bf16.msra.mxu0 %v6846_v56 }
 0x557   :  { %6227 = vmatpush3.bf16.msra.mxu1 %v6852_v57  ;;  %6228 = vmatprep.subr.bf16.mxu0 %v6481_v18 }
 0x558   :  { %6234 = vmatprep.subr.bf16.mxu1 %v6481_v18 }
 0x559   :  { %5845 = vmatmul.mubr.msk.f32.vlgmr.msra.gmra.mrb[58].mxu0 %vm190_vm10, %v7255_v24 }
 0x55a   :  { %5856 = vmatmul.mubr.msk.f32.vlgmr.msra.gmra.mrb[58].mxu1 %vm190_vm10, %v7255_v24  ;;  %6230 = vmatpush3.bf16.msra.mxu0 %v6709_v25 }
 0x55b   :  { %6236 = vmatpush3.bf16.msra.mxu1 %v6711_v26  ;;  %6231 = vmatprep.subr.bf16.mxu0 %v6481_v18 }
 0x55c   :  { %6237 = vmatprep.subr.bf16.mxu1 %v6481_v18  ;;  %5866 = vmatprep.mubr.msk.f32.mxu0 %vm6482_vm5, %v6483_v37 }
 0x55d   :  { %5877 = vmatprep.mubr.msk.f32.mxu1 %vm6482_vm5, %v6483_v37 }
 0x55e   :  { %6233 = vmatpush3.bf16.msra.mxu0 %v6735_v31 }
 0x55f   :  { %6239 = vmatpush3.bf16.msra.mxu1 %v6737_v32  ;;  %6240 = vmatprep.subr.bf16.mxu0 %v6481_v18 }
 0x560   :  { %6246 = vmatprep.subr.bf16.mxu1 %v6481_v18 }
 0x61c   :  { %v3376_v55 = vpop.f32.mrb[54].mxu0  ;;  %v3446_v27 = vpop.f32.mrb[54].mxu1 }
 0x61d   :  { %v3522_v28 = vadd.f32 %v3521_v6, %v3376_v55  ;;  %v5802_v29 = vpop.f32.mrb[55].mxu0  ;;  %v5813_v33 = vpop.f32.mrb[55].mxu1  ;;  %v3531_v41 = vadd.f32 %v3530_v40, %v3446_v27  ;;  %v3780_v55 = vld [vmem:[#allocation7 + $0x10] sm:$0xff] }
 0x61f   :  { %v5044_v35 = vmul.f32 -1.442695, %v3522_v28  ;;  %v5045_v16 = vmul.f32 -1.442695, %v3531_v41 }
 0x621   :  { %6418 = vpow2.f32 %v5044_v35 }
 0x622   :  { %6420 = vpow2.f32 %v5045_v16 }
 0x624   :  { %v3516_v42 = vpop.f32.mrb[56].mxu0 }
 0x625   :  { %v3617_v47 = vpop.f32.mrb[56].mxu1  ;;  %v5824_v51 = vpop.f32.mrb[57].mxu0  ;;  %v3517_v14 = vadd.f32 %v7292_v13, %v3516_v42 }
 0x626   :  { %v3763_v49 = vadd.f32 %v3762_v23, %v3617_v47  ;;  %v5835_v52 = vpop.f32.mrb[57].mxu1 }
 0x628   :  { %v5049_v54 = vmul.f32 -1.442695, %v3763_v49 }
 0x62a   :  { %6422 = vpow2.f32 %v5049_v54 }
 0x62b   :  { %v6419_v58 = vpop.eup %6418 }
 0x62c   :  { %v3526_v59 = vadd.f32 1.0, %v6419_v58  ;;  %v3687_v60 = vpop.f32.mrb[58].mxu0  ;;  %v6421_v48 = vpop.eup %6420  ;;  %v4012_v58 = vld [vmem:[#allocation3 + $0x30] sm:$0xff] }
 0x62d   :  { %v3757_v0 = vpop.f32.mrb[58].mxu1  ;;  %v3772_v1 = vadd.f32 %v3771_v62, %v3687_v60  ;;  %v5846_v36 = vpop.f32.mrb[59].mxu0  ;;  %v3535_v12 = vadd.f32 1.0, %v6421_v48 }
 0x62e   :  { %v5857_v4 = vpop.f32.mrb[59].mxu1  ;;  %6424 = vrcp.f32 %v3526_v59  ;;  %v3758_v63 = vadd.f32 %v7298_v22, %v3757_v0 }
 0x62f   :  { %v5050_v5 = vmul.f32 -1.442695, %v3772_v1 }
 0x631   :  { %6426 = vpow2.f32 %v5050_v5 }
 0x634   :  { %v6423_v8 = vpop.eup %6422 }
 0x635   :  { %v3767_v10 = vadd.f32 1.0, %v6423_v8 }
 0x637   :  { %6428 = vrcp.f32 %v3767_v10  ;;  %v4253_v10 = vld [vmem:[#allocation6 + $0x8] sm:$0xff] }
 0x638   :  { %v6425_v15 = vpop.eup %6424  ;;  %6430 = vrcp.f32 %v3535_v12 }
 0x639   :  { %v3540_v34 = vmul.f32 %v6425_v15, %v3517_v14 }
 0x63b   :  { %v6427_v19 = vpop.eup %6426  ;;  %v3541_v20 = vadd.f32 %v3540_v34, %v3539_v17 }
 0x63c   :  { %v3776_v43 = vadd.f32 1.0, %v6427_v19 }
 0x63d   :  { %6432 = vtanh.f32 %v3541_v20 }
 0x63e   :  { %6434 = vrcp.f32 %v3776_v43 }
 0x641   :  { %v6429_v3 = vpop.eup %6428 }
 0x642   :  { %v3781_v9 = vmul.f32 %v6429_v3, %v3758_v63  ;;  %v6431_v6 = vpop.eup %6430 }
 0x643   :  { %v3543_v28 = vsub.f32 1.0, %v6431_v6  ;;  %v3545_v35 = vmul.f32 %v6431_v6, %v7233_v2  ;;  %v4021_v6 = vld [vmem:[#allocation4 + $0x30] sm:$0xff] }
 0x644   :  { %v3782_v27 = vadd.f32 %v3781_v9, %v3780_v55 }
 0x646   :  { %6436 = vtanh.f32 %v3782_v27 }
 0x647   :  { %v6433_v29 = vpop.eup %6432 }
 0x648   :  { %v3544_v33 = vmul.f32 %v6433_v29, %v3543_v28  ;;  %v6435_v41 = vpop.eup %6434 }
 0x649   :  { %v3784_v42 = vsub.f32 1.0, %v6435_v41 }
 0x64a   :  { %v3546_v40 = vadd.f32 %v3545_v35, %v3544_v33 }
 0x64c   :  { %v7305_v16 = vsel %vm2329_vm0, %v3546_v40, %v7233_v2  ;;  %v3786_v2 = vmul.f32 %v6435_v41, %v7255_v24  ;;  %v4262_v41 = vld [vmem:[#allocation7 + $0x8] sm:$0xff] }
 0x64d   :  { %5867 = vmatmul.mubr.msk.f32.vlgmr.msra.gmra.mrb[60].mxu0 %vm190_vm10, %v7305_v16  ;;  %5878 = vmatmul.mubr.msk.f32.vlgmr.msra.gmra.mrb[60].mxu1 %vm190_vm10, %v7305_v16 }
 0x64e   :  { %6242 = vmatpush3.bf16.msra.mxu0 %v6781_v38  ;;  %6248 = vmatpush3.bf16.msra.mxu1 %v6783_v39 }
 0x64f   :  { %6243 = vmatprep.subr.bf16.mxu0 %v6481_v18  ;;  %6249 = vmatprep.subr.bf16.mxu1 %v6481_v18 }
 0x650   :  { %v6437_v47 = vpop.eup %6436  ;;  %5888 = vmatprep.mubr.msk.f32.mxu0 %vm6482_vm5, %v6483_v37  ;;  %5899 = vmatprep.mubr.msk.f32.mxu1 %vm6482_vm5, %v6483_v37 }
 0x651   :  { %v3785_v46 = vmul.f32 %v6437_v47, %v3784_v42 }
 0x652   :  { %6245 = vmatpush3.bf16.msra.mxu0 %v6801_v44  ;;  %6251 = vmatpush3.bf16.msra.mxu1 %v6803_v45 }
 0x653   :  { %v3787_v23 = vadd.f32 %v3786_v2, %v3785_v46  ;;  %6252 = vmatprep.subr.bf16.mxu0 %v6481_v18  ;;  %6258 = vmatprep.subr.bf16.mxu1 %v6481_v18 }
 0x655   :  { %v7327_v49 = vsel %vm2082_vm15, %v3787_v23, %v7255_v24  ;;  %5889 = vmatmul.mubr.msk.f32.vlgmr.msra.gmra.mrb[62].mxu0 %vm190_vm10, %v7305_v16 }
 0x656   :  { %5900 = vmatmul.mubr.msk.f32.vlgmr.msra.gmra.mrb[62].mxu1 %vm190_vm10, %v7327_v49  ;;  %6254 = vmatpush3.bf16.msra.mxu0 %v6825_v50 }
 0x657   :  { %6260 = vmatpush3.bf16.msra.mxu1 %v6835_v53  ;;  %6255 = vmatprep.subr.bf16.mxu0 %v6481_v18 }
 0x658   :  { %6261 = vmatprep.subr.bf16.mxu1 %v6481_v18  ;;  %5910 = vmatprep.mubr.msk.f32.mxu0 %vm6482_vm5, %v6483_v37 }
 0x659   :  { %5921 = vmatprep.mubr.msk.f32.mxu1 %vm6482_vm5, %v6483_v37 }
 0x65a   :  { %6257 = vmatpush3.bf16.msra.mxu0 %v6846_v56 }
 0x65b   :  { %6263 = vmatpush3.bf16.msra.mxu1 %v6852_v57  ;;  %6264 = vmatprep.subr.bf16.mxu0 %v6481_v18 }
 0x65c   :  { %6270 = vmatprep.subr.bf16.mxu1 %v6481_v18 }
 0x65d   :  { %5911 = vmatmul.mubr.msk.f32.vlgmr.msra.gmra.mrb[64].mxu0 %vm190_vm10, %v7327_v49 }
 0x65e   :  { %5922 = vmatmul.mubr.msk.f32.vlgmr.msra.gmra.mrb[64].mxu1 %vm190_vm10, %v7327_v49  ;;  %6266 = vmatpush3.bf16.msra.mxu0 %v6709_v25 }
 0x65f   :  { %6272 = vmatpush3.bf16.msra.mxu1 %v6711_v26  ;;  %6267 = vmatprep.subr.bf16.mxu0 %v6481_v18  ;;  %v4003_v26 = vld [vmem:[#allocation2 + $0x30] sm:$0xff] }
 0x660   :  { %6273 = vmatprep.subr.bf16.mxu1 %v6481_v18  ;;  %5932 = vmatprep.mubr.msk.f32.mxu0 %vm6482_vm5, %v6483_v37 }
 0x661   :  { %5943 = vmatprep.mubr.msk.f32.mxu1 %vm6482_vm5, %v6483_v37 }
 0x662   :  { %6269 = vmatpush3.bf16.msra.mxu0 %v6735_v31  ;;  %v4244_v31 = vld [vmem:[#allocation5 + $0x8] sm:$0xff] }
 0x663   :  { %6275 = vmatpush3.bf16.msra.mxu1 %v6737_v32  ;;  %6276 = vmatprep.subr.bf16.mxu0 %v6481_v18 }
 0x664   :  { %6282 = vmatprep.subr.bf16.mxu1 %v6481_v18 }
 0x720   :  { %v3858_v25 = vpop.f32.mrb[60].mxu0  ;;  %v3928_v30 = vpop.f32.mrb[60].mxu1 }
 0x721   :  { %v4004_v24 = vadd.f32 %v4003_v26, %v3858_v25  ;;  %v5868_v51 = vpop.f32.mrb[61].mxu0  ;;  %v5879_v52 = vpop.f32.mrb[61].mxu1  ;;  %v4013_v59 = vadd.f32 %v4012_v58, %v3928_v30  ;;  %v4757_v58 = vld [vmem:[%s7470_s11 + $0x18] sm:$0xff] }
 0x723   :  { %v5054_v54 = vmul.f32 -1.442695, %v4004_v24  ;;  %v5055_v60 = vmul.f32 -1.442695, %v4013_v59 }
 0x725   :  { %6438 = vpow2.f32 %v5054_v54  ;;  %v4756_v54 = vld [vmem:[%s7470_s11 + $0x10] sm:$0xff] }
 0x726   :  { %6440 = vpow2.f32 %v5055_v60  ;;  %v6304_v59 = vpack.c.bf16 %v4757_v58, %v4756_v54 }
 0x728   :  { %v3998_v62 = vpop.f32.mrb[62].mxu0 }
 0x729   :  { %v4099_v0 = vpop.f32.mrb[62].mxu1  ;;  %v5890_v32 = vpop.f32.mrb[63].mxu0  ;;  %v3999_v3 = vadd.f32 %v7292_v13, %v3998_v62  ;;  %v4485_v62 = vld [vmem:[#allocation2 + $0x38] sm:$0xff] }
 0x72a   :  { %v4245_v1 = vadd.f32 %v4244_v31, %v4099_v0  ;;  %v5901_v36 = vpop.f32.mrb[63].mxu1 }
 0x72c   :  { %v5059_v4 = vmul.f32 -1.442695, %v4245_v1 }
 0x72e   :  { %6442 = vpow2.f32 %v5059_v4  ;;  %v4494_v4 = vld [vmem:[#allocation3 + $0x38] sm:$0xff] }
 0x72f   :  { %v6439_v5 = vpop.eup %6438 }
 0x730   :  { %v4008_v48 = vadd.f32 1.0, %v6439_v5  ;;  %v4169_v8 = vpop.f32.mrb[64].mxu0  ;;  %v6441_v19 = vpop.eup %6440 }
 0x731   :  { %v4239_v12 = vpop.f32.mrb[64].mxu1  ;;  %v4254_v14 = vadd.f32 %v4253_v10, %v4169_v8  ;;  %v5912_v15 = vpop.f32.mrb[65].mxu0  ;;  %v4017_v63 = vadd.f32 1.0, %v6441_v19  ;;  %v4725_v10 = vld [vmem:[#allocation5] sm:$0xff] }
 0x732   :  { %v5923_v34 = vpop.f32.mrb[65].mxu1  ;;  %6444 = vrcp.f32 %v4008_v48  ;;  %v4240_v33 = vadd.f32 %v7298_v22, %v4239_v12 }
 0x733   :  { %v5060_v17 = vmul.f32 -1.442695, %v4254_v14 }
 0x735   :  { %6446 = vpow2.f32 %v5060_v17 }
 0x738   :  { %v6443_v20 = vpop.eup %6442 }
 0x739   :  { %v4249_v43 = vadd.f32 1.0, %v6443_v20 }
 0x73b   :  { %6448 = vrcp.f32 %v4249_v43  ;;  %v4733_v43 = vld [vmem:[#allocation6] sm:$0xff] }
 0x73c   :  { %v6445_v9 = vpop.eup %6444  ;;  %6450 = vrcp.f32 %v4017_v63 }
 0x73d   :  { %v4022_v55 = vmul.f32 %v6445_v9, %v3999_v3 }
 0x73f   :  { %v6447_v27 = vpop.eup %6446  ;;  %v4023_v28 = vadd.f32 %v4022_v55, %v4021_v6 }
 0x740   :  { %v4258_v29 = vadd.f32 1.0, %v6447_v27 }
 0x741   :  { %6452 = vtanh.f32 %v4023_v28 }
 0x742   :  { %6454 = vrcp.f32 %v4258_v29 }
 0x745   :  { %v6449_v35 = vpop.eup %6448 }
 0x746   :  { %v4263_v40 = vmul.f32 %v6449_v35, %v4240_v33  ;;  %v6451_v42 = vpop.eup %6450 }
 0x747   :  { %v4025_v46 = vsub.f32 1.0, %v6451_v42  ;;  %v4027_v25 = vmul.f32 %v6451_v42, %v7305_v16  ;;  %v4503_v42 = vld [vmem:[#allocation4 + $0x38] sm:$0xff] }
 0x748   :  { %v4264_v47 = vadd.f32 %v4263_v40, %v4262_v41 }
 0x74a   :  { %6456 = vtanh.f32 %v4264_v47 }
 0x74b   :  { %v6453_v2 = vpop.eup %6452 }
 0x74c   :  { %v4026_v23 = vmul.f32 %v6453_v2, %v4025_v46  ;;  %v6455_v30 = vpop.eup %6454 }
 0x74d   :  { %v4266_v51 = vsub.f32 1.0, %v6455_v30 }
 0x74e   :  { %v4028_v26 = vadd.f32 %v4027_v25, %v4026_v23 }
 0x750   :  { %v7367_v24 = vsel %vm1835_vm14, %v4028_v26, %v7305_v16  ;;  %v4268_v16 = vmul.f32 %v6455_v30, %v7327_v49  ;;  %v4741_v30 = vld [vmem:[#allocation7] sm:$0xff] }
 0x751   :  { %5933 = vmatmul.mubr.msk.f32.vlgmr.msra.gmra.mrb[66].mxu0 %vm190_vm10, %v7367_v24  ;;  %5944 = vmatmul.mubr.msk.f32.vlgmr.msra.gmra.mrb[66].mxu1 %vm190_vm10, %v7367_v24 }
 0x752   :  { %6278 = vmatpush3.bf16.msra.mxu0 %v6781_v38  ;;  %6284 = vmatpush3.bf16.msra.mxu1 %v6783_v39 }
 0x753   :  { %6279 = vmatprep.subr.bf16.mxu0 %v6481_v18  ;;  %6285 = vmatprep.subr.bf16.mxu1 %v6481_v18 }
 0x754   :  { %v6457_v52 = vpop.eup %6456  ;;  %5954 = vmatprep.mubr.msk.f32.mxu0 %vm6482_vm5, %v6483_v37  ;;  %5965 = vmatprep.mubr.msk.f32.mxu1 %vm6482_vm5, %v6483_v37 }
 0x755   :  { %v4267_v21 = vmul.f32 %v6457_v52, %v4266_v51 }
 0x756   :  { %6281 = vmatpush3.bf16.msra.mxu0 %v6801_v44  ;;  %6287 = vmatpush3.bf16.msra.mxu1 %v6803_v45  ;;  %v4750_v44 = vld [vmem:[%s7469_s10] sm:$0xff]  ;;  %v4751_v45 = vld [vmem:[%s7469_s10 + $0x8] sm:$0xff] }
 0x757   :  { %v4269_v38 = vadd.f32 %v4268_v16, %v4267_v21  ;;  %6288 = vmatprep.subr.bf16.mxu0 %v6481_v18  ;;  %6294 = vmatprep.subr.bf16.mxu1 %v6481_v18 }
 0x759   :  { %v7389_v39 = vsel %vm1588_vm13, %v4269_v38, %v7327_v49  ;;  %5955 = vmatmul.mubr.msk.f32.vlgmr.msra.gmra.mrb[68].mxu0 %vm190_vm10, %v7367_v24 }
 0x75a   :  { %5966 = vmatmul.mubr.msk.f32.vlgmr.msra.gmra.mrb[68].mxu1 %vm190_vm10, %v7389_v39  ;;  %6290 = vmatpush3.bf16.msra.mxu0 %v6825_v50  ;;  %v6307_v50 = vpack.c.bf16 %v4751_v45, %v4750_v44 }
 0x75b   :  { %6296 = vmatpush3.bf16.msra.mxu1 %v6835_v53  ;;  %6291 = vmatprep.subr.bf16.mxu0 %v6481_v18  ;;  %v4752_v53 = vld [vmem:[%s7469_s10 + $0x10] sm:$0xff] }
 0x75c   :  { %6297 = vmatprep.subr.bf16.mxu1 %v6481_v18  ;;  %5976 = vmatprep.mubr.msk.f32.mxu0 %vm6482_vm5, %v6483_v37 }
 0x75d   :  { %5987 = vmatprep.mubr.msk.f32.mxu1 %vm6482_vm5, %v6483_v37 }
 0x75e   :  { %6293 = vmatpush3.bf16.msra.mxu0 %v6846_v56  ;;  %v4753_v56 = vld [vmem:[%s7469_s10 + $0x18] sm:$0xff] }
 0x75f   :  { %6299 = vmatpush3.bf16.msra.mxu1 %v6852_v57  ;;  %6300 = vmatprep.subr.bf16.mxu0 %v6481_v18  ;;  %v4755_v57 = vld [vmem:[%s7470_s11 + $0x8] sm:$0xff]  ;;  %v6310_v11 = vpack.c.bf16 %v4753_v56, %v4752_v53 }
 0x760   :  { %6306 = vmatprep.subr.bf16.mxu1 %v6481_v18 }
 0x761   :  { %5977 = vmatmul.mubr.msk.f32.vlgmr.msra.gmra.mrb[70].mxu0 %vm190_vm10, %v7389_v39 }
 0x762   :  { %5988 = vmatmul.mubr.msk.f32.vlgmr.msra.gmra.mrb[70].mxu1 %vm190_vm10, %v7389_v39  ;;  %5998 = vmatprep.mubr.msk.f32.mxu0 %vm6482_vm5, %v6483_v37 }
 0x763   :  { %6009 = vmatprep.mubr.msk.f32.mxu1 %vm6482_vm5, %v6483_v37  ;;  %v4754_v37 = vld [vmem:[%s7470_s11] sm:$0xff]  ;;  %6308 = vmatpush3.bf16.msra.mxu1 %v6307_v50 }
 0x764   :  { %v6301_v49 = vpack.c.bf16 %v4755_v57, %v4754_v37  ;;  %6309 = vmatprep.subr.bf16.mxu1 %v6481_v18 }
 0x766   :  { %6302 = vmatpush3.bf16.msra.mxu0 %v6301_v49 }
 0x767   :  { %6303 = vmatprep.subr.bf16.mxu0 %v6481_v18  ;;  %6311 = vmatpush3.bf16.msra.mxu1 %v6310_v11 }
 0x76a   :  { %6305 = vmatpush3.bf16.msra.mxu0 %v6304_v59 }
 0x824   :  { %v4340_v60 = vpop.f32.mrb[66].mxu0  ;;  %v4410_v0 = vpop.f32.mrb[66].mxu1 }
 0x825   :  { %v4486_v31 = vadd.f32 %v4485_v62, %v4340_v60  ;;  %v5934_v1 = vpop.f32.mrb[67].mxu0  ;;  %v5945_v32 = vpop.f32.mrb[67].mxu1  ;;  %v4495_v18 = vadd.f32 %v4494_v4, %v4410_v0 }
 0x827   :  { %v5064_v36 = vmul.f32 -1.442695, %v4486_v31  ;;  %v5065_v5 = vmul.f32 -1.442695, %v4495_v18 }
 0x829   :  { %6458 = vpow2.f32 %v5064_v36 }
 0x82a   :  { %6460 = vpow2.f32 %v5065_v5 }
 0x82c   :  { %v4480_v48 = vpop.f32.mrb[68].mxu0 }
 0x82d   :  { %v4581_v8 = vpop.f32.mrb[68].mxu1  ;;  %v5956_v14 = vpop.f32.mrb[69].mxu0  ;;  %v4481_v35 = vadd.f32 %v7292_v13, %v4480_v48 }
 0x82e   :  { %v4726_v12 = vadd.f32 %v4725_v10, %v4581_v8  ;;  %v5967_v15 = vpop.f32.mrb[69].mxu1 }
 0x830   :  { %v5069_v34 = vmul.f32 -1.442695, %v4726_v12 }
 0x832   :  { %6462 = vpow2.f32 %v5069_v34 }
 0x833   :  { %v6459_v17 = vpop.eup %6458 }
 0x834   :  { %v4490_v19 = vadd.f32 1.0, %v6459_v17  ;;  %v4651_v20 = vpop.f32.mrb[70].mxu0  ;;  %v6461_v27 = vpop.eup %6460 }
 0x835   :  { %v4721_v63 = vpop.f32.mrb[70].mxu1  ;;  %v4734_v3 = vadd.f32 %v4733_v43, %v4651_v20  ;;  %v5978_v9 = vpop.f32.mrb[71].mxu0  ;;  %v4499_v33 = vadd.f32 1.0, %v6461_v27 }
 0x836   :  { %v5989_v55 = vpop.f32.mrb[71].mxu1  ;;  %6464 = vrcp.f32 %v4490_v19  ;;  %v4722_v23 = vadd.f32 %v7298_v22, %v4721_v63 }
 0x837   :  { %v5070_v6 = vmul.f32 -1.442695, %v4734_v3 }
 0x839   :  { %6466 = vpow2.f32 %v5070_v6 }
 0x83c   :  { %v6463_v28 = vpop.eup %6462 }
 0x83d   :  { %v4730_v29 = vadd.f32 1.0, %v6463_v28 }
 0x83f   :  { %6468 = vrcp.f32 %v4730_v29 }
 0x840   :  { %v6465_v40 = vpop.eup %6464  ;;  %6470 = vrcp.f32 %v4499_v33 }
 0x841   :  { %v4504_v41 = vmul.f32 %v6465_v40, %v4481_v35 }
 0x843   :  { %v6467_v47 = vpop.eup %6466  ;;  %v4505_v46 = vadd.f32 %v4504_v41, %v4503_v42 }
 0x844   :  { %v4738_v2 = vadd.f32 1.0, %v6467_v47 }
 0x845   :  { %6472 = vtanh.f32 %v4505_v46 }
 0x846   :  { %6474 = vrcp.f32 %v4738_v2 }
 0x849   :  { %v6469_v25 = vpop.eup %6468 }
 0x84a   :  { %v4742_v26 = vmul.f32 %v6469_v25, %v4722_v23  ;;  %v6471_v51 = vpop.eup %6470 }
 0x84b   :  { %v4507_v21 = vsub.f32 1.0, %v6471_v51  ;;  %v4509_v38 = vmul.f32 %v6471_v51, %v7367_v24 }
 0x84c   :  { %v4743_v52 = vadd.f32 %v4742_v26, %v4741_v30 }
 0x84e   :  { %6476 = vtanh.f32 %v4743_v52 }
 0x84f   :  { %v6473_v16 = vpop.eup %6472 }
 0x850   :  { %v4508_v13 = vmul.f32 %v6473_v16, %v4507_v21  ;;  %v6475_v45 = vpop.eup %6474 }
 0x851   :  { %v4745_v22 = vsub.f32 1.0, %v6475_v45  ;;  %v4747_v37 = vmul.f32 %v6475_v45, %v7389_v39 }
 0x852   :  { %v4510_v44 = vadd.f32 %v4509_v38, %v4508_v13 }
 0x854   :  { %v4511_v50 = vsel %vm1341_vm12, %v4510_v44, %v7367_v24 }
 0x855   :  { %6010 = vmatmul.mubr.msk.f32.vlgmr.msra.gmra.mrb[72].mxu1 %vm190_vm10, %v4511_v50 }
 0x858   :  { %v6477_v53 = vpop.eup %6476 }
 0x859   :  { %v4746_v56 = vmul.f32 %v6477_v53, %v4745_v22 }
 0x85b   :  { %v4748_v57 = vadd.f32 %v4747_v37, %v4746_v56 }
 0x85d   :  { %v4749_v11 = vsel %vm1076_vm11, %v4748_v57, %v7389_v39 }
 0x85e   :  { %5999 = vmatmul.mubr.msk.f32.vlgmr.msra.gmra.mrb[72].mxu0 %vm190_vm10, %v4749_v11 }
 0x928   :  { %v4900_v49 = vpop.f32.mrb[72].mxu1 }
 0x929   :  { %v6011_v54 = vpop.f32.mrb[73].mxu1 }
 0x931   :  { %v4827_v58 = vpop.f32.mrb[72].mxu0 }
 0x932   :  { %v4901_v24 = vadd.f32 %v4900_v49, %v4827_v58  ;;  %v6000_v59 = vpop.f32.mrb[73].mxu0 }
 0x934   :  { %v4911_v60 = vadd.f32 %v5073_v7, %v4901_v24 }
 0x936   :  { %4912 = vst [vmem:[%s7472_s13] sm:$0xff] %v4911_v60 }

</bundles_post_ra>
